<compile_context>
chip_gen: v7x
topology: tpu7x:2x2x1
jax: 0.10.0
libtpu: 0.0.40
codegen_flags: <defaults>
</compile_context>

<pallas_src>
import jax
import jax.numpy as jnp
from jax.experimental import pallas as pl
from jax.experimental.pallas import tpu as pltpu

# ----------------------- small config consistent with the module -----------------
B       = 2      # batch
IN_C    = 3      # image channels
IMG_HW  = 32     # input spatial size
PATCH   = 8      # stand-in backbone downsample factor
FMAP_HW = IMG_HW // PATCH          # 4
HW      = FMAP_HW * FMAP_HW        # 16 spatial positions in the feature map
BACK_C  = 2048   # ResNet-101 trunk output channels
FEAT_D  = 64     # imageFeatureDim (module default 1024, shrunk)
INTER_D = 32     # intermediaDim
CLS     = 8      # classNum
WORD_D  = 16     # wordFeatureDim
OUT_D   = 64     # outputDim
TIME_T  = 3      # timeStep
BN_EPS  = 1e-5

VMEM = pltpu.MemorySpace.VMEM


# ------------------------------ fused forward kernel -----------------------------
def _fused_forward_kernel(
        # stage 1/2: backbone stub + changeChannel (BN folded into ccw/ccb)
        patches_ref, bw_ref, ccw_ref, ccb_ref,
        # stage 3: SemanticDecoupling (fc3∘fc4 composed into w34/b34)
        word_ref, w1_ref, w2_ref, w34_ref, b34_ref,
        # stage 4: GatedGNN (stacked gate weights, block-diag adjacency over batch)
        inm_ref, outm_ref, gw_ref, gb_ref, uw_ref, ub_ref, w5u_ref, b5u_ref,
        # stage 5: head (fc + tanh + Element_Wise_Layer)
        fcw_ref, fcb_ref, clsw_ref, clsb_ref,
        # output
        out_ref):
    f32 = jnp.float32

    # ---- 1. backbone stand-in: strided patchify projection + ReLU (bf16 MXU) ----
    # TODO(synk): full ResNet-101 trunk is not reimplemented; stand-in is a single
    # strided patchify projection to 2048 channels + ReLU.
    fmap2048 = jnp.maximum(
        jnp.dot(patches_ref[...], bw_ref[...], preferred_element_type=f32), 0.0)

    # ---- 2. changeChannel: 1x1 conv with BatchNorm (inference) folded in ----
    fmap = jnp.dot(fmap2048.astype(jnp.bfloat16), ccw_ref[...],
                   preferred_element_type=f32) + ccb_ref[...]                # (B*HW, D)

    # ---- 3. SemanticDecoupling, vectorized over (batch, class, position) ----
    img_f = jnp.dot(fmap, w1_ref[...], preferred_element_type=f32)           # (B*HW, I)
    word_f = jnp.dot(word_ref[...], w2_ref[...], preferred_element_type=f32) # (CLS, I)
    f = jnp.tanh(img_f.reshape(B, 1, HW, INTER_D) *
                 word_f.reshape(1, CLS, 1, INTER_D))                         # (B,CLS,HW,I)
    f = f.reshape(B * CLS, HW, INTER_D)
    # fc3 and fc4 have no activation between them -> composed into (w34, b34).
    coef = jnp.sum(f * w34_ref[...], axis=-1) + b34_ref[...]                 # (B*CLS, HW)
    coef = coef - jnp.max(coef, axis=-1, keepdims=True)                      # softmax over HW
    e = jnp.exp(coef)
    p = e / jnp.sum(e, axis=-1, keepdims=True)
    sem = jnp.einsum('bch,bhd->bcd', p.reshape(B, CLS, HW),
                     fmap.reshape(B, HW, FEAT_D),
                     preferred_element_type=f32)                             # (B, CLS, D)
    sem2 = sem.reshape(B * CLS, FEAT_D)                                      # (B*CLS, D)

    # ---- 4. Gated GNN: TIME_T iterations, batched over all B*CLS nodes ----
    def ggnn_step(_, nodes):                                                 # (B*CLS, D)
        a_in = jnp.dot(inm_ref[...], nodes, preferred_element_type=f32)
        a_out = jnp.dot(outm_ref[...], nodes, preferred_element_type=f32)
        a_cat = jnp.concatenate([a_in, a_out], axis=-1)                      # (B*CLS, 2D)
        gates = jnp.dot(a_cat, gw_ref[...],
                        preferred_element_type=f32) + gb_ref[...]            # (B*CLS, 3D)
        zr = jnp.dot(nodes, uw_ref[...],
                     preferred_element_type=f32) + ub_ref[...]               # (B*CLS, 2D)
        z = jax.nn.sigmoid(gates[:, :FEAT_D] + zr[:, :FEAT_D])
        r = jax.nn.sigmoid(gates[:, FEAT_D:2 * FEAT_D] + zr[:, FEAT_D:])
        h = jnp.tanh(gates[:, 2 * FEAT_D:] +
                     jnp.dot(r * nodes, w5u_ref[...],
                             preferred_element_type=f32) + b5u_ref[...])
        return (1.0 - z) * nodes + z * h

    feat = jax.lax.fori_loop(0, TIME_T, ggnn_step, sem2, unroll=True)        # (B*CLS, D)

    # ---- 5. head: fc(cat(feature, semanticFeature)) -> tanh -> Element_Wise ----
    x_cat = jnp.concatenate([feat, sem2], axis=-1)                           # (B*CLS, 2D)
    h = jnp.tanh(jnp.dot(x_cat, fcw_ref[...],
                         preferred_element_type=f32) + fcb_ref[...])         # (B*CLS, O)
    h3 = h.reshape(B, CLS, OUT_D)
    out_ref[...] = jnp.sum(h3 * clsw_ref[...][None, :, :], axis=-1) + clsb_ref[...]


# -------------------- one-time, host-side parameter preparation ------------------
def prepare_params(p):
    """Fold BN into the 1x1 conv, compose fc3∘fc4, stack GGNN gate weights, and
    build the block-diagonal adjacency.  Pure algebra; done once, off the kernel."""
    # BatchNorm2d (inference) folded into the 1x1 conv: w' = w*scale, b' = beta - mean*scale
    scale = p["bn_gamma"] * jax.lax.rsqrt(p["bn_var"] + BN_EPS)              # (1, FEAT_D)
    cc_w = (p["cc_w"] * scale).astype(jnp.bfloat16)
    cc_b = p["bn_beta"] - p["bn_mean"] * scale

    # SemanticDecoupling fc3 then fc4 (no activation between) compose exactly:
    # coef = (f@w3+b3)@w4.T + b4 = f@(w3@w4.T) + (b3@w4.T + b4)
    sd_w34 = p["sd_w4"] @ p["sd_w3"].T                                       # (1, INTER_D)
    sd_b34 = p["sd_b3"] @ p["sd_w4"].T + p["sd_b4"]                          # (1, 1)

    # GGNN gate weights stacked: one (2D,3D) W for cat(a_in,a_out), one (D,2D) U.
    w3w, b3w, w3u, b3u, w4w, b4w, w4u, b4u, w5w, b5w, w5u, b5u = p["ggnn"]
    gw = jnp.concatenate([w3w, w4w, w5w], axis=1)                            # (2D, 3D)
    gb = jnp.concatenate([b3w, b4w, b5w], axis=1)                            # (1, 3D)
    uw = jnp.concatenate([w3u, w4u], axis=1)                                 # (D, 2D)
    ub = jnp.concatenate([b3u, b4u], axis=1)                                 # (1, 2D)

    # Block-diagonal adjacency so the GGNN runs on all (B*CLS) nodes at once.
    eye_b = jnp.eye(B, dtype=jnp.float32)
    in_blk = jnp.kron(eye_b, p["in_matrix"])                                 # (B*CLS, B*CLS)
    out_blk = jnp.kron(eye_b, p["out_matrix"])

    return dict(
        backbone_w=p["backbone_w"].astype(jnp.bfloat16),
        cc_w=cc_w, cc_b=cc_b,
        word_features=p["word_features"],
        sd_w1=p["sd_w1"], sd_w2=p["sd_w2"], sd_w34=sd_w34, sd_b34=sd_b34,
        in_blk=in_blk, out_blk=out_blk,
        gw=gw, gb=gb, uw=uw, ub=ub, w5u=w5u, b5u=b5u,
        fc_w=p["fc_w"], fc_b=p["fc_b"],
        cls_w=p["cls_w"], cls_b=p["cls_b"].reshape(1, CLS),
    )


# ------------------------------------ wrapper ------------------------------------
def backbone_forward(x, pp):
    bn, cin, h, w = x.shape
    # NCHW -> NHWC -> non-overlapping PATCH x PATCH patches, flattened row-major.
    x_nhwc = jnp.transpose(x, (0, 2, 3, 1))
    hp, wp = h // PATCH, w // PATCH
    patches = x_nhwc.reshape(bn, hp, PATCH, wp, PATCH, cin)
    patches = patches.transpose(0, 1, 3, 2, 4, 5).reshape(bn * hp * wp, PATCH * PATCH * cin)

    args = (patches.astype(jnp.bfloat16),
            pp["backbone_w"], pp["cc_w"], pp["cc_b"],
            pp["word_features"], pp["sd_w1"], pp["sd_w2"], pp["sd_w34"], pp["sd_b34"],
            pp["in_blk"], pp["out_blk"],
            pp["gw"], pp["gb"], pp["uw"], pp["ub"], pp["w5u"], pp["b5u"],
            pp["fc_w"], pp["fc_b"], pp["cls_w"], pp["cls_b"])

    return pl.pallas_call(
        _fused_forward_kernel,
        out_shape=jax.ShapeDtypeStruct((bn, CLS), jnp.float32),
        in_specs=[pl.BlockSpec(memory_space=VMEM)] * len(args),
        out_specs=pl.BlockSpec(memory_space=VMEM),
    )(*args)                                                                 # (B, classNum)


# ------------------------------- deterministic init -------------------------------
def init_params(key):
    ks = iter(jax.random.split(key, 40))

    def nrm(shape, fan_in):
        return (jax.random.normal(next(ks), shape, jnp.float32) / jnp.sqrt(float(fan_in)))

    p = {}
    p["backbone_w"] = nrm((PATCH * PATCH * IN_C, BACK_C), PATCH * PATCH * IN_C)
    p["cc_w"] = nrm((BACK_C, FEAT_D), BACK_C)
    p["bn_gamma"] = 1.0 + 0.1 * jax.random.normal(next(ks), (1, FEAT_D), jnp.float32)
    p["bn_beta"] = 0.1 * jax.random.normal(next(ks), (1, FEAT_D), jnp.float32)
    p["bn_mean"] = 0.1 * jax.random.normal(next(ks), (1, FEAT_D), jnp.float32)
    p["bn_var"] = jax.random.uniform(next(ks), (1, FEAT_D), jnp.float32, 0.5, 1.5)

    p["word_features"] = jax.random.normal(next(ks), (CLS, WORD_D), jnp.float32)
    adj = jax.random.uniform(next(ks), (CLS, CLS), jnp.float32)
    p["in_matrix"], p["out_matrix"] = adj, adj.T

    p["sd_w1"] = nrm((FEAT_D, INTER_D), FEAT_D)
    p["sd_w2"] = nrm((WORD_D, INTER_D), WORD_D)
    p["sd_w3"] = nrm((INTER_D, INTER_D), INTER_D)
    p["sd_b3"] = 0.1 * jax.random.normal(next(ks), (1, INTER_D), jnp.float32)
    p["sd_w4"] = nrm((1, INTER_D), INTER_D)     # fc4 weight stored as a row vector
    p["sd_b4"] = 0.1 * jax.random.normal(next(ks), (1, 1), jnp.float32)

    ggnn = []
    for _ in range(3):                           # eq3 (z), eq4 (r), eq5 (h)
        ggnn.append(nrm((2 * FEAT_D, FEAT_D), 2 * FEAT_D))                   # W on a_v
        ggnn.append(0.1 * jax.random.normal(next(ks), (1, FEAT_D), jnp.float32))
        ggnn.append(nrm((FEAT_D, FEAT_D), FEAT_D))                           # U on h_v
        ggnn.append(0.1 * jax.random.normal(next(ks), (1, FEAT_D), jnp.float32))
    p["ggnn"] = tuple(ggnn)

    p["fc_w"] = nrm((2 * FEAT_D, OUT_D), 2 * FEAT_D)
    p["fc_b"] = 0.1 * jax.random.normal(next(ks), (1, OUT_D), jnp.float32)
    p["cls_w"] = nrm((CLS, OUT_D), OUT_D)
    p["cls_b"] = 0.1 * jax.random.normal(next(ks), (CLS,), jnp.float32)
    return p


if __name__ == "__main__":
    root = jax.random.PRNGKey(0)
    kx, kp = jax.random.split(root)
    x = jax.random.normal(kx, (B, IN_C, IMG_HW, IMG_HW), jnp.float32)   # NCHW, like PyTorch
    params = init_params(kp)
    prepped = prepare_params(params)

    result = backbone_forward(x, prepped)
    result = jax.block_until_ready(result)

    assert result.shape == (B, CLS), result.shape
    assert bool(jnp.all(jnp.isfinite(result)))
    print("KERNEL_OK")
</pallas_src>

<mosaic_0001>
module attributes {stable_mosaic.version = 11 : i64} {
  func.func @_fused_forward_kernel(%arg0: memref<32x192xbf16, #tpu.memory_space<vmem>>, %arg1: memref<192x2048xbf16, #tpu.memory_space<vmem>>, %arg2: memref<2048x64xbf16, #tpu.memory_space<vmem>>, %arg3: memref<1x64xf32, #tpu.memory_space<vmem>>, %arg4: memref<8x16xf32, #tpu.memory_space<vmem>>, %arg5: memref<64x32xf32, #tpu.memory_space<vmem>>, %arg6: memref<16x32xf32, #tpu.memory_space<vmem>>, %arg7: memref<1x32xf32, #tpu.memory_space<vmem>>, %arg8: memref<1x1xf32, #tpu.memory_space<vmem>>, %arg9: memref<16x16xf32, #tpu.memory_space<vmem>>, %arg10: memref<16x16xf32, #tpu.memory_space<vmem>>, %arg11: memref<128x192xf32, #tpu.memory_space<vmem>>, %arg12: memref<1x192xf32, #tpu.memory_space<vmem>>, %arg13: memref<64x128xf32, #tpu.memory_space<vmem>>, %arg14: memref<1x128xf32, #tpu.memory_space<vmem>>, %arg15: memref<64x64xf32, #tpu.memory_space<vmem>>, %arg16: memref<1x64xf32, #tpu.memory_space<vmem>>, %arg17: memref<128x64xf32, #tpu.memory_space<vmem>>, %arg18: memref<1x64xf32, #tpu.memory_space<vmem>>, %arg19: memref<8x64xf32, #tpu.memory_space<vmem>>, %arg20: memref<1x8xf32, #tpu.memory_space<vmem>>, %arg21: memref<2x8xf32, #tpu.memory_space<vmem>>) attributes {dimension_semantics = [], scalar_prefetch = 0 : i64, scratch_operands = 0 : i64, tpu.core_type = #tpu.core_type<tc>} {
    %c0 = arith.constant 0 : index
    %c0_0 = arith.constant 0 : index
    %0 = vector.load %arg0[%c0, %c0_0] : memref<32x192xbf16, #tpu.memory_space<vmem>>, vector<32x192xbf16>
    %c0_1 = arith.constant 0 : index
    %c0_2 = arith.constant 0 : index
    %1 = vector.load %arg1[%c0_1, %c0_2] : memref<192x2048xbf16, #tpu.memory_space<vmem>>, vector<192x2048xbf16>
    %cst = arith.constant dense<0.000000e+00> : vector<32x2048xf32>
    %2 = tpu.matmul %0, %1, %cst {dimension_numbers = #tpu.dot_dimension_numbers<[1], [0], [0], [1], [0, 0, 1, 1], [], []>} : vector<32x192xbf16>, vector<192x2048xbf16>, vector<32x2048xf32> -> vector<32x2048xf32>
    %cst_3 = arith.constant 0.000000e+00 : f32
    %3 = vector.broadcast %cst_3 : f32 to vector<32x2048xf32>
    %4 = arith.maximumf %2, %3 : vector<32x2048xf32>
    %5 = arith.truncf %4 : vector<32x2048xf32> to vector<32x2048xbf16>
    %c0_4 = arith.constant 0 : index
    %c0_5 = arith.constant 0 : index
    %6 = vector.load %arg2[%c0_4, %c0_5] : memref<2048x64xbf16, #tpu.memory_space<vmem>>, vector<2048x64xbf16>
    %cst_6 = arith.constant dense<0.000000e+00> : vector<32x64xf32>
    %7 = tpu.matmul %5, %6, %cst_6 {dimension_numbers = #tpu.dot_dimension_numbers<[1], [0], [0], [1], [0, 0, 1, 1], [], []>} : vector<32x2048xbf16>, vector<2048x64xbf16>, vector<32x64xf32> -> vector<32x64xf32>
    %c0_7 = arith.constant 0 : index
    %c0_8 = arith.constant 0 : index
    %8 = vector.load %arg3[%c0_7, %c0_8] : memref<1x64xf32, #tpu.memory_space<vmem>>, vector<1x64xf32>
    %9 = vector.broadcast %8 : vector<1x64xf32> to vector<32x64xf32>
    %10 = arith.addf %7, %9 : vector<32x64xf32>
    %c0_9 = arith.constant 0 : index
    %c0_10 = arith.constant 0 : index
    %11 = vector.load %arg5[%c0_9, %c0_10] : memref<64x32xf32, #tpu.memory_space<vmem>>, vector<64x32xf32>
    %cst_11 = arith.constant dense<0.000000e+00> : vector<32x32xf32>
    %12 = tpu.matmul %10, %11, %cst_11 {dimension_numbers = #tpu.dot_dimension_numbers<[1], [0], [0], [1], [0, 0, 1, 1], [], []>} : vector<32x64xf32>, vector<64x32xf32>, vector<32x32xf32> -> vector<32x32xf32>
    %c0_12 = arith.constant 0 : index
    %c0_13 = arith.constant 0 : index
    %13 = vector.load %arg4[%c0_12, %c0_13] : memref<8x16xf32, #tpu.memory_space<vmem>>, vector<8x16xf32>
    %c0_14 = arith.constant 0 : index
    %c0_15 = arith.constant 0 : index
    %14 = vector.load %arg6[%c0_14, %c0_15] : memref<16x32xf32, #tpu.memory_space<vmem>>, vector<16x32xf32>
    %cst_16 = arith.constant dense<0.000000e+00> : vector<8x32xf32>
    %15 = tpu.matmul %13, %14, %cst_16 {dimension_numbers = #tpu.dot_dimension_numbers<[1], [0], [0], [1], [0, 0, 1, 1], [], []>} : vector<8x16xf32>, vector<16x32xf32>, vector<8x32xf32> -> vector<8x32xf32>
    %16 = vector.shape_cast %12 : vector<32x32xf32> to vector<2x1x16x32xf32>
    %17 = vector.shape_cast %15 : vector<8x32xf32> to vector<1x8x1x32xf32>
    %18 = vector.broadcast %16 : vector<2x1x16x32xf32> to vector<2x8x16x32xf32>
    %19 = vector.broadcast %17 : vector<1x8x1x32xf32> to vector<2x8x16x32xf32>
    %20 = arith.mulf %18, %19 : vector<2x8x16x32xf32>
    %21 = math.tanh %20 : vector<2x8x16x32xf32>
    %22 = vector.shape_cast %21 : vector<2x8x16x32xf32> to vector<16x16x32xf32>
    %c0_17 = arith.constant 0 : index
    %c0_18 = arith.constant 0 : index
    %23 = vector.load %arg7[%c0_17, %c0_18] : memref<1x32xf32, #tpu.memory_space<vmem>>, vector<1x32xf32>
    %24 = vector.shape_cast %23 : vector<1x32xf32> to vector<1x1x32xf32>
    %25 = vector.broadcast %24 : vector<1x1x32xf32> to vector<16x16x32xf32>
    %26 = arith.mulf %22, %25 : vector<16x16x32xf32>
    %cst_19 = arith.constant dense<0.000000e+00> : vector<16x16xf32>
    %27 = vector.multi_reduction <add>, %26, %cst_19 [2] : vector<16x16x32xf32> to vector<16x16xf32>
    %c0_20 = arith.constant 0 : index
    %c0_21 = arith.constant 0 : index
    %28 = vector.load %arg8[%c0_20, %c0_21] : memref<1x1xf32, #tpu.memory_space<vmem>>, vector<1x1xf32>
    %29 = vector.broadcast %28 : vector<1x1xf32> to vector<16x16xf32>
    %30 = arith.addf %27, %29 : vector<16x16xf32>
    %cst_22 = arith.constant dense<0xFF800000> : vector<16xf32>
    %31 = vector.multi_reduction <maximumf>, %30, %cst_22 [1] : vector<16x16xf32> to vector<16xf32>
    %32 = vector.shape_cast %31 : vector<16xf32> to vector<16x1xf32>
    %33 = vector.broadcast %32 : vector<16x1xf32> to vector<16x16xf32>
    %34 = arith.subf %30, %33 : vector<16x16xf32>
    %35 = math.exp %34 : vector<16x16xf32>
    %cst_23 = arith.constant dense<0.000000e+00> : vector<16xf32>
    %36 = vector.multi_reduction <add>, %35, %cst_23 [1] : vector<16x16xf32> to vector<16xf32>
    %37 = vector.shape_cast %36 : vector<16xf32> to vector<16x1xf32>
    %38 = vector.broadcast %37 : vector<16x1xf32> to vector<16x16xf32>
    %39 = arith.divf %35, %38 : vector<16x16xf32>
    %40 = vector.shape_cast %39 : vector<16x16xf32> to vector<2x8x16xf32>
    %41 = vector.shape_cast %10 : vector<32x64xf32> to vector<2x16x64xf32>
    "tpu.trace_start"() <{level = 10 : i32, message = "bch,bhd->bcd"}> : () -> ()
    %cst_24 = arith.constant dense<0.000000e+00> : vector<2x8x64xf32>
    %42 = tpu.matmul %40, %41, %cst_24 {dimension_numbers = #tpu.dot_dimension_numbers<[2], [1], [1], [2], [0, 0, 0, 1, 1, 2], [0], [0]>} : vector<2x8x16xf32>, vector<2x16x64xf32>, vector<2x8x64xf32> -> vector<2x8x64xf32>
    "tpu.trace_stop"() : () -> ()
    %43 = vector.shape_cast %42 : vector<2x8x64xf32> to vector<16x64xf32>
    %c0_i32 = arith.constant 0 : i32
    %c0_25 = arith.constant 0 : index
    %c0_26 = arith.constant 0 : index
    %44 = vector.load %arg9[%c0_25, %c0_26] : memref<16x16xf32, #tpu.memory_space<vmem>>, vector<16x16xf32>
    %cst_27 = arith.constant dense<0.000000e+00> : vector<16x64xf32>
    %45 = tpu.matmul %44, %43, %cst_27 {dimension_numbers = #tpu.dot_dimension_numbers<[1], [0], [0], [1], [0, 0, 1, 1], [], []>} : vector<16x16xf32>, vector<16x64xf32>, vector<16x64xf32> -> vector<16x64xf32>
    %c0_28 = arith.constant 0 : index
    %c0_29 = arith.constant 0 : index
    %46 = vector.load %arg10[%c0_28, %c0_29] : memref<16x16xf32, #tpu.memory_space<vmem>>, vector<16x16xf32>
    %cst_30 = arith.constant dense<0.000000e+00> : vector<16x64xf32>
    %47 = tpu.matmul %46, %43, %cst_30 {dimension_numbers = #tpu.dot_dimension_numbers<[1], [0], [0], [1], [0, 0, 1, 1], [], []>} : vector<16x16xf32>, vector<16x64xf32>, vector<16x64xf32> -> vector<16x64xf32>
    %48 = tpu.concatenate %45, %47 in 1 : vector<16x64xf32>, vector<16x64xf32> -> vector<16x128xf32>
    %c0_31 = arith.constant 0 : index
    %c0_32 = arith.constant 0 : index
    %49 = vector.load %arg11[%c0_31, %c0_32] : memref<128x192xf32, #tpu.memory_space<vmem>>, vector<128x192xf32>
    %cst_33 = arith.constant dense<0.000000e+00> : vector<16x192xf32>
    %50 = tpu.matmul %48, %49, %cst_33 {dimension_numbers = #tpu.dot_dimension_numbers<[1], [0], [0], [1], [0, 0, 1, 1], [], []>} : vector<16x128xf32>, vector<128x192xf32>, vector<16x192xf32> -> vector<16x192xf32>
    %c0_34 = arith.constant 0 : index
    %c0_35 = arith.constant 0 : index
    %51 = vector.load %arg12[%c0_34, %c0_35] : memref<1x192xf32, #tpu.memory_space<vmem>>, vector<1x192xf32>
    %52 = vector.broadcast %51 : vector<1x192xf32> to vector<16x192xf32>
    %53 = arith.addf %50, %52 : vector<16x192xf32>
    %c0_36 = arith.constant 0 : index
    %c0_37 = arith.constant 0 : index
    %54 = vector.load %arg13[%c0_36, %c0_37] : memref<64x128xf32, #tpu.memory_space<vmem>>, vector<64x128xf32>
    %cst_38 = arith.constant dense<0.000000e+00> : vector<16x128xf32>
    %55 = tpu.matmul %43, %54, %cst_38 {dimension_numbers = #tpu.dot_dimension_numbers<[1], [0], [0], [1], [0, 0, 1, 1], [], []>} : vector<16x64xf32>, vector<64x128xf32>, vector<16x128xf32> -> vector<16x128xf32>
    %c0_39 = arith.constant 0 : index
    %c0_40 = arith.constant 0 : index
    %56 = vector.load %arg14[%c0_39, %c0_40] : memref<1x128xf32, #tpu.memory_space<vmem>>, vector<1x128xf32>
    %57 = vector.broadcast %56 : vector<1x128xf32> to vector<16x128xf32>
    %58 = arith.addf %55, %57 : vector<16x128xf32>
    %59 = vector.extract_strided_slice %53 {offsets = [0, 0], sizes = [16, 64], strides = [1, 1]} : vector<16x192xf32> to vector<16x64xf32>
    %60 = vector.extract_strided_slice %58 {offsets = [0, 0], sizes = [16, 64], strides = [1, 1]} : vector<16x128xf32> to vector<16x64xf32>
    %61 = arith.addf %59, %60 : vector<16x64xf32>
    %62 = arith.negf %61 : vector<16x64xf32>
    %63 = math.exp %62 : vector<16x64xf32>
    %cst_41 = arith.constant 1.000000e+00 : f32
    %64 = vector.broadcast %cst_41 : f32 to vector<16x64xf32>
    %65 = arith.addf %64, %63 : vector<16x64xf32>
    %66 = arith.divf %64, %65 : vector<16x64xf32>
    %67 = vector.extract_strided_slice %53 {offsets = [0, 64], sizes = [16, 64], strides = [1, 1]} : vector<16x192xf32> to vector<16x64xf32>
    %68 = vector.extract_strided_slice %58 {offsets = [0, 64], sizes = [16, 64], strides = [1, 1]} : vector<16x128xf32> to vector<16x64xf32>
    %69 = arith.addf %67, %68 : vector<16x64xf32>
    %70 = arith.negf %69 : vector<16x64xf32>
    %71 = math.exp %70 : vector<16x64xf32>
    %cst_42 = arith.constant 1.000000e+00 : f32
    %72 = vector.broadcast %cst_42 : f32 to vector<16x64xf32>
    %73 = arith.addf %72, %71 : vector<16x64xf32>
    %74 = arith.divf %72, %73 : vector<16x64xf32>
    %75 = vector.extract_strided_slice %53 {offsets = [0, 128], sizes = [16, 64], strides = [1, 1]} : vector<16x192xf32> to vector<16x64xf32>
    %76 = arith.mulf %74, %43 : vector<16x64xf32>
    %c0_43 = arith.constant 0 : index
    %c0_44 = arith.constant 0 : index
    %77 = vector.load %arg15[%c0_43, %c0_44] : memref<64x64xf32, #tpu.memory_space<vmem>>, vector<64x64xf32>
    %cst_45 = arith.constant dense<0.000000e+00> : vector<16x64xf32>
    %78 = tpu.matmul %76, %77, %cst_45 {dimension_numbers = #tpu.dot_dimension_numbers<[1], [0], [0], [1], [0, 0, 1, 1], [], []>} : vector<16x64xf32>, vector<64x64xf32>, vector<16x64xf32> -> vector<16x64xf32>
    %79 = arith.addf %75, %78 : vector<16x64xf32>
    %c0_46 = arith.constant 0 : index
    %c0_47 = arith.constant 0 : index
    %80 = vector.load %arg16[%c0_46, %c0_47] : memref<1x64xf32, #tpu.memory_space<vmem>>, vector<1x64xf32>
    %81 = vector.broadcast %80 : vector<1x64xf32> to vector<16x64xf32>
    %82 = arith.addf %79, %81 : vector<16x64xf32>
    %83 = math.tanh %82 : vector<16x64xf32>
    %cst_48 = arith.constant 1.000000e+00 : f32
    %84 = vector.broadcast %cst_48 : f32 to vector<16x64xf32>
    %85 = arith.subf %84, %66 : vector<16x64xf32>
    %86 = arith.mulf %85, %43 : vector<16x64xf32>
    %87 = arith.mulf %66, %83 : vector<16x64xf32>
    %88 = arith.addf %86, %87 : vector<16x64xf32>
    %c1_i32 = arith.constant 1 : i32
    %c0_49 = arith.constant 0 : index
    %c0_50 = arith.constant 0 : index
    %89 = vector.load %arg9[%c0_49, %c0_50] : memref<16x16xf32, #tpu.memory_space<vmem>>, vector<16x16xf32>
    %cst_51 = arith.constant dense<0.000000e+00> : vector<16x64xf32>
    %90 = tpu.matmul %89, %88, %cst_51 {dimension_numbers = #tpu.dot_dimension_numbers<[1], [0], [0], [1], [0, 0, 1, 1], [], []>} : vector<16x16xf32>, vector<16x64xf32>, vector<16x64xf32> -> vector<16x64xf32>
    %c0_52 = arith.constant 0 : index
    %c0_53 = arith.constant 0 : index
    %91 = vector.load %arg10[%c0_52, %c0_53] : memref<16x16xf32, #tpu.memory_space<vmem>>, vector<16x16xf32>
    %cst_54 = arith.constant dense<0.000000e+00> : vector<16x64xf32>
    %92 = tpu.matmul %91, %88, %cst_54 {dimension_numbers = #tpu.dot_dimension_numbers<[1], [0], [0], [1], [0, 0, 1, 1], [], []>} : vector<16x16xf32>, vector<16x64xf32>, vector<16x64xf32> -> vector<16x64xf32>
    %93 = tpu.concatenate %90, %92 in 1 : vector<16x64xf32>, vector<16x64xf32> -> vector<16x128xf32>
    %c0_55 = arith.constant 0 : index
    %c0_56 = arith.constant 0 : index
    %94 = vector.load %arg11[%c0_55, %c0_56] : memref<128x192xf32, #tpu.memory_space<vmem>>, vector<128x192xf32>
    %cst_57 = arith.constant dense<0.000000e+00> : vector<16x192xf32>
    %95 = tpu.matmul %93, %94, %cst_57 {dimension_numbers = #tpu.dot_dimension_numbers<[1], [0], [0], [1], [0, 0, 1, 1], [], []>} : vector<16x128xf32>, vector<128x192xf32>, vector<16x192xf32> -> vector<16x192xf32>
    %c0_58 = arith.constant 0 : index
    %c0_59 = arith.constant 0 : index
    %96 = vector.load %arg12[%c0_58, %c0_59] : memref<1x192xf32, #tpu.memory_space<vmem>>, vector<1x192xf32>
    %97 = vector.broadcast %96 : vector<1x192xf32> to vector<16x192xf32>
    %98 = arith.addf %95, %97 : vector<16x192xf32>
    %c0_60 = arith.constant 0 : index
    %c0_61 = arith.constant 0 : index
    %99 = vector.load %arg13[%c0_60, %c0_61] : memref<64x128xf32, #tpu.memory_space<vmem>>, vector<64x128xf32>
    %cst_62 = arith.constant dense<0.000000e+00> : vector<16x128xf32>
    %100 = tpu.matmul %88, %99, %cst_62 {dimension_numbers = #tpu.dot_dimension_numbers<[1], [0], [0], [1], [0, 0, 1, 1], [], []>} : vector<16x64xf32>, vector<64x128xf32>, vector<16x128xf32> -> vector<16x128xf32>
    %c0_63 = arith.constant 0 : index
    %c0_64 = arith.constant 0 : index
    %101 = vector.load %arg14[%c0_63, %c0_64] : memref<1x128xf32, #tpu.memory_space<vmem>>, vector<1x128xf32>
    %102 = vector.broadcast %101 : vector<1x128xf32> to vector<16x128xf32>
    %103 = arith.addf %100, %102 : vector<16x128xf32>
    %104 = vector.extract_strided_slice %98 {offsets = [0, 0], sizes = [16, 64], strides = [1, 1]} : vector<16x192xf32> to vector<16x64xf32>
    %105 = vector.extract_strided_slice %103 {offsets = [0, 0], sizes = [16, 64], strides = [1, 1]} : vector<16x128xf32> to vector<16x64xf32>
    %106 = arith.addf %104, %105 : vector<16x64xf32>
    %107 = arith.negf %106 : vector<16x64xf32>
    %108 = math.exp %107 : vector<16x64xf32>
    %cst_65 = arith.constant 1.000000e+00 : f32
    %109 = vector.broadcast %cst_65 : f32 to vector<16x64xf32>
    %110 = arith.addf %109, %108 : vector<16x64xf32>
    %111 = arith.divf %109, %110 : vector<16x64xf32>
    %112 = vector.extract_strided_slice %98 {offsets = [0, 64], sizes = [16, 64], strides = [1, 1]} : vector<16x192xf32> to vector<16x64xf32>
    %113 = vector.extract_strided_slice %103 {offsets = [0, 64], sizes = [16, 64], strides = [1, 1]} : vector<16x128xf32> to vector<16x64xf32>
    %114 = arith.addf %112, %113 : vector<16x64xf32>
    %115 = arith.negf %114 : vector<16x64xf32>
    %116 = math.exp %115 : vector<16x64xf32>
    %cst_66 = arith.constant 1.000000e+00 : f32
    %117 = vector.broadcast %cst_66 : f32 to vector<16x64xf32>
    %118 = arith.addf %117, %116 : vector<16x64xf32>
    %119 = arith.divf %117, %118 : vector<16x64xf32>
    %120 = vector.extract_strided_slice %98 {offsets = [0, 128], sizes = [16, 64], strides = [1, 1]} : vector<16x192xf32> to vector<16x64xf32>
    %121 = arith.mulf %119, %88 : vector<16x64xf32>
    %c0_67 = arith.constant 0 : index
    %c0_68 = arith.constant 0 : index
    %122 = vector.load %arg15[%c0_67, %c0_68] : memref<64x64xf32, #tpu.memory_space<vmem>>, vector<64x64xf32>
    %cst_69 = arith.constant dense<0.000000e+00> : vector<16x64xf32>
    %123 = tpu.matmul %121, %122, %cst_69 {dimension_numbers = #tpu.dot_dimension_numbers<[1], [0], [0], [1], [0, 0, 1, 1], [], []>} : vector<16x64xf32>, vector<64x64xf32>, vector<16x64xf32> -> vector<16x64xf32>
    %124 = arith.addf %120, %123 : vector<16x64xf32>
    %c0_70 = arith.constant 0 : index
    %c0_71 = arith.constant 0 : index
    %125 = vector.load %arg16[%c0_70, %c0_71] : memref<1x64xf32, #tpu.memory_space<vmem>>, vector<1x64xf32>
    %126 = vector.broadcast %125 : vector<1x64xf32> to vector<16x64xf32>
    %127 = arith.addf %124, %126 : vector<16x64xf32>
    %128 = math.tanh %127 : vector<16x64xf32>
    %cst_72 = arith.constant 1.000000e+00 : f32
    %129 = vector.broadcast %cst_72 : f32 to vector<16x64xf32>
    %130 = arith.subf %129, %111 : vector<16x64xf32>
    %131 = arith.mulf %130, %88 : vector<16x64xf32>
    %132 = arith.mulf %111, %128 : vector<16x64xf32>
    %133 = arith.addf %131, %132 : vector<16x64xf32>
    %c2_i32 = arith.constant 2 : i32
    %c0_73 = arith.constant 0 : index
    %c0_74 = arith.constant 0 : index
    %134 = vector.load %arg9[%c0_73, %c0_74] : memref<16x16xf32, #tpu.memory_space<vmem>>, vector<16x16xf32>
    %cst_75 = arith.constant dense<0.000000e+00> : vector<16x64xf32>
    %135 = tpu.matmul %134, %133, %cst_75 {dimension_numbers = #tpu.dot_dimension_numbers<[1], [0], [0], [1], [0, 0, 1, 1], [], []>} : vector<16x16xf32>, vector<16x64xf32>, vector<16x64xf32> -> vector<16x64xf32>
    %c0_76 = arith.constant 0 : index
    %c0_77 = arith.constant 0 : index
    %136 = vector.load %arg10[%c0_76, %c0_77] : memref<16x16xf32, #tpu.memory_space<vmem>>, vector<16x16xf32>
    %cst_78 = arith.constant dense<0.000000e+00> : vector<16x64xf32>
    %137 = tpu.matmul %136, %133, %cst_78 {dimension_numbers = #tpu.dot_dimension_numbers<[1], [0], [0], [1], [0, 0, 1, 1], [], []>} : vector<16x16xf32>, vector<16x64xf32>, vector<16x64xf32> -> vector<16x64xf32>
    %138 = tpu.concatenate %135, %137 in 1 : vector<16x64xf32>, vector<16x64xf32> -> vector<16x128xf32>
    %c0_79 = arith.constant 0 : index
    %c0_80 = arith.constant 0 : index
    %139 = vector.load %arg11[%c0_79, %c0_80] : memref<128x192xf32, #tpu.memory_space<vmem>>, vector<128x192xf32>
    %cst_81 = arith.constant dense<0.000000e+00> : vector<16x192xf32>
    %140 = tpu.matmul %138, %139, %cst_81 {dimension_numbers = #tpu.dot_dimension_numbers<[1], [0], [0], [1], [0, 0, 1, 1], [], []>} : vector<16x128xf32>, vector<128x192xf32>, vector<16x192xf32> -> vector<16x192xf32>
    %c0_82 = arith.constant 0 : index
    %c0_83 = arith.constant 0 : index
    %141 = vector.load %arg12[%c0_82, %c0_83] : memref<1x192xf32, #tpu.memory_space<vmem>>, vector<1x192xf32>
    %142 = vector.broadcast %141 : vector<1x192xf32> to vector<16x192xf32>
    %143 = arith.addf %140, %142 : vector<16x192xf32>
    %c0_84 = arith.constant 0 : index
    %c0_85 = arith.constant 0 : index
    %144 = vector.load %arg13[%c0_84, %c0_85] : memref<64x128xf32, #tpu.memory_space<vmem>>, vector<64x128xf32>
    %cst_86 = arith.constant dense<0.000000e+00> : vector<16x128xf32>
    %145 = tpu.matmul %133, %144, %cst_86 {dimension_numbers = #tpu.dot_dimension_numbers<[1], [0], [0], [1], [0, 0, 1, 1], [], []>} : vector<16x64xf32>, vector<64x128xf32>, vector<16x128xf32> -> vector<16x128xf32>
    %c0_87 = arith.constant 0 : index
    %c0_88 = arith.constant 0 : index
    %146 = vector.load %arg14[%c0_87, %c0_88] : memref<1x128xf32, #tpu.memory_space<vmem>>, vector<1x128xf32>
    %147 = vector.broadcast %146 : vector<1x128xf32> to vector<16x128xf32>
    %148 = arith.addf %145, %147 : vector<16x128xf32>
    %149 = vector.extract_strided_slice %143 {offsets = [0, 0], sizes = [16, 64], strides = [1, 1]} : vector<16x192xf32> to vector<16x64xf32>
    %150 = vector.extract_strided_slice %148 {offsets = [0, 0], sizes = [16, 64], strides = [1, 1]} : vector<16x128xf32> to vector<16x64xf32>
    %151 = arith.addf %149, %150 : vector<16x64xf32>
    %152 = arith.negf %151 : vector<16x64xf32>
    %153 = math.exp %152 : vector<16x64xf32>
    %cst_89 = arith.constant 1.000000e+00 : f32
    %154 = vector.broadcast %cst_89 : f32 to vector<16x64xf32>
    %155 = arith.addf %154, %153 : vector<16x64xf32>
    %156 = arith.divf %154, %155 : vector<16x64xf32>
    %157 = vector.extract_strided_slice %143 {offsets = [0, 64], sizes = [16, 64], strides = [1, 1]} : vector<16x192xf32> to vector<16x64xf32>
    %158 = vector.extract_strided_slice %148 {offsets = [0, 64], sizes = [16, 64], strides = [1, 1]} : vector<16x128xf32> to vector<16x64xf32>
    %159 = arith.addf %157, %158 : vector<16x64xf32>
    %160 = arith.negf %159 : vector<16x64xf32>
    %161 = math.exp %160 : vector<16x64xf32>
    %cst_90 = arith.constant 1.000000e+00 : f32
    %162 = vector.broadcast %cst_90 : f32 to vector<16x64xf32>
    %163 = arith.addf %162, %161 : vector<16x64xf32>
    %164 = arith.divf %162, %163 : vector<16x64xf32>
    %165 = vector.extract_strided_slice %143 {offsets = [0, 128], sizes = [16, 64], strides = [1, 1]} : vector<16x192xf32> to vector<16x64xf32>
    %166 = arith.mulf %164, %133 : vector<16x64xf32>
    %c0_91 = arith.constant 0 : index
    %c0_92 = arith.constant 0 : index
    %167 = vector.load %arg15[%c0_91, %c0_92] : memref<64x64xf32, #tpu.memory_space<vmem>>, vector<64x64xf32>
    %cst_93 = arith.constant dense<0.000000e+00> : vector<16x64xf32>
    %168 = tpu.matmul %166, %167, %cst_93 {dimension_numbers = #tpu.dot_dimension_numbers<[1], [0], [0], [1], [0, 0, 1, 1], [], []>} : vector<16x64xf32>, vector<64x64xf32>, vector<16x64xf32> -> vector<16x64xf32>
    %169 = arith.addf %165, %168 : vector<16x64xf32>
    %c0_94 = arith.constant 0 : index
    %c0_95 = arith.constant 0 : index
    %170 = vector.load %arg16[%c0_94, %c0_95] : memref<1x64xf32, #tpu.memory_space<vmem>>, vector<1x64xf32>
    %171 = vector.broadcast %170 : vector<1x64xf32> to vector<16x64xf32>
    %172 = arith.addf %169, %171 : vector<16x64xf32>
    %173 = math.tanh %172 : vector<16x64xf32>
    %cst_96 = arith.constant 1.000000e+00 : f32
    %174 = vector.broadcast %cst_96 : f32 to vector<16x64xf32>
    %175 = arith.subf %174, %156 : vector<16x64xf32>
    %176 = arith.mulf %175, %133 : vector<16x64xf32>
    %177 = arith.mulf %156, %173 : vector<16x64xf32>
    %178 = arith.addf %176, %177 : vector<16x64xf32>
    %179 = tpu.concatenate %178, %43 in 1 : vector<16x64xf32>, vector<16x64xf32> -> vector<16x128xf32>
    %c0_97 = arith.constant 0 : index
    %c0_98 = arith.constant 0 : index
    %180 = vector.load %arg17[%c0_97, %c0_98] : memref<128x64xf32, #tpu.memory_space<vmem>>, vector<128x64xf32>
    %cst_99 = arith.constant dense<0.000000e+00> : vector<16x64xf32>
    %181 = tpu.matmul %179, %180, %cst_99 {dimension_numbers = #tpu.dot_dimension_numbers<[1], [0], [0], [1], [0, 0, 1, 1], [], []>} : vector<16x128xf32>, vector<128x64xf32>, vector<16x64xf32> -> vector<16x64xf32>
    %c0_100 = arith.constant 0 : index
    %c0_101 = arith.constant 0 : index
    %182 = vector.load %arg18[%c0_100, %c0_101] : memref<1x64xf32, #tpu.memory_space<vmem>>, vector<1x64xf32>
    %183 = vector.broadcast %182 : vector<1x64xf32> to vector<16x64xf32>
    %184 = arith.addf %181, %183 : vector<16x64xf32>
    %185 = math.tanh %184 : vector<16x64xf32>
    %186 = vector.shape_cast %185 : vector<16x64xf32> to vector<2x8x64xf32>
    %c0_102 = arith.constant 0 : index
    %c0_103 = arith.constant 0 : index
    %187 = vector.load %arg19[%c0_102, %c0_103] : memref<8x64xf32, #tpu.memory_space<vmem>>, vector<8x64xf32>
    %188 = vector.shape_cast %187 : vector<8x64xf32> to vector<1x8x64xf32>
    %189 = vector.broadcast %188 : vector<1x8x64xf32> to vector<2x8x64xf32>
    %190 = arith.mulf %186, %189 : vector<2x8x64xf32>
    %cst_104 = arith.constant dense<0.000000e+00> : vector<2x8xf32>
    %191 = vector.multi_reduction <add>, %190, %cst_104 [2] : vector<2x8x64xf32> to vector<2x8xf32>
    %c0_105 = arith.constant 0 : index
    %c0_106 = arith.constant 0 : index
    %192 = vector.load %arg20[%c0_105, %c0_106] : memref<1x8xf32, #tpu.memory_space<vmem>>, vector<1x8xf32>
    %193 = vector.broadcast %192 : vector<1x8xf32> to vector<2x8xf32>
    %194 = arith.addf %191, %193 : vector<2x8xf32>
    %c0_107 = arith.constant 0 : index
    %c0_108 = arith.constant 0 : index
    %195 = vector.load %arg21[%c0_107, %c0_108] : memref<2x8xf32, #tpu.memory_space<vmem>>, vector<2x8xf32>
    tpu.vector_store %arg21[%c0_107, %c0_108], %194 {strides = array<i32>} : memref<2x8xf32, #tpu.memory_space<vmem>>, vector<2x8xf32>,
    return
  }
}

</mosaic_0001>

<bundles_post_ra>
// kernel: tpu_custom_call.1
= control target key start
LH: loop header
LB: loop body
LE: loop exit
PB: predicated region body
PF: predicated region fallthrough
CT: control target
= control target key end

     0   :  { %s11019_s0 = inlined_call_operand.hbm [shape: bf16[32,192], index: 0, kind: input, shape index: {}]   ;;  %s11020_s1 = inlined_call_operand.vmem [shape: bf16[192,2048], index: 1, kind: input, shape index: {}]   ;;  %s11021_s2 = inlined_call_operand.vmem [shape: bf16[2048,64], index: 2, kind: input, shape index: {}]   ;;  %s11022_s3 = inlined_call_operand.vmem [shape: f32[1,64], index: 3, kind: input, shape index: {}]   ;;  %s11023_s4 = inlined_call_operand.vmem [shape: f32[8,16], index: 4, kind: input, shape index: {}]   ;;  %s11024_s5 = inlined_call_operand.vmem [shape: f32[64,32], index: 5, kind: input, shape index: {}]   ;;  %s11025_s6 = inlined_call_operand.hbm [shape: f32[16,32], index: 6, kind: input, shape index: {}]   ;;  %s11026_s7 = inlined_call_operand.vmem [shape: f32[1,32], index: 7, kind: input, shape index: {}]   ;;  %s11027_s8 = inlined_call_operand.<no memory space> [shape: f32[1,1], index: 8, kind: input, shape index: {}]   ;;  %s11028_s9 = inlined_call_operand.hbm [shape: f32[16,16], index: 9, kind: input, shape index: {}]   ;;  %s11029_s10 = inlined_call_operand.hbm [shape: f32[16,16], index: 10, kind: input, shape index: {}]   ;;  %s11030_s11 = inlined_call_operand.vmem [shape: f32[128,192], index: 11, kind: input, shape index: {}]   ;;  %s11031_s12 = inlined_call_operand.vmem [shape: f32[1,192], index: 12, kind: input, shape index: {}]   ;;  %s11032_s13 = inlined_call_operand.hbm [shape: f32[64,128], index: 13, kind: input, shape index: {}]   ;;  %s11033_s14 = inlined_call_operand.vmem [shape: f32[1,128], index: 14, kind: input, shape index: {}]   ;;  %s11034_s15 = inlined_call_operand.hbm [shape: f32[64,64], index: 15, kind: input, shape index: {}]   ;;  %s11035_s16 = inlined_call_operand.hbm [shape: f32[1,64], index: 16, kind: input, shape index: {}]   ;;  %s11036_s17 = inlined_call_operand.vmem [shape: f32[128,64], index: 17, kind: input, shape index: {}]   ;;  %s11037_s18 = inlined_call_operand.hbm [shape: f32[1,64], index: 18, kind: input, shape index: {}]   ;;  %s11038_s19 = inlined_call_operand.vmem [shape: f32[8,64], index: 19, kind: input, shape index: {}]   ;;  %s11039_s20 = inlined_call_operand.hbm [shape: f32[1,8], index: 20, kind: input, shape index: {}]   ;;  %s11040_s21 = inlined_call_operand.hbm [shape: f32[2,8], index: 21, kind: output, shape index: {}]  }
   0x1   :  { %11050 = sst [smem:[#allocation28_spill]] %s11019_s0  ;;  %v26_v0 = vstv %s11027_s8 }
   0x2   :  { %11051 = sst [smem:[#allocation29_spill]] %s11020_s1  ;;  %27 = vst [vmem:[#allocation2] sm:$0x1] %v26_v0 }
   0x3   :  { %11052 = sst [smem:[#allocation30_spill]] %s11021_s2 }
   0x4   :  { %11053 = sst [smem:[#allocation31_spill]] %s11022_s3 }
   0x5   :  { %11054 = sst [smem:[#allocation32_spill]] %s11023_s4 }
   0x6   :  { %11055 = sst [smem:[#allocation33_spill]] %s11024_s5 }
   0x7   :  { %28 = vsyncpa [#allocation4], 0 }
   0x8   :  { %29 = vsyncpa [#allocation7], 0 }
   0x9   :  { %30 = vsyncpa [#allocation10], 0 }
   0xa   :  { %31 = vsyncpa [#allocation13], 0 }
   0xb   :  { %32 = vsyncpa [#allocation16], 0 }
   0xc   :  { %33 = vsyncpa [#allocation5], 0  ;;  %s8464_s26 = smov [#allocation6]   ;;  %s8465_s3 = smov [#allocation9]  }
   0xd   :  { %s61_s27 = sshll.u32 %s8464_s26, 4  ;;  %s89_s28 = sshll.u32 %s8465_s3, 4  ;;  %s62_s27 = int_to_ptr.vmem [resolvable:$true] %s61_s27  ;;  %s8595_s28 = int_to_ptr.vmem [resolvable:$true] %s89_s28 }
   0xe   :  { %s8232_s4 = scalar_lea.hbm %s11025_s6, 256 }
   0xf   :  { %p8233_p0 = scmp.ne.s32.totalorder %s11025_s6, %s8232_s4  ;;  %p8236_p1 = scmp.lt.u32.totalorder %s8232_s4, %s11025_s6 }
  0x11   :  { %p8238_p2 = pnand %p8236_p1, %p8233_p0 }
  0x13   :  { %8241 = shalt.err (!%p8238_p2)
}
  0x14   :  { %s8242_s23 = scalar_lea.vmem %s62_s27, 256  ;;  %p8247_p4 = scmp.lt.s32.totalorder %s62_s27, %s62_s27 }
  0x15   :  { %p8243_p3 = scmp.ne.s32.totalorder %s62_s27, %s8242_s23  ;;  %p8248_p5 = scmp.lt.s32.totalorder %s8242_s23, %s8242_s23 }
  0x17   :  { %p8249_p6 = por %p8248_p5, %p8247_p4 }
  0x19   :  { %p8250_p7 = pnand %p8249_p6, %p8243_p3 }
  0x1b   :  { %8253 = shalt.err (!%p8250_p7)
}
  0x1c   :  { %s8466_s1 = smov 128   ;;  %s8467_s24 = smov 8  }
  0x1d   :  { %67 = dma.hbm_to_vmem [thread:$0]  %s11025_s6, 256, %s62_s27, [#allocation7], %s8466_s1, %s8466_s1, %s8467_s24  }
  0x1e   :  { %s8254_s29 = scalar_lea.hbm %s11029_s10, 256 }
  0x1f   :  { %p8255_p8 = scmp.ne.s32.totalorder %s11029_s10, %s8254_s29  ;;  %p8258_p9 = scmp.lt.u32.totalorder %s8254_s29, %s11029_s10 }
  0x21   :  { %p8260_p10 = pnand %p8258_p9, %p8255_p8 }
  0x23   :  { %8263 = shalt.err (!%p8260_p10)
}
  0x24   :  { %s8264_s5 = scalar_lea.vmem %s8595_s28, 256  ;;  %p8269_p12 = scmp.lt.s32.totalorder %s8595_s28, %s8595_s28 }
  0x25   :  { %p8265_p11 = scmp.ne.s32.totalorder %s8595_s28, %s8264_s5  ;;  %p8270_p13 = scmp.lt.s32.totalorder %s8264_s5, %s8264_s5 }
  0x27   :  { %p8271_p0 = por %p8270_p13, %p8269_p12 }
  0x29   :  { %p8272_p1 = pnand %p8271_p0, %p8265_p11 }
  0x2b   :  { %8275 = shalt.err (!%p8272_p1)
}
  0x2c   :  { %95 = dma.hbm_to_vmem [thread:$0]  %s11029_s10, 256, %s8595_s28, [#allocation10], %s8466_s1, %s8466_s1, %s8467_s24  }
  0x2d   :  { %s8468_s22 = smov [#allocation12]   ;;  %s8469_s2 = smov [#allocation15]  }
  0x2e   :  { %s119_s23 = sshll.u32 %s8468_s22, 4  ;;  %s144_s25 = sshll.u32 %s8469_s2, 4  ;;  %s120_s23 = int_to_ptr.vmem [resolvable:$true] %s119_s23  ;;  %s145_s25 = int_to_ptr.vmem [resolvable:$true] %s144_s25 }
  0x2f   :  { %s8276_s29 = scalar_lea.hbm %s11034_s15, 1024 }
  0x30   :  { %p8277_p2 = scmp.ne.s32.totalorder %s11034_s15, %s8276_s29  ;;  %p8280_p3 = scmp.lt.u32.totalorder %s8276_s29, %s11034_s15 }
  0x32   :  { %p8282_p4 = pnand %p8280_p3, %p8277_p2 }
  0x34   :  { %8285 = shalt.err (!%p8282_p4)
}
  0x35   :  { %s8286_s10 = scalar_lea.vmem %s120_s23, 1024  ;;  %p8291_p6 = scmp.lt.s32.totalorder %s120_s23, %s120_s23 }
  0x36   :  { %p8287_p5 = scmp.ne.s32.totalorder %s120_s23, %s8286_s10  ;;  %p8292_p7 = scmp.lt.s32.totalorder %s8286_s10, %s8286_s10 }
  0x38   :  { %p8293_p8 = por %p8292_p7, %p8291_p6 }
  0x3a   :  { %p8294_p9 = pnand %p8293_p8, %p8287_p5 }
  0x3c   :  { %8297 = shalt.err (!%p8294_p9)
}
  0x3d   :  { %125 = dma.hbm_to_vmem [thread:$0]  %s11034_s15, 1024, %s120_s23, [#allocation13], %s8466_s1, %s8466_s1, %s8467_s24  }
  0x3e   :  { %s8298_s22 = scalar_lea.hbm %s11037_s18, 16 }
  0x3f   :  { %p8299_p10 = scmp.ne.s32.totalorder %s11037_s18, %s8298_s22  ;;  %p8302_p11 = scmp.lt.u32.totalorder %s8298_s22, %s11037_s18 }
  0x41   :  { %p8304_p12 = pnand %p8302_p11, %p8299_p10 }
  0x43   :  { %8307 = shalt.err (!%p8304_p12)
}
  0x44   :  { %s8308_s0 = scalar_lea.vmem %s145_s25, 16  ;;  %s8312_s4 = scalar_lea.vmem %s145_s25, 32 }
  0x45   :  { %p8309_p13 = scmp.ne.s32.totalorder %s145_s25, %s8308_s0  ;;  %p8313_p0 = scmp.lt.s32.totalorder %s145_s25, %s145_s25 }
  0x46   :  { %p8314_p1 = scmp.lt.s32.totalorder %s8312_s4, %s8308_s0 }
  0x48   :  { %p8315_p2 = por %p8314_p1, %p8313_p0 }
  0x4a   :  { %p8316_p3 = pnand %p8315_p2, %p8309_p13 }
  0x4c   :  { %8319 = shalt.err (!%p8316_p3)
}
  0x4d   :  { %147 = dma.hbm_to_vmem [thread:$0]  %s11037_s18, 16, %s145_s25, [#allocation16]  }
  0x4e   :  { %s8470_s30 = smov [#allocation3]   ;;  %s8471_s10 = smov [#allocation8]  }
  0x4f   :  { %s39_s8 = sshll.u32 %s8470_s30, 4  ;;  %s77_s28 = sshll.u32 %s8471_s10, 4  ;;  %s40_s8 = int_to_ptr.vmem [resolvable:$true] %s39_s8  ;;  %s8659_s28 = int_to_ptr.vmem [resolvable:$true] %s77_s28 }
  0x50   :  { %s11056_s27 = sld [smem:[#allocation28_spill]] }
  0x56   :  { %s8320_s22 = scalar_lea.hbm %s11056_s27, 512 }
  0x57   :  { %p8321_p4 = scmp.ne.s32.totalorder %s11056_s27, %s8320_s22  ;;  %p8324_p5 = scmp.lt.u32.totalorder %s8320_s22, %s11056_s27 }
  0x59   :  { %p8326_p6 = pnand %p8324_p5, %p8321_p4 }
  0x5b   :  { %8329 = shalt.err (!%p8326_p6)
}
  0x5c   :  { %s8330_s18 = scalar_lea.vmem %s40_s8, 512  ;;  %p8335_p8 = scmp.lt.s32.totalorder %s40_s8, %s40_s8 }
  0x5d   :  { %p8331_p7 = scmp.ne.s32.totalorder %s40_s8, %s8330_s18  ;;  %p8336_p9 = scmp.lt.s32.totalorder %s8330_s18, %s8330_s18 }
  0x5f   :  { %p8337_p10 = por %p8336_p9, %p8335_p8 }
  0x61   :  { %p8338_p11 = pnand %p8337_p10, %p8331_p7 }
  0x63   :  { %8341 = shalt.err (!%p8338_p11)
}
  0x64   :  { %45 = dma.hbm_to_vmem [thread:$0]  %s11056_s27, 512, %s40_s8, [#allocation4], %s8466_s1, %s8466_s1, %s8467_s24  }
  0x65   :  { %s8342_s23 = scalar_lea.hbm %s11028_s9, 256 }
  0x66   :  { %p8343_p12 = scmp.ne.s32.totalorder %s11028_s9, %s8342_s23  ;;  %p8346_p13 = scmp.lt.u32.totalorder %s8342_s23, %s11028_s9 }
  0x68   :  { %p8348_p0 = pnand %p8346_p13, %p8343_p12 }
  0x6a   :  { %8351 = shalt.err (!%p8348_p0)
}
  0x6b   :  { %s8352_s22 = scalar_lea.vmem %s8659_s28, 256  ;;  %p8357_p2 = scmp.lt.s32.totalorder %s8659_s28, %s8659_s28 }
  0x6c   :  { %p8353_p1 = scmp.ne.s32.totalorder %s8659_s28, %s8352_s22  ;;  %p8358_p3 = scmp.lt.s32.totalorder %s8352_s22, %s8352_s22 }
  0x6e   :  { %p8359_p4 = por %p8358_p3, %p8357_p2 }
  0x70   :  { %p8360_p5 = pnand %p8359_p4, %p8353_p1 }
  0x72   :  { %8363 = shalt.err (!%p8360_p5)
}
  0x73   :  { %83 = dma.hbm_to_vmem [thread:$0]  %s11028_s9, 256, %s8659_s28, [#allocation7], %s8466_s1, %s8466_s1, %s8467_s24  }
  0x74   :  { %s8472_s2 = smov [#allocation11]   ;;  %s8473_s3 = smov [#allocation14]  }
  0x75   :  { %s105_s26 = sshll.u32 %s8472_s2, 4  ;;  %s132_s29 = sshll.u32 %s8473_s3, 4  ;;  %s106_s26 = int_to_ptr.vmem [resolvable:$true] %s105_s26  ;;  %s133_s29 = int_to_ptr.vmem [resolvable:$true] %s132_s29 }
  0x76   :  { %s8364_s0 = scalar_lea.hbm %s11032_s13, 1024 }
  0x77   :  { %p8365_p6 = scmp.ne.s32.totalorder %s11032_s13, %s8364_s0  ;;  %p8368_p7 = scmp.lt.u32.totalorder %s8364_s0, %s11032_s13 }
  0x79   :  { %p8370_p8 = pnand %p8368_p7, %p8365_p6 }
  0x7b   :  { %8373 = shalt.err (!%p8370_p8)
}
  0x7c   :  { %s8374_s9 = scalar_lea.vmem %s106_s26, 1024  ;;  %p8379_p10 = scmp.lt.s32.totalorder %s106_s26, %s106_s26 }
  0x7d   :  { %p8375_p9 = scmp.ne.s32.totalorder %s106_s26, %s8374_s9  ;;  %p8380_p11 = scmp.lt.s32.totalorder %s8374_s9, %s8374_s9 }
  0x7f   :  { %p8381_p12 = por %p8380_p11, %p8379_p10 }
  0x81   :  { %p8382_p13 = pnand %p8381_p12, %p8375_p9 }
  0x83   :  { %8385 = shalt.err (!%p8382_p13)
}
  0x84   :  { %111 = dma.hbm_to_vmem [thread:$0]  %s11032_s13, 1024, %s106_s26, [#allocation10], %s8466_s1, %s8466_s1, %s8467_s24  }
  0x85   :  { %s8386_s22 = scalar_lea.hbm %s11035_s16, 16 }
  0x86   :  { %p8387_p0 = scmp.ne.s32.totalorder %s11035_s16, %s8386_s22  ;;  %p8390_p1 = scmp.lt.u32.totalorder %s8386_s22, %s11035_s16 }
  0x88   :  { %p8392_p2 = pnand %p8390_p1, %p8387_p0 }
  0x8a   :  { %8395 = shalt.err (!%p8392_p2)
}
  0x8b   :  { %s8396_s18 = scalar_lea.vmem %s133_s29, 16  ;;  %s8400_s25 = scalar_lea.vmem %s133_s29, 32 }
  0x8c   :  { %p8397_p3 = scmp.ne.s32.totalorder %s133_s29, %s8396_s18  ;;  %p8401_p4 = scmp.lt.s32.totalorder %s133_s29, %s133_s29 }
  0x8d   :  { %p8402_p5 = scmp.lt.s32.totalorder %s8400_s25, %s8396_s18 }
  0x8f   :  { %p8403_p6 = por %p8402_p5, %p8401_p4 }
  0x91   :  { %p8404_p7 = pnand %p8403_p6, %p8397_p3 }
  0x93   :  { %8407 = shalt.err (!%p8404_p7)
}
  0x94   :  { %135 = dma.hbm_to_vmem [thread:$0]  %s11035_s16, 16, %s133_s29, [#allocation13]  }
  0x95   :  { %s8474_s24 = smov [#allocation17]   ;;  %s8408_s15 = scalar_lea.hbm %s11039_s20, 16 }
  0x96   :  { %s156_s26 = sshll.u32 %s8474_s24, 4  ;;  %p8409_p8 = scmp.ne.s32.totalorder %s11039_s20, %s8408_s15  ;;  %s157_s26 = int_to_ptr.vmem [resolvable:$true] %s156_s26 }
  0x97   :  { %p8412_p9 = scmp.lt.u32.totalorder %s8408_s15, %s11039_s20 }
  0x99   :  { %p8414_p10 = pnand %p8412_p9, %p8409_p8 }
  0x9b   :  { %8417 = shalt.err (!%p8414_p10)
}
  0x9c   :  { %s8418_s10 = scalar_lea.vmem %s157_s26, 16  ;;  %s8422_s16 = scalar_lea.vmem %s157_s26, 32 }
  0x9d   :  { %p8419_p11 = scmp.ne.s32.totalorder %s157_s26, %s8418_s10  ;;  %p8423_p12 = scmp.lt.s32.totalorder %s157_s26, %s157_s26 }
  0x9e   :  { %p8424_p13 = scmp.lt.s32.totalorder %s8422_s16, %s8418_s10 }
  0xa0   :  { %p8425_p0 = por %p8424_p13, %p8423_p12 }
  0xa2   :  { %p8426_p1 = pnand %p8425_p0, %p8419_p11 }
  0xa4   :  { %8429 = shalt.err (!%p8426_p1)
}
  0xa5   :  { %159 = dma.hbm_to_vmem [thread:$0]  %s11039_s20, 16, %s157_s26, [#allocation16]  }
  0xa6   :  { %8452 = dma.done.wait [#allocation4], 512  }
  0xa7   :  { %8453 = vsyncadd [#allocation4], 4294966784 }
  0xa8   :  { %8454 = dma.done.wait [#allocation7], 512  }
  0xa9   :  { %8455 = vsyncadd [#allocation7], 4294966784 }
  0xaa   :  { %8456 = dma.done.wait [#allocation10], 1280  }
  0xab   :  { %8457 = vsyncadd [#allocation10], 4294966016 }
  0xac   :  { %8458 = dma.done.wait [#allocation13], 1040  }
  0xad   :  { %8459 = vsyncadd [#allocation13], 4294966256 }
  0xae   :  { %8460 = dma.done.wait [#allocation16], 32  }
  0xaf   :  { %8461 = vsyncadd [#allocation16], 4294967264  ;;  %s11057_s8 = sld [smem:[#allocation29_spill]]  ;;  %vm1362_vm0 = vcmask 523264   ;;  %v8807_v44 = vld [vmem:[#allocation3 + $0x4] ss:$8 sps:$4 sm:$0xff]  }
  0xb0   :  { %6832 = vmatprep.mubr.msk.bf16.mxu0 %vm1362_vm0, %v8807_v44  ;;  %6834 = vmatprep.mubr.msk.bf16.mxu1 %vm1362_vm0, %v8807_v44  ;;  %s11058_s28 = sld [smem:[#allocation30_spill]]  ;;  %s11059_s16 = sld [smem:[#allocation33_spill]]  ;;  %vm8476_vm1 = vmmov 0   ;;  %vm3420_vm2 = vcmask 130048   ;;  %vm3687_vm3 = vcmask 261120   ;;  %vm3869_vm4 = vcmask 130112  }
  0xb1   :  { %s11060_s18 = sld [smem:[#allocation32_spill]]  ;;  %s11061_s1 = sld [smem:[#allocation31_spill]]  ;;  %vm4006_vm5 = vcmask 1041409   ;;  %vm4008_vm6 = vcmask 1042434   ;;  %vm4010_vm7 = vcmask 1043459   ;;  %vm4012_vm8 = vcmask 1044484  }
  0xb2   :  { %vm4014_vm9 = vcmask 1045509   ;;  %vm4016_vm10 = vcmask 1046534   ;;  %vm4018_vm11 = vcmask 1047559   ;;  %vm6615_vm12 = vcmask 58368  }
  0xb5   :  { %v192_v1 = vld [vmem:[%s11057_s8] sm:$0xff]  ;;  %v193_v3 = vld [vmem:[%s11057_s8 + $0x8] sm:$0xff] }
  0xb6   :  { %v200_v2 = vld [vmem:[%s11057_s8 + $0x40] sm:$0xff]  ;;  %v201_v5 = vld [vmem:[%s11057_s8 + $0x48] sm:$0xff] }
  0xb7   :  { %v6641_v4 = vcombine.high %v192_v1, %v200_v2  ;;  %v6640_v6 = vcombine.low %v192_v1, %v200_v2  ;;  %v208_v7 = vld [vmem:[%s11057_s8 + $0x80] sm:$0xff]  ;;  %v6643_v9 = vcombine.high %v193_v3, %v201_v5  ;;  %v6642_v10 = vcombine.low %v193_v3, %v201_v5  ;;  %v209_v12 = vld [vmem:[%s11057_s8 + $0x88] sm:$0xff] }
  0xb8   :  { %v216_v8 = vld [vmem:[%s11057_s8 + $0xc0] sm:$0xff]  ;;  %v217_v13 = vld [vmem:[%s11057_s8 + $0xc8] sm:$0xff] }
  0xb9   :  { %v6657_v11 = vcombine.high %v208_v7, %v216_v8  ;;  %v224_v14 = vld [vmem:[%s11057_s8 + $0x100] sm:$0xff]  ;;  %1369 = vmatprep.subr.bf16.mxu0 %v6641_v4  ;;  %v6659_v15 = vcombine.high %v209_v12, %v217_v13  ;;  %v225_v17 = vld [vmem:[%s11057_s8 + $0x108] sm:$0xff]  ;;  %1422 = vmatprep.subr.bf16.mxu1 %v6643_v9  ;;  %v6656_v19 = vcombine.low %v208_v7, %v216_v8 }
  0xba   :  { %v232_v16 = vld [vmem:[%s11057_s8 + $0x140] sm:$0xff]  ;;  %v233_v18 = vld [vmem:[%s11057_s8 + $0x148] sm:$0xff]  ;;  %1370 = vmatpush1.bf16.msra.mxu0 %v6640_v6  ;;  %1423 = vmatpush1.bf16.msra.mxu1 %v6642_v10  ;;  %v6658_v20 = vcombine.low %v209_v12, %v217_v13 }
  0xbb   :  { %1371 = vmatprep.subr.bf16.mxu0 %v6657_v11  ;;  %v6673_v21 = vcombine.high %v224_v14, %v232_v16  ;;  %1424 = vmatprep.subr.bf16.mxu1 %v6659_v15  ;;  %v6675_v22 = vcombine.high %v225_v17, %v233_v18  ;;  %v240_v23 = vld [vmem:[%s11057_s8 + $0x180] sm:$0xff]  ;;  %v241_v25 = vld [vmem:[%s11057_s8 + $0x188] sm:$0xff]  ;;  %v6672_v27 = vcombine.low %v224_v14, %v232_v16 }
  0xbc   :  { %v248_v24 = vld [vmem:[%s11057_s8 + $0x1c0] sm:$0xff]  ;;  %v249_v26 = vld [vmem:[%s11057_s8 + $0x1c8] sm:$0xff]  ;;  %v6674_v28 = vcombine.low %v225_v17, %v233_v18 }
  0xbd   :  { %v6689_v29 = vcombine.high %v240_v23, %v248_v24  ;;  %v6691_v30 = vcombine.high %v241_v25, %v249_v26  ;;  %v256_v31 = vld [vmem:[%s11057_s8 + $0x200] sm:$0xff]  ;;  %v257_v33 = vld [vmem:[%s11057_s8 + $0x208] sm:$0xff]  ;;  %v6688_v35 = vcombine.low %v240_v23, %v248_v24  ;;  %v6690_v36 = vcombine.low %v241_v25, %v249_v26 }
  0xbe   :  { %1372 = vmatpush1.bf16.msra.mxu0 %v6656_v19  ;;  %1425 = vmatpush1.bf16.msra.mxu1 %v6658_v20  ;;  %v264_v32 = vld [vmem:[%s11057_s8 + $0x240] sm:$0xff]  ;;  %v265_v34 = vld [vmem:[%s11057_s8 + $0x248] sm:$0xff] }
  0xbf   :  { %1373 = vmatprep.subr.bf16.mxu0 %v6673_v21  ;;  %1426 = vmatprep.subr.bf16.mxu1 %v6675_v22  ;;  %v6705_v37 = vcombine.high %v256_v31, %v264_v32  ;;  %v6707_v38 = vcombine.high %v257_v33, %v265_v34  ;;  %v272_v39 = vld [vmem:[%s11057_s8 + $0x280] sm:$0xff]  ;;  %v273_v41 = vld [vmem:[%s11057_s8 + $0x288] sm:$0xff]  ;;  %v6704_v43 = vcombine.low %v256_v31, %v264_v32  ;;  %v194_v32 = vld [vmem:[%s11057_s8 + $0x10] sm:$0xff] }
  0xc0   :  { %v280_v40 = vld [vmem:[%s11057_s8 + $0x2c0] sm:$0xff]  ;;  %v281_v42 = vld [vmem:[%s11057_s8 + $0x2c8] sm:$0xff]  ;;  %v6706_v45 = vcombine.low %v257_v33, %v265_v34  ;;  %v202_v33 = vld [vmem:[%s11057_s8 + $0x50] sm:$0xff] }
  0xc1   :  { %v6721_v46 = vcombine.high %v272_v39, %v280_v40  ;;  %v6723_v47 = vcombine.high %v273_v41, %v281_v42  ;;  %v288_v48 = vld [vmem:[%s11057_s8 + $0x300] sm:$0xff]  ;;  %v289_v50 = vld [vmem:[%s11057_s8 + $0x308] sm:$0xff]  ;;  %v6720_v52 = vcombine.low %v272_v39, %v280_v40  ;;  %v6722_v53 = vcombine.low %v273_v41, %v281_v42  ;;  %v195_v34 = vld [vmem:[%s11057_s8 + $0x18] sm:$0xff] }
  0xc2   :  { %1374 = vmatpush1.bf16.msra.mxu0 %v6672_v27  ;;  %1427 = vmatpush1.bf16.msra.mxu1 %v6674_v28  ;;  %v296_v49 = vld [vmem:[%s11057_s8 + $0x340] sm:$0xff]  ;;  %v297_v51 = vld [vmem:[%s11057_s8 + $0x348] sm:$0xff]  ;;  %v210_v40 = vld [vmem:[%s11057_s8 + $0x90] sm:$0xff] }
  0xc3   :  { %1375 = vmatprep.subr.bf16.mxu0 %v6689_v29  ;;  %1428 = vmatprep.subr.bf16.mxu1 %v6691_v30  ;;  %v6737_v54 = vcombine.high %v288_v48, %v296_v49  ;;  %v6739_v55 = vcombine.high %v289_v50, %v297_v51  ;;  %v304_v56 = vld [vmem:[%s11057_s8 + $0x380] sm:$0xff]  ;;  %v305_v58 = vld [vmem:[%s11057_s8 + $0x388] sm:$0xff]  ;;  %v6736_v60 = vcombine.low %v288_v48, %v296_v49  ;;  %v218_v41 = vld [vmem:[%s11057_s8 + $0xd0] sm:$0xff] }
  0xc4   :  { %v312_v57 = vld [vmem:[%s11057_s8 + $0x3c0] sm:$0xff]  ;;  %v313_v59 = vld [vmem:[%s11057_s8 + $0x3c8] sm:$0xff]  ;;  %v6738_v61 = vcombine.low %v289_v50, %v297_v51  ;;  %v6661_v48 = vcombine.high %v210_v40, %v218_v41  ;;  %v226_v50 = vld [vmem:[%s11057_s8 + $0x110] sm:$0xff] }
  0xc5   :  { %v6753_v62 = vcombine.high %v304_v56, %v312_v57  ;;  %v6755_v63 = vcombine.high %v305_v58, %v313_v59  ;;  %v320_v0 = vld [vmem:[%s11057_s8 + $0x400] sm:$0xff]  ;;  %v321_v2 = vld [vmem:[%s11057_s8 + $0x408] sm:$0xff]  ;;  %v6752_v4 = vcombine.low %v304_v56, %v312_v57  ;;  %v6754_v5 = vcombine.low %v305_v58, %v313_v59  ;;  %v234_v51 = vld [vmem:[%s11057_s8 + $0x150] sm:$0xff] }
  0xc6   :  { %1376 = vmatpush1.bf16.msra.mxu0 %v6688_v35  ;;  %1429 = vmatpush1.bf16.msra.mxu1 %v6690_v36  ;;  %v328_v1 = vld [vmem:[%s11057_s8 + $0x440] sm:$0xff]  ;;  %v329_v3 = vld [vmem:[%s11057_s8 + $0x448] sm:$0xff]  ;;  %v203_v35 = vld [vmem:[%s11057_s8 + $0x58] sm:$0xff]  ;;  %v6677_v57 = vcombine.high %v226_v50, %v234_v51 }
  0xc7   :  { %1377 = vmatprep.subr.bf16.mxu0 %v6705_v37  ;;  %1430 = vmatprep.subr.bf16.mxu1 %v6707_v38  ;;  %v6769_v6 = vcombine.high %v320_v0, %v328_v1  ;;  %v6771_v7 = vcombine.high %v321_v2, %v329_v3  ;;  %v336_v8 = vld [vmem:[%s11057_s8 + $0x480] sm:$0xff]  ;;  %v337_v10 = vld [vmem:[%s11057_s8 + $0x488] sm:$0xff]  ;;  %v6768_v12 = vcombine.low %v320_v0, %v328_v1  ;;  %v242_v59 = vld [vmem:[%s11057_s8 + $0x190] sm:$0xff] }
  0xc8   :  { %v344_v9 = vld [vmem:[%s11057_s8 + $0x4c0] sm:$0xff]  ;;  %v345_v11 = vld [vmem:[%s11057_s8 + $0x4c8] sm:$0xff]  ;;  %v6770_v13 = vcombine.low %v321_v2, %v329_v3  ;;  %v6645_v38 = vcombine.high %v194_v32, %v202_v33  ;;  %v6647_v39 = vcombine.high %v195_v34, %v203_v35  ;;  %v6676_v0 = vcombine.low %v226_v50, %v234_v51  ;;  %v354_v51 = vld [vmem:[%s11057_s8 + $0x510] sm:$0xff] }
  0xc9   :  { %v6785_v14 = vcombine.high %v336_v8, %v344_v9  ;;  %v6787_v15 = vcombine.high %v337_v10, %v345_v11  ;;  %v352_v16 = vld [vmem:[%s11057_s8 + $0x500] sm:$0xff]  ;;  %v353_v18 = vld [vmem:[%s11057_s8 + $0x508] sm:$0xff]  ;;  %v6784_v20 = vcombine.low %v336_v8, %v344_v9  ;;  %v6786_v21 = vcombine.low %v337_v10, %v345_v11 }
  0xca   :  { %1378 = vmatpush1.bf16.msra.mxu0 %v6704_v43  ;;  %1431 = vmatpush1.bf16.msra.mxu1 %v6706_v45  ;;  %v360_v17 = vld [vmem:[%s11057_s8 + $0x540] sm:$0xff]  ;;  %v361_v19 = vld [vmem:[%s11057_s8 + $0x548] sm:$0xff]  ;;  %v211_v43 = vld [vmem:[%s11057_s8 + $0x98] sm:$0xff] }
  0xcb   :  { %1379 = vmatprep.subr.bf16.mxu0 %v6721_v46  ;;  %1432 = vmatprep.subr.bf16.mxu1 %v6723_v47  ;;  %v6801_v22 = vcombine.high %v352_v16, %v360_v17  ;;  %v6803_v23 = vcombine.high %v353_v18, %v361_v19  ;;  %v368_v24 = vld [vmem:[%s11057_s8 + $0x580] sm:$0xff]  ;;  %v369_v26 = vld [vmem:[%s11057_s8 + $0x588] sm:$0xff]  ;;  %v6800_v28 = vcombine.low %v352_v16, %v360_v17  ;;  %v219_v45 = vld [vmem:[%s11057_s8 + $0xd8] sm:$0xff] }
  0xcc   :  { %v376_v25 = vld [vmem:[%s11057_s8 + $0x5c0] sm:$0xff]  ;;  %v377_v27 = vld [vmem:[%s11057_s8 + $0x5c8] sm:$0xff]  ;;  %v6802_v29 = vcombine.low %v353_v18, %v361_v19  ;;  %v6644_v46 = vcombine.low %v194_v32, %v202_v33  ;;  %v6646_v47 = vcombine.low %v195_v34, %v203_v35  ;;  %v6663_v49 = vcombine.high %v211_v43, %v219_v45  ;;  %v290_v19 = vld [vmem:[%s11057_s8 + $0x310] sm:$0xff] }
  0xcd   :  { %v6817_v30 = vcombine.high %v368_v24, %v376_v25  ;;  %v6819_v31 = vcombine.high %v369_v26, %v377_v27  ;;  %v6816_v36 = vcombine.low %v368_v24, %v376_v25  ;;  %v6818_v37 = vcombine.low %v369_v26, %v377_v27  ;;  %v8903_v42 = vld [vmem:[#allocation3] ss:$8 sps:$4 sm:$0xff]   ;;  %v306_v25 = vld [vmem:[%s11057_s8 + $0x390] sm:$0xff] }
  0xce   :  { %1380 = vmatpush1.bf16.msra.mxu0 %v6720_v52  ;;  %1433 = vmatpush1.bf16.msra.mxu1 %v6722_v53  ;;  %v8917_v52 = vld [vmem:[#allocation3 + $0x14] ss:$8 sps:$4 sm:$0xff]   ;;  %v6662_v56 = vcombine.low %v211_v43, %v219_v45 }
  0xcf   :  { %1381 = vmatprep.subr.bf16.mxu0 %v6737_v54  ;;  %1434 = vmatprep.subr.bf16.mxu1 %v6739_v55  ;;  %v227_v53 = vld [vmem:[%s11057_s8 + $0x118] sm:$0xff]  ;;  %v6660_v55 = vcombine.low %v210_v40, %v218_v41  ;;  %v314_v26 = vld [vmem:[%s11057_s8 + $0x3d0] sm:$0xff] }
  0xd0   :  { %v235_v54 = vld [vmem:[%s11057_s8 + $0x158] sm:$0xff]  ;;  %v322_v33 = vld [vmem:[%s11057_s8 + $0x410] sm:$0xff]  ;;  %v6756_v40 = vcombine.low %v306_v25, %v314_v26 }
  0xd1   :  { %v6679_v58 = vcombine.high %v227_v53, %v235_v54  ;;  %v6678_v1 = vcombine.low %v227_v53, %v235_v54  ;;  %v330_v34 = vld [vmem:[%s11057_s8 + $0x450] sm:$0xff] }
  0xd2   :  { %1382 = vmatpush1.bf16.msra.mxu0 %v6736_v60  ;;  %1435 = vmatpush1.bf16.msra.mxu1 %v6738_v61  ;;  %v250_v60 = vld [vmem:[%s11057_s8 + $0x1d0] sm:$0xff]  ;;  %v243_v61 = vld [vmem:[%s11057_s8 + $0x198] sm:$0xff]  ;;  %v6773_v43 = vcombine.high %v322_v33, %v330_v34  ;;  %v6772_v50 = vcombine.low %v322_v33, %v330_v34  ;;  %v245_v33 = vld [vmem:[%s11057_s8 + $0x1a8] sm:$0xff] }
  0xd3   :  { %1383 = vmatprep.subr.bf16.mxu0 %v6753_v62  ;;  %1436 = vmatprep.subr.bf16.mxu1 %v6755_v63  ;;  %v251_v62 = vld [vmem:[%s11057_s8 + $0x1d8] sm:$0xff]  ;;  %v6693_v2 = vcombine.high %v242_v59, %v250_v60  ;;  %v6692_v8 = vcombine.low %v242_v59, %v250_v60  ;;  %v370_v60 = vld [vmem:[%s11057_s8 + $0x590] sm:$0xff] }
  0xd4   :  { %v8941_v63 = vld [vmem:[#allocation3 + $0x10] ss:$8 sps:$4 sm:$0xff]   ;;  %v6695_v3 = vcombine.high %v243_v61, %v251_v62  ;;  %v6694_v9 = vcombine.low %v243_v61, %v251_v62 }
  0xd6   :  { %1384 = vmatpush1.bf16.msra.mxu0 %v6752_v4  ;;  %1437 = vmatpush1.bf16.msra.mxu1 %v6754_v5  ;;  %v258_v4 = vld [vmem:[%s11057_s8 + $0x210] sm:$0xff] }
  0xd7   :  { %1385 = vmatprep.subr.bf16.mxu0 %v6769_v6  ;;  %1438 = vmatprep.subr.bf16.mxu1 %v6771_v7  ;;  %v266_v5 = vld [vmem:[%s11057_s8 + $0x250] sm:$0xff]  ;;  %v259_v6 = vld [vmem:[%s11057_s8 + $0x218] sm:$0xff] }
  0xd8   :  { %v267_v7 = vld [vmem:[%s11057_s8 + $0x258] sm:$0xff]  ;;  %v6709_v10 = vcombine.high %v258_v4, %v266_v5  ;;  %v6708_v16 = vcombine.low %v258_v4, %v266_v5  ;;  %v196_v5 = vld [vmem:[%s11057_s8 + $0x20] sm:$0xff] }
  0xd9   :  { %v6711_v11 = vcombine.high %v259_v6, %v267_v7  ;;  %v6710_v17 = vcombine.low %v259_v6, %v267_v7  ;;  %v204_v6 = vld [vmem:[%s11057_s8 + $0x60] sm:$0xff] }
  0xda   :  { %1386 = vmatpush1.bf16.msra.mxu0 %v6768_v12  ;;  %1439 = vmatpush1.bf16.msra.mxu1 %v6770_v13  ;;  %v274_v12 = vld [vmem:[%s11057_s8 + $0x290] sm:$0xff] }
  0xdb   :  { %1387 = vmatprep.subr.bf16.mxu0 %v6785_v14  ;;  %1440 = vmatprep.subr.bf16.mxu1 %v6787_v15  ;;  %v282_v13 = vld [vmem:[%s11057_s8 + $0x2d0] sm:$0xff]  ;;  %v275_v14 = vld [vmem:[%s11057_s8 + $0x298] sm:$0xff] }
  0xdc   :  { %v283_v15 = vld [vmem:[%s11057_s8 + $0x2d8] sm:$0xff]  ;;  %v6725_v18 = vcombine.high %v274_v12, %v282_v13  ;;  %v6724_v24 = vcombine.low %v274_v12, %v282_v13  ;;  %v212_v13 = vld [vmem:[%s11057_s8 + $0xa0] sm:$0xff] }
  0xdd   :  { %v6726_v27 = vcombine.low %v275_v14, %v283_v15 }
  0xde   :  { %1388 = vmatpush1.bf16.msra.mxu0 %v6784_v20  ;;  %1441 = vmatpush1.bf16.msra.mxu1 %v6786_v21  ;;  %v298_v20 = vld [vmem:[%s11057_s8 + $0x350] sm:$0xff]  ;;  %v6727_v21 = vcombine.high %v275_v14, %v283_v15  ;;  %v220_v14 = vld [vmem:[%s11057_s8 + $0xe0] sm:$0xff] }
  0xdf   :  { %1389 = vmatprep.subr.bf16.mxu0 %v6801_v22  ;;  %1442 = vmatprep.subr.bf16.mxu1 %v6803_v23  ;;  %v291_v22 = vld [vmem:[%s11057_s8 + $0x318] sm:$0xff]  ;;  %v6740_v32 = vcombine.low %v290_v19, %v298_v20 }
  0xe0   :  { %v299_v23 = vld [vmem:[%s11057_s8 + $0x358] sm:$0xff] }
  0xe1   :  { %v6742_v35 = vcombine.low %v291_v22, %v299_v23 }
  0xe2   :  { %1390 = vmatpush1.bf16.msra.mxu0 %v6800_v28  ;;  %1443 = vmatpush1.bf16.msra.mxu1 %v6802_v29  ;;  %v6741_v28 = vcombine.high %v290_v19, %v298_v20  ;;  %v307_v29 = vld [vmem:[%s11057_s8 + $0x398] sm:$0xff]  ;;  %v6648_v20 = vcombine.low %v196_v5, %v204_v6 }
  0xe3   :  { %1391 = vmatprep.subr.bf16.mxu0 %v6817_v30  ;;  %1444 = vmatprep.subr.bf16.mxu1 %v6819_v31  ;;  %v315_v30 = vld [vmem:[%s11057_s8 + $0x3d8] sm:$0xff]  ;;  %v6743_v31 = vcombine.high %v291_v22, %v299_v23  ;;  %v236_v22 = vld [vmem:[%s11057_s8 + $0x160] sm:$0xff] }
  0xe4   :  { %v6758_v41 = vcombine.low %v307_v29, %v315_v30 }
  0xe6   :  { %1392 = vmatpush1.bf16.msra.mxu0 %v6816_v36  ;;  %1445 = vmatpush1.bf16.msra.mxu1 %v6818_v37  ;;  %v6757_v36 = vcombine.high %v306_v25, %v314_v26  ;;  %v323_v37 = vld [vmem:[%s11057_s8 + $0x418] sm:$0xff]  ;;  %v229_v25 = vld [vmem:[%s11057_s8 + $0x128] sm:$0xff] }
  0xe7   :  { %1475 = vmatprep.subr.bf16.mxu0 %v6645_v38  ;;  %1528 = vmatprep.subr.bf16.mxu1 %v6647_v39  ;;  %v331_v38 = vld [vmem:[%s11057_s8 + $0x458] sm:$0xff]  ;;  %v6759_v39 = vcombine.high %v307_v29, %v315_v30  ;;  %v237_v26 = vld [vmem:[%s11057_s8 + $0x168] sm:$0xff]  ;;  %v244_v29 = vld [vmem:[%s11057_s8 + $0x1a0] sm:$0xff] }
  0xe8   :  { %v6775_v45 = vcombine.high %v323_v37, %v331_v38  ;;  %v6774_v53 = vcombine.low %v323_v37, %v331_v38  ;;  %v252_v30 = vld [vmem:[%s11057_s8 + $0x1e0] sm:$0xff]  ;;  %v6683_v34 = vcombine.high %v229_v25, %v237_v26  ;;  %v6682_v38 = vcombine.low %v229_v25, %v237_v26  ;;  %v357_v25 = vld [vmem:[%s11057_s8 + $0x528] sm:$0xff] }
  0xe9   :  { %1402 = vmatmul.mubr.bf16.vlgmr.msra.gmra.mrb[0].mxu0 %v8903_v42  ;;  %1455 = vmatmul.mubr.bf16.vlgmr.msra.gmra.mrb[0].mxu1 %v8903_v42  ;;  %v268_v37 = vld [vmem:[%s11057_s8 + $0x260] sm:$0xff]  ;;  %v365_v26 = vld [vmem:[%s11057_s8 + $0x568] sm:$0xff] }
  0xea   :  { %1476 = vmatpush1.bf16.msra.mxu0 %v6644_v46  ;;  %1529 = vmatpush1.bf16.msra.mxu1 %v6646_v47  ;;  %v338_v46 = vld [vmem:[%s11057_s8 + $0x490] sm:$0xff] }
  0xeb   :  { %1477 = vmatprep.subr.bf16.mxu0 %v6661_v48  ;;  %1530 = vmatprep.subr.bf16.mxu1 %v6663_v49  ;;  %v346_v47 = vld [vmem:[%s11057_s8 + $0x4d0] sm:$0xff]  ;;  %v339_v48 = vld [vmem:[%s11057_s8 + $0x498] sm:$0xff] }
  0xec   :  { %6833 = vmatprep.mubr.msk.bf16.mxu0 %vm1362_vm0, %v8917_v52  ;;  %6835 = vmatprep.mubr.msk.bf16.mxu1 %vm1362_vm0, %v8917_v52  ;;  %v347_v49 = vld [vmem:[%s11057_s8 + $0x4d8] sm:$0xff]  ;;  %v6789_v54 = vcombine.high %v338_v46, %v346_v47  ;;  %v6788_v59 = vcombine.low %v338_v46, %v346_v47  ;;  %v284_v46 = vld [vmem:[%s11057_s8 + $0x2e0] sm:$0xff] }
  0xed   :  { %v6790_v61 = vcombine.low %v339_v48, %v347_v49 }
  0xee   :  { %1478 = vmatpush1.bf16.msra.mxu0 %v6660_v55  ;;  %1531 = vmatpush1.bf16.msra.mxu1 %v6662_v56  ;;  %v362_v55 = vld [vmem:[%s11057_s8 + $0x550] sm:$0xff]  ;;  %v6791_v56 = vcombine.high %v339_v48, %v347_v49  ;;  %v277_v49 = vld [vmem:[%s11057_s8 + $0x2a8] sm:$0xff] }
  0xef   :  { %1479 = vmatprep.subr.bf16.mxu0 %v6677_v57  ;;  %1532 = vmatprep.subr.bf16.mxu1 %v6679_v58  ;;  %v355_v57 = vld [vmem:[%s11057_s8 + $0x518] sm:$0xff]  ;;  %v6805_v62 = vcombine.high %v354_v51, %v362_v55  ;;  %v6804_v4 = vcombine.low %v354_v51, %v362_v55 }
  0xf0   :  { %v363_v58 = vld [vmem:[%s11057_s8 + $0x558] sm:$0xff] }
  0xf1   :  { %1412 = vmatmul.mubr.bf16.gmra.mrb[4].mxu0 %v8941_v63  ;;  %1465 = vmatmul.mubr.bf16.gmra.mrb[4].mxu1 %v8941_v63  ;;  %v6806_v7 = vcombine.low %v355_v57, %v363_v58 }
  0xf2   :  { %1480 = vmatpush1.bf16.msra.mxu0 %v6676_v0  ;;  %1533 = vmatpush1.bf16.msra.mxu1 %v6678_v1  ;;  %v378_v0 = vld [vmem:[%s11057_s8 + $0x5d0] sm:$0xff]  ;;  %v6807_v1 = vcombine.high %v355_v57, %v363_v58  ;;  %v293_v57 = vld [vmem:[%s11057_s8 + $0x328] sm:$0xff] }
  0xf3   :  { %1481 = vmatprep.subr.bf16.mxu0 %v6693_v2  ;;  %1534 = vmatprep.subr.bf16.mxu1 %v6695_v3  ;;  %v371_v2 = vld [vmem:[%s11057_s8 + $0x598] sm:$0xff]  ;;  %v6820_v12 = vcombine.low %v370_v60, %v378_v0 }
  0xf4   :  { %6836 = vmatprep.mubr.msk.bf16.mxu0 %vm1362_vm0, %v8807_v44  ;;  %6838 = vmatprep.mubr.msk.bf16.mxu1 %vm1362_vm0, %v8807_v44  ;;  %v379_v3 = vld [vmem:[%s11057_s8 + $0x5d8] sm:$0xff] }
  0xf5   :  { %v6822_v15 = vcombine.low %v371_v2, %v379_v3 }
  0xf6   :  { %1482 = vmatpush1.bf16.msra.mxu0 %v6692_v8  ;;  %1535 = vmatpush1.bf16.msra.mxu1 %v6694_v9  ;;  %v6821_v8 = vcombine.high %v370_v60, %v378_v0  ;;  %v197_v9 = vld [vmem:[%s11057_s8 + $0x28] sm:$0xff]  ;;  %v308_v60 = vld [vmem:[%s11057_s8 + $0x3a0] sm:$0xff] }
  0xf7   :  { %1483 = vmatprep.subr.bf16.mxu0 %v6709_v10  ;;  %1536 = vmatprep.subr.bf16.mxu1 %v6711_v11  ;;  %v6823_v10 = vcombine.high %v371_v2, %v379_v3  ;;  %v205_v11 = vld [vmem:[%s11057_s8 + $0x68] sm:$0xff] }
  0xf8   :  { %v6651_v19 = vcombine.high %v197_v9, %v205_v11  ;;  %v6650_v23 = vcombine.low %v197_v9, %v205_v11  ;;  %v317_v2 = vld [vmem:[%s11057_s8 + $0x3e8] sm:$0xff] }
  0xf9   :  { %v325_v9 = vld [vmem:[%s11057_s8 + $0x428] sm:$0xff] }
  0xfa   :  { %1484 = vmatpush1.bf16.msra.mxu0 %v6708_v16  ;;  %1537 = vmatpush1.bf16.msra.mxu1 %v6710_v17  ;;  %v6649_v16 = vcombine.high %v196_v5, %v204_v6  ;;  %v213_v17 = vld [vmem:[%s11057_s8 + $0xa8] sm:$0xff]  ;;  %v324_v5 = vld [vmem:[%s11057_s8 + $0x420] sm:$0xff] }
  0xfb   :  { %1485 = vmatprep.subr.bf16.mxu0 %v6725_v18  ;;  %1538 = vmatprep.subr.bf16.mxu1 %v6727_v21  ;;  %v221_v18 = vld [vmem:[%s11057_s8 + $0xe8] sm:$0xff]  ;;  %v228_v21 = vld [vmem:[%s11057_s8 + $0x120] sm:$0xff] }
  0xfc   :  { %v332_v6 = vld [vmem:[%s11057_s8 + $0x460] sm:$0xff] }
  0xfe   :  { %1486 = vmatpush1.bf16.msra.mxu0 %v6724_v24  ;;  %1539 = vmatpush1.bf16.msra.mxu1 %v6726_v27  ;;  %v6665_v24 = vcombine.high %v212_v13, %v220_v14  ;;  %v6667_v27 = vcombine.high %v213_v17, %v221_v18 }
  0xff   :  { %1487 = vmatprep.subr.bf16.mxu0 %v6741_v28  ;;  %1540 = vmatprep.subr.bf16.mxu1 %v6743_v31  ;;  %v6664_v28 = vcombine.low %v212_v13, %v220_v14  ;;  %v6666_v31 = vcombine.low %v213_v17, %v221_v18  ;;  %v340_v13 = vld [vmem:[%s11057_s8 + $0x4a0] sm:$0xff]  ;;  %v341_v17 = vld [vmem:[%s11057_s8 + $0x4a8] sm:$0xff] }
 0x100   :  { %v348_v14 = vld [vmem:[%s11057_s8 + $0x4e0] sm:$0xff]  ;;  %v349_v18 = vld [vmem:[%s11057_s8 + $0x4e8] sm:$0xff] }
 0x102   :  { %1488 = vmatpush1.bf16.msra.mxu0 %v6740_v32  ;;  %1541 = vmatpush1.bf16.msra.mxu1 %v6742_v35  ;;  %v6681_v32 = vcombine.high %v228_v21, %v236_v22  ;;  %v6680_v35 = vcombine.low %v228_v21, %v236_v22  ;;  %v356_v21 = vld [vmem:[%s11057_s8 + $0x520] sm:$0xff] }
 0x103   :  { %1489 = vmatprep.subr.bf16.mxu0 %v6757_v36  ;;  %1542 = vmatprep.subr.bf16.mxu1 %v6759_v39  ;;  %v260_v36 = vld [vmem:[%s11057_s8 + $0x220] sm:$0xff]  ;;  %v6697_v39 = vcombine.high %v244_v29, %v252_v30 }
 0x104   :  { %v6713_v48 = vcombine.high %v260_v36, %v268_v37  ;;  %v6712_v51 = vcombine.low %v260_v36, %v268_v37  ;;  %v364_v22 = vld [vmem:[%s11057_s8 + $0x560] sm:$0xff]  ;;  %v6810_v36 = vcombine.low %v357_v25, %v365_v26 }
 0x106   :  { %1490 = vmatpush1.bf16.msra.mxu0 %v6756_v40  ;;  %1543 = vmatpush1.bf16.msra.mxu1 %v6758_v41  ;;  %v261_v40 = vld [vmem:[%s11057_s8 + $0x228] sm:$0xff] }
 0x107   :  { %1491 = vmatprep.subr.bf16.mxu0 %v6773_v43  ;;  %1544 = vmatprep.subr.bf16.mxu1 %v6775_v45  ;;  %v6696_v43 = vcombine.low %v244_v29, %v252_v30  ;;  %v276_v45 = vld [vmem:[%s11057_s8 + $0x2a0] sm:$0xff]  ;;  %v6794_v29 = vcombine.low %v341_v17, %v349_v18  ;;  %v6809_v30 = vcombine.high %v356_v21, %v364_v22 }
 0x10a   :  { %1492 = vmatpush1.bf16.msra.mxu0 %v6772_v50  ;;  %1545 = vmatpush1.bf16.msra.mxu1 %v6774_v53  ;;  %v292_v53 = vld [vmem:[%s11057_s8 + $0x320] sm:$0xff] }
 0x10b   :  { %1493 = vmatprep.subr.bf16.mxu0 %v6789_v54  ;;  %1546 = vmatprep.subr.bf16.mxu1 %v6791_v56  ;;  %v300_v54 = vld [vmem:[%s11057_s8 + $0x360] sm:$0xff]  ;;  %v6729_v56 = vcombine.high %v276_v45, %v284_v46 }
 0x10c   :  { %v6745_v0 = vcombine.high %v292_v53, %v300_v54 }
 0x10e   :  { %1494 = vmatpush1.bf16.msra.mxu0 %v6788_v59  ;;  %1547 = vmatpush1.bf16.msra.mxu1 %v6790_v61  ;;  %v6728_v59 = vcombine.low %v276_v45, %v284_v46  ;;  %v316_v61 = vld [vmem:[%s11057_s8 + $0x3e0] sm:$0xff]  ;;  %v214_v45 = vld [vmem:[%s11057_s8 + $0xb0] sm:$0xff] }
 0x10f   :  { %1495 = vmatprep.subr.bf16.mxu0 %v6805_v62  ;;  %1548 = vmatprep.subr.bf16.mxu1 %v6807_v1  ;;  %v309_v1 = vld [vmem:[%s11057_s8 + $0x3a8] sm:$0xff]  ;;  %v222_v46 = vld [vmem:[%s11057_s8 + $0xf0] sm:$0xff] }
 0x110   :  { %v6763_v11 = vcombine.high %v309_v1, %v317_v2 }
 0x112   :  { %1496 = vmatpush1.bf16.msra.mxu0 %v6804_v4  ;;  %1549 = vmatpush1.bf16.msra.mxu1 %v6806_v7  ;;  %v6744_v4 = vcombine.low %v292_v53, %v300_v54  ;;  %v6669_v54 = vcombine.high %v214_v45, %v222_v46 }
 0x113   :  { %1497 = vmatprep.subr.bf16.mxu0 %v6821_v8  ;;  %1550 = vmatprep.subr.bf16.mxu1 %v6823_v10  ;;  %v6761_v8 = vcombine.high %v308_v60, %v316_v61  ;;  %v333_v10 = vld [vmem:[%s11057_s8 + $0x468] sm:$0xff] }
 0x116   :  { %1498 = vmatpush1.bf16.msra.mxu0 %v6820_v12  ;;  %1551 = vmatpush1.bf16.msra.mxu1 %v6822_v15  ;;  %v6760_v12 = vcombine.low %v308_v60, %v316_v61  ;;  %v6762_v15 = vcombine.low %v309_v1, %v317_v2  ;;  %v6668_v60 = vcombine.low %v214_v45, %v222_v46  ;;  %v246_v61 = vld [vmem:[%s11057_s8 + $0x1b0] sm:$0xff]  ;;  %v247_v2 = vld [vmem:[%s11057_s8 + $0x1b8] sm:$0xff] }
 0x117   :  { %1581 = vmatprep.subr.bf16.mxu0 %v6649_v16  ;;  %1634 = vmatprep.subr.bf16.mxu1 %v6651_v19  ;;  %v6777_v16 = vcombine.high %v324_v5, %v332_v6  ;;  %v6779_v19 = vcombine.high %v325_v9, %v333_v10  ;;  %v254_v1 = vld [vmem:[%s11057_s8 + $0x1f0] sm:$0xff]  ;;  %v327_v46 = vld [vmem:[%s11057_s8 + $0x438] sm:$0xff] }
 0x118   :  { %v334_v45 = vld [vmem:[%s11057_s8 + $0x470] sm:$0xff] }
 0x119   :  { %1508 = vmatmul.mubr.bf16.vlgmr.msra.gmra.mrb[8].mxu0 %v8903_v42  ;;  %1561 = vmatmul.mubr.bf16.vlgmr.msra.gmra.mrb[8].mxu1 %v8903_v42  ;;  %v253_v42 = vld [vmem:[%s11057_s8 + $0x1e8] sm:$0xff] }
 0x11a   :  { %1582 = vmatpush1.bf16.msra.mxu0 %v6648_v20  ;;  %1635 = vmatpush1.bf16.msra.mxu1 %v6650_v23  ;;  %v6699_v41 = vcombine.high %v245_v33, %v253_v42  ;;  %v6698_v47 = vcombine.low %v245_v33, %v253_v42  ;;  %v6776_v20 = vcombine.low %v324_v5, %v332_v6  ;;  %v380_v33 = vld [vmem:[%s11057_s8 + $0x5e0] sm:$0xff]  ;;  %v373_v42 = vld [vmem:[%s11057_s8 + $0x5a8] sm:$0xff]  ;;  %v255_v5 = vld [vmem:[%s11057_s8 + $0x1f8] sm:$0xff] }
 0x11b   :  { %1583 = vmatprep.subr.bf16.mxu0 %v6665_v24  ;;  %1636 = vmatprep.subr.bf16.mxu1 %v6667_v27  ;;  %v6778_v23 = vcombine.low %v325_v9, %v333_v10  ;;  %v6793_v24 = vcombine.high %v340_v13, %v348_v14  ;;  %v6795_v27 = vcombine.high %v341_v17, %v349_v18  ;;  %v270_v10 = vld [vmem:[%s11057_s8 + $0x270] sm:$0xff] }
 0x11c   :  { %6837 = vmatprep.mubr.msk.bf16.mxu0 %vm1362_vm0, %v8917_v52  ;;  %6839 = vmatprep.mubr.msk.bf16.mxu1 %vm1362_vm0, %v8917_v52  ;;  %v269_v52 = vld [vmem:[%s11057_s8 + $0x268] sm:$0xff]  ;;  %v6701_v9 = vcombine.high %v246_v61, %v254_v1  ;;  %v6702_v17 = vcombine.low %v247_v2, %v255_v5 }
 0x11d   :  { %v6715_v50 = vcombine.high %v261_v40, %v269_v52  ;;  %v6714_v55 = vcombine.low %v261_v40, %v269_v52  ;;  %v206_v40 = vld [vmem:[%s11057_s8 + $0x70] sm:$0xff]  ;;  %v199_v52 = vld [vmem:[%s11057_s8 + $0x38] sm:$0xff] }
 0x11e   :  { %1584 = vmatpush1.bf16.msra.mxu0 %v6664_v28  ;;  %1637 = vmatpush1.bf16.msra.mxu1 %v6666_v31  ;;  %v6792_v28 = vcombine.low %v340_v13, %v348_v14  ;;  %v6811_v31 = vcombine.high %v357_v25, %v365_v26  ;;  %v271_v13 = vld [vmem:[%s11057_s8 + $0x278] sm:$0xff]  ;;  %v294_v25 = vld [vmem:[%s11057_s8 + $0x330] sm:$0xff] }
 0x11f   :  { %1585 = vmatprep.subr.bf16.mxu0 %v6681_v32  ;;  %1638 = vmatprep.subr.bf16.mxu1 %v6683_v34  ;;  %v372_v32 = vld [vmem:[%s11057_s8 + $0x5a0] sm:$0xff]  ;;  %v381_v34 = vld [vmem:[%s11057_s8 + $0x5e8] sm:$0xff]  ;;  %v9273_v14 = vld [vmem:[#allocation3 + $0x10] ss:$8 sps:$4 sm:$0xff]  }
 0x120   :  { %v6825_v37 = vcombine.high %v372_v32, %v380_v33 }
 0x121   :  { %1518 = vmatmul.mubr.bf16.gmra.mrb[12].mxu0 %v8941_v63  ;;  %1571 = vmatmul.mubr.bf16.gmra.mrb[12].mxu1 %v8941_v63  ;;  %v285_v63 = vld [vmem:[%s11057_s8 + $0x2e8] sm:$0xff] }
 0x122   :  { %1586 = vmatpush1.bf16.msra.mxu0 %v6680_v35  ;;  %1639 = vmatpush1.bf16.msra.mxu1 %v6682_v38  ;;  %v6731_v58 = vcombine.high %v277_v49, %v285_v63  ;;  %v6730_v62 = vcombine.low %v277_v49, %v285_v63  ;;  %v6808_v35 = vcombine.low %v356_v21, %v364_v22  ;;  %v215_v49 = vld [vmem:[%s11057_s8 + $0xb8] sm:$0xff] }
 0x123   :  { %1587 = vmatprep.subr.bf16.mxu0 %v6697_v39  ;;  %1640 = vmatprep.subr.bf16.mxu1 %v6699_v41  ;;  %v6827_v38 = vcombine.high %v373_v42, %v381_v34  ;;  %v198_v39 = vld [vmem:[%s11057_s8 + $0x30] sm:$0xff]  ;;  %v207_v41 = vld [vmem:[%s11057_s8 + $0x78] sm:$0xff] }
 0x124   :  { %6840 = vmatprep.mubr.msk.bf16.mxu0 %vm1362_vm0, %v8807_v44  ;;  %6842 = vmatprep.mubr.msk.bf16.mxu1 %vm1362_vm0, %v8807_v44  ;;  %v301_v44 = vld [vmem:[%s11057_s8 + $0x368] sm:$0xff]  ;;  %v223_v63 = vld [vmem:[%s11057_s8 + $0xf8] sm:$0xff]  ;;  %v6654_v53 = vcombine.low %v199_v52, %v207_v41 }
 0x125   :  { %v6747_v3 = vcombine.high %v293_v57, %v301_v44  ;;  %v6746_v7 = vcombine.low %v293_v57, %v301_v44  ;;  %v231_v57 = vld [vmem:[%s11057_s8 + $0x138] sm:$0xff]  ;;  %v6671_v44 = vcombine.high %v215_v49, %v223_v63 }
 0x126   :  { %1588 = vmatpush1.bf16.msra.mxu0 %v6696_v43  ;;  %1641 = vmatpush1.bf16.msra.mxu1 %v6698_v47  ;;  %v6824_v43 = vcombine.low %v372_v32, %v380_v33  ;;  %v6826_v47 = vcombine.low %v373_v42, %v381_v34  ;;  %v287_v22 = vld [vmem:[%s11057_s8 + $0x2f8] sm:$0xff]  ;;  %v310_v33 = vld [vmem:[%s11057_s8 + $0x3b0] sm:$0xff] }
 0x127   :  { %1589 = vmatprep.subr.bf16.mxu0 %v6713_v48  ;;  %1642 = vmatprep.subr.bf16.mxu1 %v6715_v50  ;;  %v6653_v48 = vcombine.high %v198_v39, %v206_v40  ;;  %v6655_v50 = vcombine.high %v199_v52, %v207_v41  ;;  %v318_v42 = vld [vmem:[%s11057_s8 + $0x3f0] sm:$0xff] }
 0x128   :  { %v6765_v41 = vcombine.high %v310_v33, %v318_v42 }
 0x12a   :  { %1590 = vmatpush1.bf16.msra.mxu0 %v6712_v51  ;;  %1643 = vmatpush1.bf16.msra.mxu1 %v6714_v55  ;;  %v6652_v51 = vcombine.low %v198_v39, %v206_v40  ;;  %v230_v55 = vld [vmem:[%s11057_s8 + $0x130] sm:$0xff] }
 0x12b   :  { %1591 = vmatprep.subr.bf16.mxu0 %v6729_v56  ;;  %1644 = vmatprep.subr.bf16.mxu1 %v6731_v58  ;;  %v238_v56 = vld [vmem:[%s11057_s8 + $0x170] sm:$0xff]  ;;  %v239_v58 = vld [vmem:[%s11057_s8 + $0x178] sm:$0xff] }
 0x12c   :  { %v6684_v6 = vcombine.low %v230_v55, %v238_v56  ;;  %v326_v40 = vld [vmem:[%s11057_s8 + $0x430] sm:$0xff] }
 0x12e   :  { %1592 = vmatpush1.bf16.msra.mxu0 %v6728_v59  ;;  %1645 = vmatpush1.bf16.msra.mxu1 %v6730_v62  ;;  %v9239_v59 = vld [vmem:[#allocation3] ss:$8 sps:$4 sm:$0xff]   ;;  %v6670_v62 = vcombine.low %v215_v49, %v223_v63  ;;  %v6781_v63 = vcombine.high %v326_v40, %v334_v45 }
 0x12f   :  { %1593 = vmatprep.subr.bf16.mxu0 %v6745_v0  ;;  %1646 = vmatprep.subr.bf16.mxu1 %v6747_v3  ;;  %v6685_v0 = vcombine.high %v230_v55, %v238_v56  ;;  %v9252_v3 = vld [vmem:[#allocation3 + $0x14] ss:$8 sps:$4 sm:$0xff]   ;;  %v6780_v56 = vcombine.low %v326_v40, %v334_v45 }
 0x130   :  { %v351_v55 = vld [vmem:[%s11057_s8 + $0x4f8] sm:$0xff]  ;;  %v7927_v40 = vld [vmem:[%s11058_s28 + $0xb0] sm:$0xff]  }
 0x131   :  { %v7931_v45 = vld [vmem:[%s11058_s28 + $0xb8] sm:$0xff]  }
 0x132   :  { %1594 = vmatpush1.bf16.msra.mxu0 %v6744_v4  ;;  %1647 = vmatpush1.bf16.msra.mxu1 %v6746_v7  ;;  %v6687_v4 = vcombine.high %v231_v57, %v239_v58  ;;  %v262_v7 = vld [vmem:[%s11057_s8 + $0x230] sm:$0xff] }
 0x133   :  { %1595 = vmatprep.subr.bf16.mxu0 %v6761_v8  ;;  %1648 = vmatprep.subr.bf16.mxu1 %v6763_v11  ;;  %v6686_v8 = vcombine.low %v231_v57, %v239_v58  ;;  %v263_v11 = vld [vmem:[%s11057_s8 + $0x238] sm:$0xff]  ;;  %v6717_v18 = vcombine.high %v262_v7, %v270_v10 }
 0x134   :  { %v6719_v21 = vcombine.high %v263_v11, %v271_v13  ;;  %v6718_v26 = vcombine.low %v263_v11, %v271_v13 }
 0x136   :  { %1596 = vmatpush1.bf16.msra.mxu0 %v6760_v12  ;;  %1649 = vmatpush1.bf16.msra.mxu1 %v6762_v15  ;;  %v6703_v12 = vcombine.high %v247_v2, %v255_v5  ;;  %v6700_v15 = vcombine.low %v246_v61, %v254_v1  ;;  %v366_v61 = vld [vmem:[%s11057_s8 + $0x570] sm:$0xff] }
 0x137   :  { %1597 = vmatprep.subr.bf16.mxu0 %v6777_v16  ;;  %1650 = vmatprep.subr.bf16.mxu1 %v6779_v19  ;;  %v278_v16 = vld [vmem:[%s11057_s8 + $0x2b0] sm:$0xff] }
 0x138   :  { %v286_v19 = vld [vmem:[%s11057_s8 + $0x2f0] sm:$0xff] }
 0x139   :  { %v6732_v32 = vcombine.low %v278_v16, %v286_v19 }
 0x13a   :  { %1598 = vmatpush1.bf16.msra.mxu0 %v6776_v20  ;;  %1651 = vmatpush1.bf16.msra.mxu1 %v6778_v23  ;;  %v279_v20 = vld [vmem:[%s11057_s8 + $0x2b8] sm:$0xff]  ;;  %v8231_v23 = vld [vmem:[#allocation3 + $0x4] ss:$8 sps:$4 sm:$0xff]  }
 0x13b   :  { %1599 = vmatprep.subr.bf16.mxu0 %v6793_v24  ;;  %1652 = vmatprep.subr.bf16.mxu1 %v6795_v27  ;;  %v6716_v24 = vcombine.low %v262_v7, %v270_v10  ;;  %v6733_v27 = vcombine.high %v278_v16, %v286_v19  ;;  %v6734_v34 = vcombine.low %v279_v20, %v287_v22  ;;  %v382_v7 = vld [vmem:[%s11057_s8 + $0x5f0] sm:$0xff]  ;;  %v7902_v19 = vld [vmem:[%s11058_s28] sm:$0xff]  }
 0x13e   :  { %1600 = vmatpush1.bf16.msra.mxu0 %v6792_v28  ;;  %1653 = vmatpush1.bf16.msra.mxu1 %v6794_v29  ;;  %v302_v28 = vld [vmem:[%s11057_s8 + $0x370] sm:$0xff]  ;;  %v295_v29 = vld [vmem:[%s11057_s8 + $0x338] sm:$0xff] }
 0x13f   :  { %1601 = vmatprep.subr.bf16.mxu0 %v6809_v30  ;;  %1654 = vmatprep.subr.bf16.mxu1 %v6811_v31  ;;  %v6735_v30 = vcombine.high %v279_v20, %v287_v22  ;;  %v303_v31 = vld [vmem:[%s11057_s8 + $0x378] sm:$0xff]  ;;  %v6748_v39 = vcombine.low %v294_v25, %v302_v28  ;;  %v7903_v20 = vld [vmem:[%s11058_s28 + $0x80] sm:$0xff]   ;;  %v7905_v22 = vld [vmem:[%s11058_s28 + $0xc8] sm:$0xff]  }
 0x140   :  { %v6750_v52 = vcombine.low %v295_v29, %v303_v31 }
 0x142   :  { %1602 = vmatpush1.bf16.msra.mxu0 %v6808_v35  ;;  %1655 = vmatpush1.bf16.msra.mxu1 %v6810_v36  ;;  %v6749_v35 = vcombine.high %v294_v25, %v302_v28  ;;  %v311_v36 = vld [vmem:[%s11057_s8 + $0x3b8] sm:$0xff]  ;;  %v7910_v25 = vld [vmem:[%s11058_s28 + $0x10] sm:$0xff]  }
 0x143   :  { %1603 = vmatprep.subr.bf16.mxu0 %v6825_v37  ;;  %1656 = vmatprep.subr.bf16.mxu1 %v6827_v38  ;;  %v319_v37 = vld [vmem:[%s11057_s8 + $0x3f8] sm:$0xff]  ;;  %v6751_v38 = vcombine.high %v295_v29, %v303_v31  ;;  %v7916_v31 = vld [vmem:[%s11058_s28 + $0x60] sm:$0xff]  }
 0x144   :  { %v6766_v49 = vcombine.low %v311_v36, %v319_v37  ;;  %v7913_v28 = vld [vmem:[%s11058_s28 + $0xd8] sm:$0xff]  }
 0x145   :  { %v7914_v29 = vld [vmem:[%s11058_s28 + $0x18] sm:$0xff]  }
 0x146   :  { %1604 = vmatpush1.bf16.msra.mxu0 %v6824_v43  ;;  %1657 = vmatpush1.bf16.msra.mxu1 %v6826_v47  ;;  %v6767_v43 = vcombine.high %v311_v36, %v319_v37  ;;  %v335_v47 = vld [vmem:[%s11057_s8 + $0x478] sm:$0xff]  ;;  %v7923_v36 = vld [vmem:[%s11058_s28 + $0xa8] sm:$0xff]   ;;  %v7924_v37 = vld [vmem:[%s11058_s28 + $0x70] sm:$0xff]  }
 0x147   :  { %1687 = vmatprep.subr.bf16.mxu0 %v6653_v48  ;;  %1740 = vmatprep.subr.bf16.mxu1 %v6655_v50  ;;  %v6764_v48 = vcombine.low %v310_v33, %v318_v42  ;;  %v6783_v50 = vcombine.high %v327_v46, %v335_v47  ;;  %v6782_v57 = vcombine.low %v327_v46, %v335_v47  ;;  %v7919_v33 = vld [vmem:[%s11058_s28 + $0xa0] sm:$0xff]   ;;  %v7920_v42 = vld [vmem:[%s11058_s28 + $0x68] sm:$0xff]  }
 0x148   :  { %v7932_v46 = vld [vmem:[%s11058_s28 + $0x140] sm:$0xff]  }
 0x149   :  { %1614 = vmatmul.mubr.bf16.vlgmr.msra.gmra.mrb[16].mxu0 %v9239_v59  ;;  %1667 = vmatmul.mubr.bf16.vlgmr.msra.gmra.mrb[16].mxu1 %v9239_v59  ;;  %v7933_v47 = vld [vmem:[%s11058_s28 + $0x1c0] sm:$0xff]  }
 0x14a   :  { %1688 = vmatpush1.bf16.msra.mxu0 %v6652_v51  ;;  %1741 = vmatpush1.bf16.msra.mxu1 %v6654_v53  ;;  %v342_v51 = vld [vmem:[%s11057_s8 + $0x4b0] sm:$0xff] }
 0x14b   :  { %1689 = vmatprep.subr.bf16.mxu0 %v6669_v54  ;;  %1742 = vmatprep.subr.bf16.mxu1 %v6671_v44  ;;  %v350_v53 = vld [vmem:[%s11057_s8 + $0x4f0] sm:$0xff]  ;;  %v343_v54 = vld [vmem:[%s11057_s8 + $0x4b8] sm:$0xff] }
 0x14c   :  { %6841 = vmatprep.mubr.msk.bf16.mxu0 %vm1362_vm0, %v9252_v3  ;;  %6843 = vmatprep.mubr.msk.bf16.mxu1 %vm1362_vm0, %v9252_v3  ;;  %v6797_v44 = vcombine.high %v342_v51, %v350_v53  ;;  %v6799_v58 = vcombine.high %v343_v54, %v351_v55  ;;  %v6796_v1 = vcombine.low %v342_v51, %v350_v53 }
 0x14d   :  { %v6798_v2 = vcombine.low %v343_v54, %v351_v55 }
 0x14e   :  { %1690 = vmatpush1.bf16.msra.mxu0 %v6668_v60  ;;  %1743 = vmatpush1.bf16.msra.mxu1 %v6670_v62  ;;  %v358_v60 = vld [vmem:[%s11057_s8 + $0x530] sm:$0xff]  ;;  %v359_v62 = vld [vmem:[%s11057_s8 + $0x538] sm:$0xff] }
 0x14f   :  { %1691 = vmatprep.subr.bf16.mxu0 %v6685_v0  ;;  %1744 = vmatprep.subr.bf16.mxu1 %v6687_v4  ;;  %v367_v0 = vld [vmem:[%s11057_s8 + $0x578] sm:$0xff]  ;;  %v6813_v4 = vcombine.high %v358_v60, %v366_v61  ;;  %v6812_v10 = vcombine.low %v358_v60, %v366_v61 }
 0x150   :  { %v6815_v5 = vcombine.high %v359_v62, %v367_v0  ;;  %v6814_v11 = vcombine.low %v359_v62, %v367_v0 }
 0x151   :  { %1624 = vmatmul.mubr.bf16.gmra.mrb[20].mxu0 %v9273_v14  ;;  %1677 = vmatmul.mubr.bf16.gmra.mrb[20].mxu1 %v9273_v14 }
 0x152   :  { %1692 = vmatpush1.bf16.msra.mxu0 %v6684_v6  ;;  %1745 = vmatpush1.bf16.msra.mxu1 %v6686_v8  ;;  %v374_v6 = vld [vmem:[%s11057_s8 + $0x5b0] sm:$0xff]  ;;  %v375_v8 = vld [vmem:[%s11057_s8 + $0x5b8] sm:$0xff] }
 0x153   :  { %1693 = vmatprep.subr.bf16.mxu0 %v6701_v9  ;;  %1746 = vmatprep.subr.bf16.mxu1 %v6703_v12  ;;  %v383_v9 = vld [vmem:[%s11057_s8 + $0x5f8] sm:$0xff]  ;;  %v6829_v12 = vcombine.high %v374_v6, %v382_v7 }
 0x154   :  { %6844 = vmatprep.mubr.msk.bf16.mxu0 %vm1362_vm0, %v8231_v23  ;;  %6846 = vmatprep.mubr.msk.bf16.mxu1 %vm1362_vm0, %v8231_v23  ;;  %v6831_v13 = vcombine.high %v375_v8, %v383_v9  ;;  %v6830_v16 = vcombine.low %v375_v8, %v383_v9  ;;  %v7906_v23 = vld [vmem:[%s11058_s28 + $0x8] sm:$0xff]  }
 0x155   :  { %v7936_v8 = vld [vmem:[%s11058_s28 + $0x148] sm:$0xff]  }
 0x156   :  { %1694 = vmatpush1.bf16.msra.mxu0 %v6700_v15  ;;  %1747 = vmatpush1.bf16.msra.mxu1 %v6702_v17  ;;  %v6828_v15 = vcombine.low %v374_v6, %v382_v7  ;;  %v7900_v17 = vld [vmem:[%s11058_s28 + $0x40] sm:$0xff]   ;;  %v7937_v9 = vld [vmem:[%s11058_s28 + $0x1c8] sm:$0xff]  }
 0x157   :  { %1695 = vmatprep.subr.bf16.mxu0 %v6717_v18  ;;  %1748 = vmatprep.subr.bf16.mxu1 %v6719_v21  ;;  %v7901_v18 = vld [vmem:[%s11058_s28 + $0xc0] sm:$0xff]   ;;  %v7904_v21 = vld [vmem:[%s11058_s28 + $0x48] sm:$0xff]  }
 0x158   :  { %v7935_v7 = vld [vmem:[%s11058_s28 + $0x180] sm:$0xff]  }
 0x15a   :  { %1696 = vmatpush1.bf16.msra.mxu0 %v6716_v24  ;;  %1749 = vmatpush1.bf16.msra.mxu1 %v6718_v26  ;;  %v7907_v24 = vld [vmem:[%s11058_s28 + $0x88] sm:$0xff]   ;;  %v7911_v26 = vld [vmem:[%s11058_s28 + $0x90] sm:$0xff]  }
 0x15b   :  { %1697 = vmatprep.subr.bf16.mxu0 %v6733_v27  ;;  %1750 = vmatprep.subr.bf16.mxu1 %v6735_v30  ;;  %v7912_v27 = vld [vmem:[%s11058_s28 + $0x58] sm:$0xff]  }
 0x15c   :  { %v7915_v30 = vld [vmem:[%s11058_s28 + $0x98] sm:$0xff]  }
 0x15e   :  { %1698 = vmatpush1.bf16.msra.mxu0 %v6732_v32  ;;  %1751 = vmatpush1.bf16.msra.mxu1 %v6734_v34  ;;  %v7918_v32 = vld [vmem:[%s11058_s28 + $0x20] sm:$0xff]   ;;  %v7921_v34 = vld [vmem:[%s11058_s28 + $0xe8] sm:$0xff]  }
 0x15f   :  { %1699 = vmatprep.subr.bf16.mxu0 %v6749_v35  ;;  %1752 = vmatprep.subr.bf16.mxu1 %v6751_v38  ;;  %v7922_v35 = vld [vmem:[%s11058_s28 + $0x28] sm:$0xff]   ;;  %v7925_v38 = vld [vmem:[%s11058_s28 + $0xf0] sm:$0xff]  }
 0x162   :  { %1700 = vmatpush1.bf16.msra.mxu0 %v6748_v39  ;;  %1753 = vmatpush1.bf16.msra.mxu1 %v6750_v52  ;;  %v7926_v39 = vld [vmem:[%s11058_s28 + $0x30] sm:$0xff]   ;;  %v7928_v52 = vld [vmem:[%s11058_s28 + $0x78] sm:$0xff]  }
 0x163   :  { %1701 = vmatprep.subr.bf16.mxu0 %v6765_v41  ;;  %1754 = vmatprep.subr.bf16.mxu1 %v6767_v43  ;;  %v7929_v41 = vld [vmem:[%s11058_s28 + $0xf8] sm:$0xff]  }
 0x164   :  { %v7930_v43 = vld [vmem:[%s11058_s28 + $0x38] sm:$0xff]  }
 0x166   :  { %1702 = vmatpush1.bf16.msra.mxu0 %v6764_v48  ;;  %1755 = vmatpush1.bf16.msra.mxu1 %v6766_v49 }
 0x167   :  { %1703 = vmatprep.subr.bf16.mxu0 %v6781_v63  ;;  %1756 = vmatprep.subr.bf16.mxu1 %v6783_v50 }
 0x16a   :  { %1704 = vmatpush1.bf16.msra.mxu0 %v6780_v56  ;;  %1757 = vmatpush1.bf16.msra.mxu1 %v6782_v57 }
 0x16b   :  { %1705 = vmatprep.subr.bf16.mxu0 %v6797_v44  ;;  %1758 = vmatprep.subr.bf16.mxu1 %v6799_v58 }
 0x16e   :  { %1706 = vmatpush1.bf16.msra.mxu0 %v6796_v1  ;;  %1759 = vmatpush1.bf16.msra.mxu1 %v6798_v2 }
 0x16f   :  { %1707 = vmatprep.subr.bf16.mxu0 %v6813_v4  ;;  %1760 = vmatprep.subr.bf16.mxu1 %v6815_v5  ;;  %v7934_v5 = vld [vmem:[%s11058_s28 + $0x100] sm:$0xff]  }
 0x172   :  { %1708 = vmatpush1.bf16.msra.mxu0 %v6812_v10  ;;  %1761 = vmatpush1.bf16.msra.mxu1 %v6814_v11 }
 0x173   :  { %1709 = vmatprep.subr.bf16.mxu0 %v6829_v12  ;;  %1762 = vmatprep.subr.bf16.mxu1 %v6831_v13 }
 0x176   :  { %1710 = vmatpush1.bf16.msra.mxu0 %v6828_v15  ;;  %1763 = vmatpush1.bf16.msra.mxu1 %v6830_v16  ;;  %v7938_v15 = vld [vmem:[%s11058_s28 + $0x108] sm:$0xff]  }
 0x177   :  { %7020 = vmatprep.subr.bf16.mxu0 %v7900_v17  ;;  %7048 = vmatprep.subr.bf16.mxu1 %v7901_v18 }
 0x179   :  { %1720 = vmatmul.mubr.bf16.vlgmr.msra.gmra.mrb[24].mxu0 %v9239_v59  ;;  %1773 = vmatmul.mubr.bf16.vlgmr.msra.gmra.mrb[24].mxu1 %v9239_v59  ;;  %v7908_v59 = vld [vmem:[%s11058_s28 + $0x50] sm:$0xff]  }
 0x17a   :  { %6845 = vmatprep.mubr.msk.bf16.mxu0 %vm1362_vm0, %v9252_v3  ;;  %6847 = vmatprep.mubr.msk.bf16.mxu1 %vm1362_vm0, %v9252_v3  ;;  %v7909_v3 = vld [vmem:[%s11058_s28 + $0xd0] sm:$0xff]  }
 0x17b   :  { %7021 = vmatpush3.bf16.msra.mxu0 %v7902_v19  ;;  %7049 = vmatpush3.bf16.msra.mxu1 %v7903_v20  ;;  %v7939_v20 = vld [vmem:[%s11058_s28 + $0x188] sm:$0xff]  }
 0x17c   :  { %7022 = vmatprep.subr.bf16.mxu0 %v7904_v21  ;;  %7050 = vmatprep.subr.bf16.mxu1 %v7905_v22  ;;  %v7940_v21 = vld [vmem:[%s11058_s28 + $0x150] sm:$0xff]  }
 0x17f   :  { %7023 = vmatpush3.bf16.msra.mxu0 %v7906_v23  ;;  %7051 = vmatpush3.bf16.msra.mxu1 %v7907_v24 }
 0x180   :  { %7024 = vmatprep.subr.bf16.mxu0 %v7908_v59  ;;  %7052 = vmatprep.subr.bf16.mxu1 %v7909_v3  ;;  %v7941_v3 = vld [vmem:[%s11058_s28 + $0x1d0] sm:$0xff]  }
 0x181   :  { %1730 = vmatmul.mubr.bf16.gmra.mrb[28].mxu0 %v9273_v14  ;;  %1783 = vmatmul.mubr.bf16.gmra.mrb[28].mxu1 %v9273_v14  ;;  %v7917_v14 = vld [vmem:[%s11058_s28 + $0xe0] sm:$0xff]  }
 0x183   :  { %7025 = vmatpush3.bf16.msra.mxu0 %v7910_v25  ;;  %7053 = vmatpush3.bf16.msra.mxu1 %v7911_v26 }
 0x184   :  { %7026 = vmatprep.subr.bf16.mxu0 %v7912_v27  ;;  %7054 = vmatprep.subr.bf16.mxu1 %v7913_v28 }
 0x187   :  { %7027 = vmatpush3.bf16.msra.mxu0 %v7914_v29  ;;  %7055 = vmatpush3.bf16.msra.mxu1 %v7915_v30  ;;  %v7942_v30 = vld [vmem:[%s11058_s28 + $0x110] sm:$0xff]  }
 0x188   :  { %7028 = vmatprep.subr.bf16.mxu0 %v7916_v31  ;;  %7056 = vmatprep.subr.bf16.mxu1 %v7917_v14 }
 0x18b   :  { %7029 = vmatpush3.bf16.msra.mxu0 %v7918_v32  ;;  %7057 = vmatpush3.bf16.msra.mxu1 %v7919_v33  ;;  %v7943_v32 = vld [vmem:[%s11058_s28 + $0x190] sm:$0xff]   ;;  %v7944_v33 = vld [vmem:[%s11058_s28 + $0x158] sm:$0xff]  }
 0x18c   :  { %7030 = vmatprep.subr.bf16.mxu0 %v7920_v42  ;;  %7058 = vmatprep.subr.bf16.mxu1 %v7921_v34  ;;  %v7945_v34 = vld [vmem:[%s11058_s28 + $0x1d8] sm:$0xff]  }
 0x18f   :  { %7031 = vmatpush3.bf16.msra.mxu0 %v7922_v35  ;;  %7059 = vmatpush3.bf16.msra.mxu1 %v7923_v36  ;;  %v7946_v35 = vld [vmem:[%s11058_s28 + $0x118] sm:$0xff]  }
 0x190   :  { %7032 = vmatprep.subr.bf16.mxu0 %v7924_v37  ;;  %7060 = vmatprep.subr.bf16.mxu1 %v7925_v38  ;;  %v7947_v36 = vld [vmem:[%s11058_s28 + $0x198] sm:$0xff]   ;;  %v7948_v37 = vld [vmem:[%s11058_s28 + $0x160] sm:$0xff]  }
 0x191   :  { %v7949_v38 = vld [vmem:[%s11058_s28 + $0x1e0] sm:$0xff]  }
 0x193   :  { %7033 = vmatpush3.bf16.msra.mxu0 %v7926_v39  ;;  %7061 = vmatpush3.bf16.msra.mxu1 %v7927_v40  ;;  %v7950_v39 = vld [vmem:[%s11058_s28 + $0x120] sm:$0xff]  }
 0x194   :  { %7034 = vmatprep.subr.bf16.mxu0 %v7928_v52  ;;  %7062 = vmatprep.subr.bf16.mxu1 %v7929_v41  ;;  %v7951_v40 = vld [vmem:[%s11058_s28 + $0x1a0] sm:$0xff]   ;;  %v7952_v52 = vld [vmem:[%s11058_s28 + $0x168] sm:$0xff]  }
 0x195   :  { %v7953_v41 = vld [vmem:[%s11058_s28 + $0x1e8] sm:$0xff]  }
 0x197   :  { %7035 = vmatpush3.bf16.msra.mxu0 %v7930_v43  ;;  %7063 = vmatpush3.bf16.msra.mxu1 %v7931_v45  ;;  %v7954_v43 = vld [vmem:[%s11058_s28 + $0x128] sm:$0xff]  }
 0x198   :  { %7076 = vmatprep.subr.bf16.mxu0 %v7932_v46  ;;  %7104 = vmatprep.subr.bf16.mxu1 %v7933_v47  ;;  %v7955_v45 = vld [vmem:[%s11058_s28 + $0x1a8] sm:$0xff]   ;;  %v7956_v46 = vld [vmem:[%s11058_s28 + $0x170] sm:$0xff]  }
 0x199   :  { %v7957_v47 = vld [vmem:[%s11058_s28 + $0x1f0] sm:$0xff]  }
 0x1bc   :  { %v1403_v48 = vpop.f32.mrb[0].mxu0  ;;  %v1456_v63 = vpop.f32.mrb[0].mxu1 }
 0x1bd   :  { %v1793_v49 = vmax.f32 %v1403_v48, 0.0  ;;  %v1405_v50 = vpop.f32.mrb[1].mxu0  ;;  %v1795_v51 = vmax.f32 %v1456_v63, 0.0  ;;  %v1458_v53 = vpop.f32.mrb[1].mxu1  ;;  %v7958_v48 = vld [vmem:[%s11058_s28 + $0x130] sm:$0xff]   ;;  %v7960_v63 = vld [vmem:[%s11058_s28 + $0x178] sm:$0xff]  }
 0x1be   :  { %v1407_v54 = vpop.f32.mrb[2].mxu0  ;;  %v1796_v55 = vmax.f32 %v1458_v53, 0.0  ;;  %v1460_v57 = vpop.f32.mrb[2].mxu1  ;;  %v1794_v58 = vmax.f32 %v1405_v50, 0.0  ;;  %v7961_v50 = vld [vmem:[%s11058_s28 + $0x1f8] sm:$0xff]  }
 0x1bf   :  { %v1809_v56 = vmax.f32 %v1407_v54, 0.0  ;;  %v1409_v44 = vpop.f32.mrb[3].mxu0  ;;  %v1811_v60 = vmax.f32 %v1460_v57, 0.0  ;;  %v1462_v62 = vpop.f32.mrb[3].mxu1  ;;  %v7963_v53 = vld [vmem:[%s11058_s28 + $0x1b8] sm:$0xff]   ;;  %v7964_v54 = vld [vmem:[%s11058_s28 + $0x240] sm:$0xff]  }
 0x1c0   :  { %v1810_v61 = vmax.f32 %v1409_v44, 0.0  ;;  %v1812_v1 = vmax.f32 %v1462_v62, 0.0 }
 0x1c1   :  { %v1857_v0 = vpack.c.bf16 %v1809_v56, %v1793_v49  ;;  %v1859_v2 = vpack.c.bf16 %v1811_v60, %v1795_v51  ;;  %v7959_v49 = vld [vmem:[%s11058_s28 + $0x1b0] sm:$0xff]   ;;  %v7962_v51 = vld [vmem:[%s11058_s28 + $0x138] sm:$0xff]  }
 0x1c2   :  { %v1858_v4 = vpack.c.bf16 %v1810_v61, %v1794_v58  ;;  %v1860_v6 = vpack.c.bf16 %v1812_v1, %v1796_v55  ;;  %v7965_v55 = vld [vmem:[%s11058_s28 + $0x2c0] sm:$0xff]  }
 0x1c4   :  { %2952 = vmatprep.mubr.bf16.mxu0 %v1858_v4  ;;  %v1413_v10 = vpop.f32.mrb[4].mxu0  ;;  %3001 = vmatprep.mubr.bf16.mxu1 %v1860_v6  ;;  %v1466_v13 = vpop.f32.mrb[4].mxu1 }
 0x1c5   :  { %2953 = vmatmul.mubr.bf16.vlgmr.msra.gmra.mrb[32].mxu0 %v1857_v0  ;;  %v1825_v11 = vmax.f32 %v1413_v10, 0.0  ;;  %v1415_v12 = vpop.f32.mrb[5].mxu0  ;;  %3002 = vmatmul.mubr.bf16.vlgmr.msra.gmra.mrb[32].mxu1 %v1859_v2  ;;  %v1827_v18 = vmax.f32 %v1466_v13, 0.0  ;;  %v1468_v19 = vpop.f32.mrb[5].mxu1  ;;  %v7966_v13 = vld [vmem:[%s11058_s28 + $0x200] sm:$0xff]  }
 0x1c6   :  { %7077 = vmatpush3.bf16.msra.mxu0 %v7934_v5  ;;  %v1826_v16 = vmax.f32 %v1415_v12, 0.0  ;;  %v1417_v17 = vpop.f32.mrb[6].mxu0  ;;  %7105 = vmatpush3.bf16.msra.mxu1 %v7935_v7  ;;  %v1828_v24 = vmax.f32 %v1468_v19, 0.0  ;;  %v1470_v59 = vpop.f32.mrb[6].mxu1  ;;  %v7969_v19 = vld [vmem:[%s11058_s28 + $0x2c8] sm:$0xff]  }
 0x1c7   :  { %7078 = vmatprep.subr.bf16.mxu0 %v7936_v8  ;;  %v1841_v22 = vmax.f32 %v1417_v17, 0.0  ;;  %v1419_v23 = vpop.f32.mrb[7].mxu0  ;;  %7106 = vmatprep.subr.bf16.mxu1 %v7937_v9  ;;  %v1843_v26 = vmax.f32 %v1470_v59, 0.0  ;;  %v1472_v27 = vpop.f32.mrb[7].mxu1  ;;  %v7968_v17 = vld [vmem:[%s11058_s28 + $0x248] sm:$0xff]  }
 0x1c8   :  { %v1842_v25 = vmax.f32 %v1419_v23, 0.0  ;;  %v1844_v29 = vmax.f32 %v1472_v27, 0.0 }
 0x1c9   :  { %v1873_v28 = vpack.c.bf16 %v1841_v22, %v1825_v11  ;;  %v1875_v14 = vpack.c.bf16 %v1843_v26, %v1827_v18 }
 0x1ca   :  { %7079 = vmatpush3.bf16.msra.mxu0 %v7938_v15  ;;  %v1874_v31 = vpack.c.bf16 %v1842_v25, %v1826_v16  ;;  %7107 = vmatpush3.bf16.msra.mxu1 %v7939_v20  ;;  %v1876_v42 = vpack.c.bf16 %v1844_v29, %v1828_v24  ;;  %v7967_v16 = vld [vmem:[%s11058_s28 + $0x280] sm:$0xff]   ;;  %v7970_v25 = vld [vmem:[%s11058_s28 + $0x208] sm:$0xff]  }
 0x1cb   :  { %7080 = vmatprep.subr.bf16.mxu0 %v7940_v21  ;;  %7108 = vmatprep.subr.bf16.mxu1 %v7941_v3 }
 0x1cc   :  { %2960 = vmatprep.mubr.bf16.mxu0 %v1874_v31  ;;  %3009 = vmatprep.mubr.bf16.mxu1 %v1876_v42  ;;  %v7972_v31 = vld [vmem:[%s11058_s28 + $0x250] sm:$0xff]  }
 0x1cd   :  { %2961 = vmatmul.mubr.bf16.gmra.mrb[36].mxu0 %v1873_v28  ;;  %3010 = vmatmul.mubr.bf16.gmra.mrb[36].mxu1 %v1875_v14  ;;  %v7973_v42 = vld [vmem:[%s11058_s28 + $0x2d0] sm:$0xff]  }
 0x1ce   :  { %7081 = vmatpush3.bf16.msra.mxu0 %v7942_v30  ;;  %7109 = vmatpush3.bf16.msra.mxu1 %v7943_v32  ;;  %v7971_v30 = vld [vmem:[%s11058_s28 + $0x288] sm:$0xff]  }
 0x1cf   :  { %7082 = vmatprep.subr.bf16.mxu0 %v7944_v33  ;;  %7110 = vmatprep.subr.bf16.mxu1 %v7945_v34 }
 0x1d2   :  { %7083 = vmatpush3.bf16.msra.mxu0 %v7946_v35  ;;  %7111 = vmatpush3.bf16.msra.mxu1 %v7947_v36 }
 0x1d3   :  { %7084 = vmatprep.subr.bf16.mxu0 %v7948_v37  ;;  %7112 = vmatprep.subr.bf16.mxu1 %v7949_v38  ;;  %v7974_v38 = vld [vmem:[%s11058_s28 + $0x210] sm:$0xff]  }
 0x1d6   :  { %7085 = vmatpush3.bf16.msra.mxu0 %v7950_v39  ;;  %7113 = vmatpush3.bf16.msra.mxu1 %v7951_v40  ;;  %v7975_v40 = vld [vmem:[%s11058_s28 + $0x290] sm:$0xff]  }
 0x1d7   :  { %7086 = vmatprep.subr.bf16.mxu0 %v7952_v52  ;;  %7114 = vmatprep.subr.bf16.mxu1 %v7953_v41  ;;  %v7976_v52 = vld [vmem:[%s11058_s28 + $0x258] sm:$0xff]  }
 0x1d8   :  { %v7977_v41 = vld [vmem:[%s11058_s28 + $0x2d8] sm:$0xff]  }
 0x1da   :  { %7087 = vmatpush3.bf16.msra.mxu0 %v7954_v43  ;;  %7115 = vmatpush3.bf16.msra.mxu1 %v7955_v45  ;;  %v7978_v43 = vld [vmem:[%s11058_s28 + $0x218] sm:$0xff]  }
 0x1db   :  { %7088 = vmatprep.subr.bf16.mxu0 %v7956_v46  ;;  %7116 = vmatprep.subr.bf16.mxu1 %v7957_v47  ;;  %v7979_v45 = vld [vmem:[%s11058_s28 + $0x298] sm:$0xff]   ;;  %v7980_v46 = vld [vmem:[%s11058_s28 + $0x260] sm:$0xff]  }
 0x1dc   :  { %v7981_v47 = vld [vmem:[%s11058_s28 + $0x2e0] sm:$0xff]  }
 0x1de   :  { %7089 = vmatpush3.bf16.msra.mxu0 %v7958_v48  ;;  %7117 = vmatpush3.bf16.msra.mxu1 %v7959_v49  ;;  %v7982_v48 = vld [vmem:[%s11058_s28 + $0x220] sm:$0xff]  }
 0x1df   :  { %7090 = vmatprep.subr.bf16.mxu0 %v7960_v63  ;;  %7118 = vmatprep.subr.bf16.mxu1 %v7961_v50  ;;  %v7983_v49 = vld [vmem:[%s11058_s28 + $0x2a0] sm:$0xff]   ;;  %v7984_v63 = vld [vmem:[%s11058_s28 + $0x268] sm:$0xff]  }
 0x1e0   :  { %v7985_v50 = vld [vmem:[%s11058_s28 + $0x2e8] sm:$0xff]  }
 0x1e2   :  { %7091 = vmatpush3.bf16.msra.mxu0 %v7962_v51  ;;  %7119 = vmatpush3.bf16.msra.mxu1 %v7963_v53  ;;  %v7986_v51 = vld [vmem:[%s11058_s28 + $0x228] sm:$0xff]  }
 0x1e3   :  { %7132 = vmatprep.subr.bf16.mxu0 %v7964_v54  ;;  %7160 = vmatprep.subr.bf16.mxu1 %v7965_v55  ;;  %v7987_v53 = vld [vmem:[%s11058_s28 + $0x2a8] sm:$0xff]   ;;  %v7988_v54 = vld [vmem:[%s11058_s28 + $0x270] sm:$0xff]  }
 0x1e4   :  { %v7989_v55 = vld [vmem:[%s11058_s28 + $0x2f0] sm:$0xff]  }
 0x1ec   :  { %v1509_v56 = vpop.f32.mrb[8].mxu0  ;;  %v1562_v44 = vpop.f32.mrb[8].mxu1 }
 0x1ed   :  { %v1797_v57 = vmax.f32 %v1509_v56, 0.0  ;;  %v1511_v58 = vpop.f32.mrb[9].mxu0  ;;  %v1799_v60 = vmax.f32 %v1562_v44, 0.0  ;;  %v1564_v61 = vpop.f32.mrb[9].mxu1  ;;  %v7990_v56 = vld [vmem:[%s11058_s28 + $0x230] sm:$0xff]   ;;  %v7992_v44 = vld [vmem:[%s11058_s28 + $0x278] sm:$0xff]  }
 0x1ee   :  { %v1513_v62 = vpop.f32.mrb[10].mxu0  ;;  %v1800_v0 = vmax.f32 %v1564_v61, 0.0  ;;  %v1566_v2 = vpop.f32.mrb[10].mxu1  ;;  %v1798_v5 = vmax.f32 %v1511_v58, 0.0  ;;  %v7993_v58 = vld [vmem:[%s11058_s28 + $0x2f8] sm:$0xff]  }
 0x1ef   :  { %v1813_v1 = vmax.f32 %v1513_v62, 0.0  ;;  %v1515_v4 = vpop.f32.mrb[11].mxu0  ;;  %v1815_v6 = vmax.f32 %v1566_v2, 0.0  ;;  %v1568_v8 = vpop.f32.mrb[11].mxu1  ;;  %v7995_v61 = vld [vmem:[%s11058_s28 + $0x2b8] sm:$0xff]   ;;  %v7996_v62 = vld [vmem:[%s11058_s28 + $0x340] sm:$0xff]  }
 0x1f0   :  { %v1814_v7 = vmax.f32 %v1515_v4, 0.0  ;;  %v1816_v10 = vmax.f32 %v1568_v8, 0.0 }
 0x1f1   :  { %v1861_v9 = vpack.c.bf16 %v1813_v1, %v1797_v57  ;;  %v1863_v11 = vpack.c.bf16 %v1815_v6, %v1799_v60  ;;  %v7991_v57 = vld [vmem:[%s11058_s28 + $0x2b0] sm:$0xff]   ;;  %v7994_v60 = vld [vmem:[%s11058_s28 + $0x238] sm:$0xff]  }
 0x1f2   :  { %v1862_v12 = vpack.c.bf16 %v1814_v7, %v1798_v5  ;;  %v1864_v15 = vpack.c.bf16 %v1816_v10, %v1800_v0  ;;  %v7997_v0 = vld [vmem:[%s11058_s28 + $0x3c0] sm:$0xff]  }
 0x1f4   :  { %v1519_v18 = vpop.f32.mrb[12].mxu0  ;;  %3050 = vmatprep.mubr.bf16.mxu0 %v1862_v12  ;;  %3099 = vmatprep.mubr.bf16.mxu1 %v1864_v15  ;;  %v1572_v22 = vpop.f32.mrb[12].mxu1 }
 0x1f5   :  { %v1829_v20 = vmax.f32 %v1519_v18, 0.0  ;;  %v1521_v21 = vpop.f32.mrb[13].mxu0  ;;  %3051 = vmatmul.mubr.bf16.vlgmr.msra.gmra.mrb[40].mxu0 %v1861_v9  ;;  %3100 = vmatmul.mubr.bf16.vlgmr.msra.gmra.mrb[40].mxu1 %v1863_v11  ;;  %v1831_v59 = vmax.f32 %v1572_v22, 0.0  ;;  %v1574_v3 = vpop.f32.mrb[13].mxu1  ;;  %v7998_v22 = vld [vmem:[%s11058_s28 + $0x300] sm:$0xff]  }
 0x1f6   :  { %v1830_v23 = vmax.f32 %v1521_v21, 0.0  ;;  %v1523_v24 = vpop.f32.mrb[14].mxu0  ;;  %7133 = vmatpush3.bf16.msra.mxu0 %v7966_v13  ;;  %v1832_v28 = vmax.f32 %v1574_v3, 0.0  ;;  %v1576_v29 = vpop.f32.mrb[14].mxu1  ;;  %7161 = vmatpush3.bf16.msra.mxu1 %v7967_v16 }
 0x1f7   :  { %v1845_v26 = vmax.f32 %v1523_v24, 0.0  ;;  %v1525_v27 = vpop.f32.mrb[15].mxu0  ;;  %7134 = vmatprep.subr.bf16.mxu0 %v7968_v17  ;;  %v1847_v32 = vmax.f32 %v1576_v29, 0.0  ;;  %v1578_v33 = vpop.f32.mrb[15].mxu1  ;;  %7162 = vmatprep.subr.bf16.mxu1 %v7969_v19  ;;  %v7999_v24 = vld [vmem:[%s11058_s28 + $0x380] sm:$0xff]  }
 0x1f8   :  { %v1846_v14 = vmax.f32 %v1525_v27, 0.0  ;;  %v1848_v35 = vmax.f32 %v1578_v33, 0.0 }
 0x1f9   :  { %v1877_v34 = vpack.c.bf16 %v1845_v26, %v1829_v20  ;;  %v1879_v37 = vpack.c.bf16 %v1847_v32, %v1831_v59  ;;  %v8000_v59 = vld [vmem:[%s11058_s28 + $0x348] sm:$0xff]  }
 0x1fa   :  { %v1878_v36 = vpack.c.bf16 %v1846_v14, %v1830_v23  ;;  %7135 = vmatpush3.bf16.msra.mxu0 %v7970_v25  ;;  %v1880_v39 = vpack.c.bf16 %v1848_v35, %v1832_v28  ;;  %7163 = vmatpush3.bf16.msra.mxu1 %v7971_v30  ;;  %v8001_v25 = vld [vmem:[%s11058_s28 + $0x3c8] sm:$0xff]  }
 0x1fb   :  { %7136 = vmatprep.subr.bf16.mxu0 %v7972_v31  ;;  %7164 = vmatprep.subr.bf16.mxu1 %v7973_v42  ;;  %v8002_v32 = vld [vmem:[%s11058_s28 + $0x308] sm:$0xff]  }
 0x1fc   :  { %3058 = vmatprep.mubr.bf16.mxu0 %v1878_v36  ;;  %3107 = vmatprep.mubr.bf16.mxu1 %v1880_v39  ;;  %v8003_v36 = vld [vmem:[%s11058_s28 + $0x388] sm:$0xff]  }
 0x1fd   :  { %3059 = vmatmul.mubr.bf16.gmra.mrb[44].mxu0 %v1877_v34  ;;  %3108 = vmatmul.mubr.bf16.gmra.mrb[44].mxu1 %v1879_v37  ;;  %v8004_v37 = vld [vmem:[%s11058_s28 + $0x350] sm:$0xff]  }
 0x1fe   :  { %7137 = vmatpush3.bf16.msra.mxu0 %v7974_v38  ;;  %7165 = vmatpush3.bf16.msra.mxu1 %v7975_v40 }
 0x1ff   :  { %7138 = vmatprep.subr.bf16.mxu0 %v7976_v52  ;;  %7166 = vmatprep.subr.bf16.mxu1 %v7977_v41  ;;  %v8005_v52 = vld [vmem:[%s11058_s28 + $0x3d0] sm:$0xff]  }
 0x202   :  { %7139 = vmatpush3.bf16.msra.mxu0 %v7978_v43  ;;  %7167 = vmatpush3.bf16.msra.mxu1 %v7979_v45 }
 0x203   :  { %7140 = vmatprep.subr.bf16.mxu0 %v7980_v46  ;;  %7168 = vmatprep.subr.bf16.mxu1 %v7981_v47  ;;  %v8006_v47 = vld [vmem:[%s11058_s28 + $0x310] sm:$0xff]  }
 0x206   :  { %7141 = vmatpush3.bf16.msra.mxu0 %v7982_v48  ;;  %7169 = vmatpush3.bf16.msra.mxu1 %v7983_v49  ;;  %v8007_v49 = vld [vmem:[%s11058_s28 + $0x390] sm:$0xff]  }
 0x207   :  { %7142 = vmatprep.subr.bf16.mxu0 %v7984_v63  ;;  %7170 = vmatprep.subr.bf16.mxu1 %v7985_v50  ;;  %v8008_v63 = vld [vmem:[%s11058_s28 + $0x358] sm:$0xff]  }
 0x208   :  { %v8009_v50 = vld [vmem:[%s11058_s28 + $0x3d8] sm:$0xff]  }
 0x20a   :  { %7143 = vmatpush3.bf16.msra.mxu0 %v7986_v51  ;;  %7171 = vmatpush3.bf16.msra.mxu1 %v7987_v53  ;;  %v8010_v51 = vld [vmem:[%s11058_s28 + $0x318] sm:$0xff]  }
 0x20b   :  { %7144 = vmatprep.subr.bf16.mxu0 %v7988_v54  ;;  %7172 = vmatprep.subr.bf16.mxu1 %v7989_v55  ;;  %v8011_v53 = vld [vmem:[%s11058_s28 + $0x398] sm:$0xff]   ;;  %v8012_v54 = vld [vmem:[%s11058_s28 + $0x360] sm:$0xff]  }
 0x20c   :  { %v8013_v55 = vld [vmem:[%s11058_s28 + $0x3e0] sm:$0xff]  }
 0x20e   :  { %7145 = vmatpush3.bf16.msra.mxu0 %v7990_v56  ;;  %7173 = vmatpush3.bf16.msra.mxu1 %v7991_v57  ;;  %v8014_v56 = vld [vmem:[%s11058_s28 + $0x320] sm:$0xff]  }
 0x20f   :  { %7146 = vmatprep.subr.bf16.mxu0 %v7992_v44  ;;  %7174 = vmatprep.subr.bf16.mxu1 %v7993_v58  ;;  %v8015_v57 = vld [vmem:[%s11058_s28 + $0x3a0] sm:$0xff]   ;;  %v8016_v44 = vld [vmem:[%s11058_s28 + $0x368] sm:$0xff]  }
 0x210   :  { %v8017_v58 = vld [vmem:[%s11058_s28 + $0x3e8] sm:$0xff]  }
 0x212   :  { %7147 = vmatpush3.bf16.msra.mxu0 %v7994_v60  ;;  %7175 = vmatpush3.bf16.msra.mxu1 %v7995_v61  ;;  %v8018_v60 = vld [vmem:[%s11058_s28 + $0x328] sm:$0xff]  }
 0x213   :  { %7188 = vmatprep.subr.bf16.mxu0 %v7996_v62  ;;  %7216 = vmatprep.subr.bf16.mxu1 %v7997_v0  ;;  %v8019_v61 = vld [vmem:[%s11058_s28 + $0x3a8] sm:$0xff]   ;;  %v8020_v62 = vld [vmem:[%s11058_s28 + $0x370] sm:$0xff]  }
 0x214   :  { %v8021_v0 = vld [vmem:[%s11058_s28 + $0x3f0] sm:$0xff]  }
 0x21c   :  { %v1615_v1 = vpop.f32.mrb[16].mxu0  ;;  %v1668_v4 = vpop.f32.mrb[16].mxu1 }
 0x21d   :  { %v1801_v2 = vmax.f32 %v1615_v1, 0.0  ;;  %v1617_v5 = vpop.f32.mrb[17].mxu0  ;;  %v1803_v6 = vmax.f32 %v1668_v4, 0.0  ;;  %v1670_v7 = vpop.f32.mrb[17].mxu1  ;;  %v8022_v1 = vld [vmem:[%s11058_s28 + $0x330] sm:$0xff]   ;;  %v8024_v4 = vld [vmem:[%s11058_s28 + $0x378] sm:$0xff]  }
 0x21e   :  { %v1619_v8 = vpop.f32.mrb[18].mxu0  ;;  %v1804_v9 = vmax.f32 %v1670_v7, 0.0  ;;  %v1672_v11 = vpop.f32.mrb[18].mxu1  ;;  %v1802_v13 = vmax.f32 %v1617_v5, 0.0  ;;  %v8025_v5 = vld [vmem:[%s11058_s28 + $0x3f8] sm:$0xff]  }
 0x21f   :  { %v1817_v10 = vmax.f32 %v1619_v8, 0.0  ;;  %v1621_v12 = vpop.f32.mrb[19].mxu0  ;;  %v1819_v15 = vmax.f32 %v1672_v11, 0.0  ;;  %v1674_v17 = vpop.f32.mrb[19].mxu1  ;;  %v8027_v7 = vld [vmem:[%s11058_s28 + $0x3b8] sm:$0xff]  }
 0x220   :  { %v1818_v16 = vmax.f32 %v1621_v12, 0.0  ;;  %v1820_v19 = vmax.f32 %v1674_v17, 0.0 }
 0x221   :  { %v1865_v18 = vpack.c.bf16 %v1817_v10, %v1801_v2  ;;  %v1867_v20 = vpack.c.bf16 %v1819_v15, %v1803_v6  ;;  %v8023_v2 = vld [vmem:[%s11058_s28 + $0x3b0] sm:$0xff]   ;;  %v8026_v6 = vld [vmem:[%s11058_s28 + $0x338] sm:$0xff]  }
 0x222   :  { %v1866_v21 = vpack.c.bf16 %v1818_v16, %v1802_v13  ;;  %v1868_v23 = vpack.c.bf16 %v1820_v19, %v1804_v9 }
 0x224   :  { %v1625_v3 = vpop.f32.mrb[20].mxu0  ;;  %3148 = vmatprep.mubr.bf16.mxu0 %v1866_v21  ;;  %3197 = vmatprep.mubr.bf16.mxu1 %v1868_v23  ;;  %v1678_v28 = vpop.f32.mrb[20].mxu1 }
 0x225   :  { %v1833_v26 = vmax.f32 %v1625_v3, 0.0  ;;  %v1627_v27 = vpop.f32.mrb[21].mxu0  ;;  %3149 = vmatmul.mubr.bf16.vlgmr.msra.gmra.mrb[48].mxu0 %v1865_v18  ;;  %3198 = vmatmul.mubr.bf16.vlgmr.msra.gmra.mrb[48].mxu1 %v1867_v20  ;;  %v1835_v31 = vmax.f32 %v1678_v28, 0.0  ;;  %v1680_v14 = vpop.f32.mrb[21].mxu1 }
 0x226   :  { %v1834_v29 = vmax.f32 %v1627_v27, 0.0  ;;  %v1629_v30 = vpop.f32.mrb[22].mxu0  ;;  %7189 = vmatpush3.bf16.msra.mxu0 %v7998_v22  ;;  %v1836_v34 = vmax.f32 %v1680_v14, 0.0  ;;  %v1682_v35 = vpop.f32.mrb[22].mxu1  ;;  %7217 = vmatpush3.bf16.msra.mxu1 %v7999_v24 }
 0x227   :  { %v1849_v33 = vmax.f32 %v1629_v30, 0.0  ;;  %v1631_v42 = vpop.f32.mrb[23].mxu0  ;;  %7190 = vmatprep.subr.bf16.mxu0 %v8000_v59  ;;  %v1851_v39 = vmax.f32 %v1682_v35, 0.0  ;;  %v1684_v40 = vpop.f32.mrb[23].mxu1  ;;  %7218 = vmatprep.subr.bf16.mxu1 %v8001_v25 }
 0x228   :  { %v1850_v38 = vmax.f32 %v1631_v42, 0.0  ;;  %v1852_v43 = vmax.f32 %v1684_v40, 0.0 }
 0x229   :  { %v1881_v41 = vpack.c.bf16 %v1849_v33, %v1833_v26  ;;  %v1883_v46 = vpack.c.bf16 %v1851_v39, %v1835_v31 }
 0x22a   :  { %v1882_v45 = vpack.c.bf16 %v1850_v38, %v1834_v29  ;;  %7191 = vmatpush3.bf16.msra.mxu0 %v8002_v32  ;;  %v1884_v48 = vpack.c.bf16 %v1852_v43, %v1836_v34  ;;  %7219 = vmatpush3.bf16.msra.mxu1 %v8003_v36 }
 0x22b   :  { %7192 = vmatprep.subr.bf16.mxu0 %v8004_v37  ;;  %7220 = vmatprep.subr.bf16.mxu1 %v8005_v52 }
 0x22c   :  { %3156 = vmatprep.mubr.bf16.mxu0 %v1882_v45  ;;  %3205 = vmatprep.mubr.bf16.mxu1 %v1884_v48  ;;  %v3312_v48 = vld [vmem:[%s11059_s16] sm:$0xff] }
 0x22d   :  { %3157 = vmatmul.mubr.bf16.gmra.mrb[52].mxu0 %v1881_v41  ;;  %3206 = vmatmul.mubr.bf16.gmra.mrb[52].mxu1 %v1883_v46  ;;  %v3418_v46 = vld [vmem:[#allocation6] sm:$0xff] }
 0x22e   :  { %7193 = vmatpush3.bf16.msra.mxu0 %v8006_v47  ;;  %7221 = vmatpush3.bf16.msra.mxu1 %v8007_v49  ;;  %v3419_v47 = vld [vmem:[#allocation6 + $0x8] sm:$0xff]  ;;  %v8475_v49 = vmov 0.0|0.0  }
 0x22f   :  { %7194 = vmatprep.subr.bf16.mxu0 %v8008_v63  ;;  %7222 = vmatprep.subr.bf16.mxu1 %v8009_v50  ;;  %v7618_v63 = vpack.c.bf16 %v3419_v47, %v3418_v46  ;;  %v3313_v50 = vld [vmem:[%s11059_s16 + $0x8] sm:$0xff] }
 0x232   :  { %7195 = vmatpush3.bf16.msra.mxu0 %v8010_v51  ;;  %7223 = vmatpush3.bf16.msra.mxu1 %v8011_v53  ;;  %v11045_v51 = vmov 0.0   ;;  %v3314_v53 = vld [vmem:[%s11059_s16 + $0x10] sm:$0xff] }
 0x233   :  { %7196 = vmatprep.subr.bf16.mxu0 %v8012_v54  ;;  %7224 = vmatprep.subr.bf16.mxu1 %v8013_v55  ;;  %v3315_v54 = vld [vmem:[%s11059_s16 + $0x18] sm:$0xff]  ;;  %v7601_v55 = vpack.c.bf16 %v3313_v50, %v3312_v48 }
 0x236   :  { %7197 = vmatpush3.bf16.msra.mxu0 %v8014_v56  ;;  %7225 = vmatpush3.bf16.msra.mxu1 %v8015_v57  ;;  %v7605_v56 = vpack.c.bf16 %v3315_v54, %v3314_v53  ;;  %v3417_v57 = vld [vmem:[%s11060_s18] sm:$0xff] }
 0x237   :  { %7198 = vmatprep.subr.bf16.mxu0 %v8016_v44  ;;  %7226 = vmatprep.subr.bf16.mxu1 %v8017_v58 }
 0x23a   :  { %7199 = vmatpush3.bf16.msra.mxu0 %v8018_v60  ;;  %7227 = vmatpush3.bf16.msra.mxu1 %v8019_v61  ;;  %v6848_v60 = vld [vmem:[%s11061_s1] ss:$0 sm:$0xff]  ;;  %s8480_s1 = smov 64  }
 0x23b   :  { %7200 = vmatprep.subr.bf16.mxu0 %v8020_v62  ;;  %7228 = vmatprep.subr.bf16.mxu1 %v8021_v0 }
 0x23e   :  { %7201 = vmatpush3.bf16.msra.mxu0 %v8022_v1  ;;  %7229 = vmatpush3.bf16.msra.mxu1 %v8023_v2 }
 0x23f   :  { %7202 = vmatprep.subr.bf16.mxu0 %v8024_v4  ;;  %7230 = vmatprep.subr.bf16.mxu1 %v8025_v5 }
 0x242   :  { %7203 = vmatpush3.bf16.msra.mxu0 %v8026_v6  ;;  %7231 = vmatpush3.bf16.msra.mxu1 %v8027_v7 }
 0x243   :  { %7617 = vmatprep.subr.bf16.mxu1 %v8475_v49  ;;  %7602 = vmatprep.subr.bf16.mxu0 %v7601_v55 }
 0x24c   :  { %v1721_v8 = vpop.f32.mrb[24].mxu0  ;;  %v1774_v9 = vpop.f32.mrb[24].mxu1 }
 0x24d   :  { %v1723_v10 = vpop.f32.mrb[25].mxu0  ;;  %v1807_v11 = vmax.f32 %v1774_v9, 0.0  ;;  %v1776_v12 = vpop.f32.mrb[25].mxu1  ;;  %v1805_v15 = vmax.f32 %v1721_v8, 0.0 }
 0x24e   :  { %v1725_v13 = vpop.f32.mrb[26].mxu0  ;;  %v1808_v16 = vmax.f32 %v1776_v12, 0.0  ;;  %v1778_v18 = vpop.f32.mrb[26].mxu1  ;;  %v1806_v20 = vmax.f32 %v1723_v10, 0.0 }
 0x24f   :  { %v1821_v17 = vmax.f32 %v1725_v13, 0.0  ;;  %v1727_v19 = vpop.f32.mrb[27].mxu0  ;;  %v1823_v21 = vmax.f32 %v1778_v18, 0.0  ;;  %v1780_v23 = vpop.f32.mrb[27].mxu1 }
 0x250   :  { %v1822_v22 = vmax.f32 %v1727_v19, 0.0  ;;  %v1824_v59 = vmax.f32 %v1780_v23, 0.0 }
 0x251   :  { %v1869_v24 = vpack.c.bf16 %v1821_v17, %v1805_v15  ;;  %v1871_v3 = vpack.c.bf16 %v1823_v21, %v1807_v11 }
 0x252   :  { %v1870_v25 = vpack.c.bf16 %v1822_v22, %v1806_v20  ;;  %v1872_v26 = vpack.c.bf16 %v1824_v59, %v1808_v16 }
 0x254   :  { %v1731_v27 = vpop.f32.mrb[28].mxu0  ;;  %3246 = vmatprep.mubr.bf16.mxu0 %v1870_v25  ;;  %3295 = vmatprep.mubr.bf16.mxu1 %v1872_v26  ;;  %v1784_v30 = vpop.f32.mrb[28].mxu1 }
 0x255   :  { %v1837_v28 = vmax.f32 %v1731_v27, 0.0  ;;  %v1733_v29 = vpop.f32.mrb[29].mxu0  ;;  %3247 = vmatmul.mubr.bf16.vlgmr.msra.gmra.mrb[56].mxu0 %v1869_v24  ;;  %3296 = vmatmul.mubr.bf16.vlgmr.msra.gmra.mrb[56].mxu1 %v1871_v3  ;;  %v1839_v32 = vmax.f32 %v1784_v30, 0.0  ;;  %v1786_v33 = vpop.f32.mrb[29].mxu1 }
 0x256   :  { %v1838_v31 = vmax.f32 %v1733_v29, 0.0  ;;  %v1735_v14 = vpop.f32.mrb[30].mxu0  ;;  %v1840_v35 = vmax.f32 %v1786_v33, 0.0  ;;  %v1788_v36 = vpop.f32.mrb[30].mxu1  ;;  %7619 = vmatpush3.bf16.msra.mxu1 %v7618_v63  ;;  %7604 = vmatpush3.bf16.msra.mxu0 %v7601_v55  ;;  %v3317_v29 = vld [vmem:[%s11059_s16 + $0x28] sm:$0xff] }
 0x257   :  { %v1853_v42 = vmax.f32 %v1735_v14, 0.0  ;;  %v1737_v34 = vpop.f32.mrb[31].mxu0  ;;  %v1855_v38 = vmax.f32 %v1788_v36, 0.0  ;;  %v1790_v39 = vpop.f32.mrb[31].mxu1  ;;  %7620 = vmatprep.subr.bf16.mxu1 %v8475_v49  ;;  %7606 = vmatprep.subr.bf16.mxu0 %v7605_v56  ;;  %v3319_v14 = vld [vmem:[%s11059_s16 + $0x38] sm:$0xff] }
 0x258   :  { %v1854_v37 = vmax.f32 %v1737_v34, 0.0  ;;  %v1856_v52 = vmax.f32 %v1790_v39, 0.0 }
 0x259   :  { %v1885_v40 = vpack.c.bf16 %v1853_v42, %v1837_v28  ;;  %v1887_v43 = vpack.c.bf16 %v1855_v38, %v1839_v32  ;;  %v3316_v28 = vld [vmem:[%s11059_s16 + $0x20] sm:$0xff] }
 0x25a   :  { %v1886_v41 = vpack.c.bf16 %v1854_v37, %v1838_v31  ;;  %v1888_v45 = vpack.c.bf16 %v1856_v52, %v1840_v35  ;;  %7608 = vmatpush3.bf16.msra.mxu0 %v7605_v56  ;;  %v7609_v30 = vpack.c.bf16 %v3317_v29, %v3316_v28  ;;  %v3318_v31 = vld [vmem:[%s11059_s16 + $0x30] sm:$0xff] }
 0x25b   :  { %v7613_v32 = vpack.c.bf16 %v3319_v14, %v3318_v31 }
 0x25c   :  { %3254 = vmatprep.mubr.bf16.mxu0 %v1886_v41  ;;  %3303 = vmatprep.mubr.bf16.mxu1 %v1888_v45 }
 0x25d   :  { %3255 = vmatmul.mubr.bf16.gmra.mrb[60].mxu0 %v1885_v40  ;;  %3304 = vmatmul.mubr.bf16.gmra.mrb[60].mxu1 %v1887_v43 }
 0x25e   :  { %7393 = vmatprep.mubr.msk.f32.mxu1 %vm8476_vm1, %v11045_v51  ;;  %7610 = vmatprep.subr.bf16.mxu0 %v7609_v30 }
 0x25f   :  { %7612 = vmatpush3.bf16.msra.mxu0 %v7609_v30 }
 0x260   :  { %7614 = vmatprep.subr.bf16.mxu0 %v7613_v32 }
 0x263   :  { %7616 = vmatpush3.bf16.msra.mxu0 %v7613_v32 }
 0x264   :  { %7623 = vmatprep.subr.bf16.mxu0 %v8475_v49 }
 0x265   :  { %7394 = vmatmul.mubr.msk.f32.vlgmr.msra.gmra.mrb[64].mxu1 %vm3420_vm2, %v3417_v57 }
 0x266   :  { %7400 = vmatprep.mubr.msk.f32.mxu1 %vm8476_vm1, %v11045_v51 }
 0x298   :  { %v7036_v44 = vpop.f32.mrb[32].mxu0  ;;  %v7064_v58 = vpop.f32.mrb[32].mxu1 }
 0x299   :  { %v7037_v61 = vpop.f32.mrb[33].mxu0  ;;  %v7065_v0 = vpop.f32.mrb[33].mxu1 }
 0x29a   :  { %v7038_v62 = vadd.f32 %v7037_v61, %v7036_v44  ;;  %v7039_v1 = vpop.f32.mrb[34].mxu0  ;;  %v7066_v2 = vadd.f32 %v7065_v0, %v7064_v58  ;;  %v7067_v4 = vpop.f32.mrb[34].mxu1 }
 0x29b   :  { %v7040_v5 = vpop.f32.mrb[35].mxu0  ;;  %v7068_v8 = vpop.f32.mrb[35].mxu1 }
 0x29c   :  { %v2955_v6 = vadd.f32 %v7038_v62, %v6848_v60  ;;  %v7041_v7 = vadd.f32 %v7040_v5, %v7039_v1  ;;  %v7069_v9 = vadd.f32 %v7068_v8, %v7067_v4 }
 0x29e   :  { %v3004_v10 = vadd.f32 %v7066_v2, %v2955_v6  ;;  %v2958_v11 = vadd.f32 %v7041_v7, %v6848_v60 }
 0x2a0   :  { %v3007_v12 = vadd.f32 %v7069_v9, %v2958_v11  ;;  %v7042_v13 = vpop.f32.mrb[36].mxu0  ;;  %v7070_v16 = vpop.f32.mrb[36].mxu1 }
 0x2a1   :  { %v7043_v15 = vpop.f32.mrb[37].mxu0  ;;  %v7071_v19 = vpop.f32.mrb[37].mxu1 }
 0x2a2   :  { %v7044_v17 = vadd.f32 %v7043_v15, %v7042_v13  ;;  %v7045_v18 = vpop.f32.mrb[38].mxu0  ;;  %v7072_v21 = vadd.f32 %v7071_v19, %v7070_v16  ;;  %v7073_v22 = vpop.f32.mrb[38].mxu1 }
 0x2a3   :  { %v7046_v20 = vpop.f32.mrb[39].mxu0  ;;  %v7074_v59 = vpop.f32.mrb[39].mxu1 }
 0x2a4   :  { %v2963_v23 = vadd.f32 %v7044_v17, %v6848_v60  ;;  %v7047_v24 = vadd.f32 %v7046_v20, %v7045_v18  ;;  %v7075_v3 = vadd.f32 %v7074_v59, %v7073_v22 }
 0x2a6   :  { %v2966_v25 = vadd.f32 %v7047_v24, %v6848_v60  ;;  %v3012_v26 = vadd.f32 %v7072_v21, %v2963_v23 }
 0x2a8   :  { %v3015_v27 = vadd.f32 %v7075_v3, %v2966_v25 }
 0x2c8   :  { %v7092_v33 = vpop.f32.mrb[40].mxu0  ;;  %v7120_v42 = vpop.f32.mrb[40].mxu1 }
 0x2c9   :  { %v7093_v34 = vpop.f32.mrb[41].mxu0  ;;  %v7121_v36 = vpop.f32.mrb[41].mxu1 }
 0x2ca   :  { %v7094_v35 = vadd.f32 %v7093_v34, %v7092_v33  ;;  %v7095_v37 = vpop.f32.mrb[42].mxu0  ;;  %v7122_v38 = vadd.f32 %v7121_v36, %v7120_v42  ;;  %v7123_v39 = vpop.f32.mrb[42].mxu1 }
 0x2cb   :  { %v7096_v40 = vpop.f32.mrb[43].mxu0  ;;  %v7124_v43 = vpop.f32.mrb[43].mxu1 }
 0x2cc   :  { %v3053_v52 = vadd.f32 %v7094_v35, %v3004_v10  ;;  %v7097_v41 = vadd.f32 %v7096_v40, %v7095_v37  ;;  %v7125_v45 = vadd.f32 %v7124_v43, %v7123_v39 }
 0x2ce   :  { %v3102_v46 = vadd.f32 %v7122_v38, %v3053_v52  ;;  %v3056_v47 = vadd.f32 %v7097_v41, %v3007_v12 }
 0x2d0   :  { %v3105_v48 = vadd.f32 %v7125_v45, %v3056_v47  ;;  %v7098_v63 = vpop.f32.mrb[44].mxu0  ;;  %v7126_v53 = vpop.f32.mrb[44].mxu1 }
 0x2d1   :  { %v7099_v50 = vpop.f32.mrb[45].mxu0  ;;  %v7127_v55 = vpop.f32.mrb[45].mxu1 }
 0x2d2   :  { %v7100_v49 = vadd.f32 %v7099_v50, %v7098_v63  ;;  %v7101_v54 = vpop.f32.mrb[46].mxu0  ;;  %v7128_v57 = vadd.f32 %v7127_v55, %v7126_v53  ;;  %v7129_v44 = vpop.f32.mrb[46].mxu1 }
 0x2d3   :  { %v7102_v56 = vpop.f32.mrb[47].mxu0  ;;  %v7130_v61 = vpop.f32.mrb[47].mxu1 }
 0x2d4   :  { %v3061_v58 = vadd.f32 %v7100_v49, %v3012_v26  ;;  %v7103_v60 = vadd.f32 %v7102_v56, %v7101_v54  ;;  %v7131_v62 = vadd.f32 %v7130_v61, %v7129_v44 }
 0x2d6   :  { %v3064_v0 = vadd.f32 %v7103_v60, %v3015_v27  ;;  %v3110_v1 = vadd.f32 %v7128_v57, %v3061_v58 }
 0x2d8   :  { %v3113_v2 = vadd.f32 %v7131_v62, %v3064_v0 }
 0x2f8   :  { %v7148_v4 = vpop.f32.mrb[48].mxu0  ;;  %v7176_v5 = vpop.f32.mrb[48].mxu1 }
 0x2f9   :  { %v7149_v6 = vpop.f32.mrb[49].mxu0  ;;  %v7177_v8 = vpop.f32.mrb[49].mxu1 }
 0x2fa   :  { %v7150_v7 = vadd.f32 %v7149_v6, %v7148_v4  ;;  %v7151_v9 = vpop.f32.mrb[50].mxu0  ;;  %v7178_v10 = vadd.f32 %v7177_v8, %v7176_v5  ;;  %v7179_v11 = vpop.f32.mrb[50].mxu1 }
 0x2fb   :  { %v7152_v12 = vpop.f32.mrb[51].mxu0  ;;  %v7180_v16 = vpop.f32.mrb[51].mxu1 }
 0x2fc   :  { %v3151_v13 = vadd.f32 %v7150_v7, %v3102_v46  ;;  %v7153_v15 = vadd.f32 %v7152_v12, %v7151_v9  ;;  %v7181_v17 = vadd.f32 %v7180_v16, %v7179_v11  ;;  %v8478_v9 = vmov 0  }
 0x2fd   :  { %7892 = vset.pattern.permute.xlu0 %v8478_v9  ;;  %7893 = vset.pattern.permute.xlu1 %v8478_v9  ;;  %v3499_v12 = vlaneseq }
 0x2fe   :  { %v3200_v18 = vadd.f32 %v7178_v10, %v3151_v13  ;;  %v3154_v19 = vadd.f32 %v7153_v15, %v3105_v48  ;;  %v8479_v10 = vmov 1966171168  }
 0x2ff   :  { %v3497_v11 = vunpack.c.l.s4 %v8479_v10  ;;  %v9800_v15 = vshrl.u32 %v3499_v12, 7 }
 0x300   :  { %v3203_v20 = vadd.f32 %v7181_v17, %v3154_v19  ;;  %v7154_v21 = vpop.f32.mrb[52].mxu0  ;;  %v7182_v23 = vpop.f32.mrb[52].mxu1 }
 0x301   :  { %v7155_v22 = vpop.f32.mrb[53].mxu0  ;;  %v7183_v3 = vpop.f32.mrb[53].mxu1  ;;  %v3498_v13 = vunpack.c.0.s8 %v3497_v11 }
 0x302   :  { %v7156_v24 = vadd.f32 %v7155_v22, %v7154_v21  ;;  %v7157_v59 = vpop.f32.mrb[54].mxu0  ;;  %v7184_v26 = vadd.f32 %v7183_v3, %v7182_v23  ;;  %v7185_v27 = vpop.f32.mrb[54].mxu1 }
 0x303   :  { %v7158_v25 = vpop.f32.mrb[55].mxu0  ;;  %v7186_v30 = vpop.f32.mrb[55].mxu1  ;;  %v3501_v16 = vsub.s32 %v3498_v13, %v9800_v15 }
 0x304   :  { %v3159_v28 = vadd.f32 %v7156_v24, %v3110_v1  ;;  %v7159_v29 = vadd.f32 %v7158_v25, %v7157_v59  ;;  %v7187_v31 = vadd.f32 %v7186_v30, %v7185_v27 }
 0x306   :  { %v3162_v14 = vadd.f32 %v7159_v29, %v3113_v2  ;;  %v3208_v32 = vadd.f32 %v7184_v26, %v3159_v28  ;;  %v9804_v26 = vsub.s32 0, %v9800_v15 }
 0x308   :  { %v3211_v33 = vadd.f32 %v7187_v31, %v3162_v14 }
 0x328   :  { %v7204_v42 = vpop.f32.mrb[56].mxu0  ;;  %v7232_v34 = vpop.f32.mrb[56].mxu1 }
 0x329   :  { %v7205_v35 = vpop.f32.mrb[57].mxu0  ;;  %v7233_v37 = vpop.f32.mrb[57].mxu1 }
 0x32a   :  { %v7206_v36 = vadd.f32 %v7205_v35, %v7204_v42  ;;  %v7207_v38 = vpop.f32.mrb[58].mxu0  ;;  %v7234_v39 = vadd.f32 %v7233_v37, %v7232_v34  ;;  %v7235_v40 = vpop.f32.mrb[58].mxu1 }
 0x32b   :  { %v7208_v52 = vpop.f32.mrb[59].mxu0  ;;  %v7236_v45 = vpop.f32.mrb[59].mxu1 }
 0x32c   :  { %v3249_v41 = vadd.f32 %v7206_v36, %v3200_v18  ;;  %v7209_v43 = vadd.f32 %v7208_v52, %v7207_v38  ;;  %v7237_v46 = vadd.f32 %v7236_v45, %v7235_v40 }
 0x32e   :  { %v3298_v47 = vadd.f32 %v7234_v39, %v3249_v41  ;;  %v3252_v48 = vadd.f32 %v7209_v43, %v3203_v20 }
 0x330   :  { %v3301_v63 = vadd.f32 %v7237_v46, %v3252_v48  ;;  %v7210_v50 = vpop.f32.mrb[60].mxu0  ;;  %7383 = vmatprep.mubr.msk.f32.mxu0 %vm1362_vm0, %v3298_v47  ;;  %v7238_v49 = vpop.f32.mrb[60].mxu1 }
 0x331   :  { %v7211_v53 = vpop.f32.mrb[61].mxu0  ;;  %v7239_v57 = vpop.f32.mrb[61].mxu1 }
 0x332   :  { %v7621_v54 = vpack.c.bf16 %v3301_v63, %v3298_v47  ;;  %v7212_v55 = vadd.f32 %v7211_v53, %v7210_v50  ;;  %v7213_v56 = vpop.f32.mrb[62].mxu0  ;;  %7384 = vmatmul.mubr.msk.f32.vlgmr.msra.gmra.mrb[64].mxu0 %vm1362_vm0, %v3301_v63  ;;  %v7240_v58 = vadd.f32 %v7239_v57, %v7238_v49  ;;  %v7241_v60 = vpop.f32.mrb[62].mxu1 }
 0x333   :  { %v7214_v44 = vpop.f32.mrb[63].mxu0  ;;  %v7242_v0 = vpop.f32.mrb[63].mxu1 }
 0x334   :  { %v3257_v61 = vadd.f32 %v7212_v55, %v3208_v32  ;;  %v7215_v62 = vadd.f32 %v7214_v44, %v7213_v56  ;;  %7622 = vmatpush3.bf16.msra.mxu1 %v7621_v54  ;;  %v7243_v1 = vadd.f32 %v7242_v0, %v7241_v60  ;;  %v9831_v0 = vld [vmem:[%s11026_s7] ss:$0 sm:$0xff] }
 0x336   :  { %v3260_v2 = vadd.f32 %v7215_v62, %v3211_v33  ;;  %v3306_v4 = vadd.f32 %v7240_v58, %v3257_v61 }
 0x338   :  { %v3309_v5 = vadd.f32 %v7243_v1, %v3260_v2  ;;  %7386 = vmatprep.mubr.msk.f32.mxu0 %vm1362_vm0, %v3306_v4  ;;  %v3490_v7 = vpop.f32.mrb[64].mxu1 }
 0x339   :  { %v7395_v8 = vpop.f32.mrb[65].mxu1  ;;  %v3495_v17 = vcombine.high %v3490_v7, %v3490_v7  ;;  %v3502_v18 = vrot.slane %v3490_v7, %v3501_v16 }
 0x33a   :  { %v7624_v6 = vpack.c.bf16 %v3309_v5, %v3306_v4  ;;  %7387 = vmatmul.mubr.msk.f32.gmra.mrb[66].mxu0 %vm1362_vm0, %v3309_v5 }
 0x33b   :  { %7407 = vmatprep.mubr.msk.f32.mxu0 %vm8476_vm1, %v11045_v51  ;;  %v3509_v19 = vrot.slane %v3495_v17, %v3501_v16  ;;  %v3510_v20 = vcombine.high %v3502_v18, %v3502_v18  ;;  %v3518_v22 = vrot.slane %v3502_v18, %v3501_v16 }
 0x33c   :  { %7625 = vmatpush3.bf16.msra.mxu0 %v7624_v6 }
 0x33d   :  { %v3511_v21 = vcombine.high %v3509_v19, %v3509_v19  ;;  %v3532_v23 = vrot.slane %v3510_v20, %v3501_v16  ;;  %v3525_v24 = vrot.slane %v3509_v19, %v3501_v16  ;;  %v3540_v3 = vcombine.high %v3518_v22, %v3518_v22 }
 0x33e   :  { %v3547_v29 = vrot.slane %v3518_v22, %v9804_v26 }
 0x33f   :  { %v3539_v59 = vrot.slane %v3511_v21, %v3501_v16  ;;  %v3542_v25 = vcombine.high %v3532_v23, %v3532_v23  ;;  %v3541_v27 = vcombine.high %v3525_v24, %v3525_v24  ;;  %v3551_v30 = vrot.slane %v3532_v23, %v9804_v26 }
 0x340   :  { %v3555_v31 = vrot.slane %v3540_v3, %v9804_v26  ;;  %v3563_v32 = vrot.slane %v3525_v24, %v9804_v26 }
 0x341   :  { %v3543_v28 = vcombine.high %v3539_v59, %v3539_v59  ;;  %v3559_v14 = vrot.slane %v3542_v25, %v9804_v26  ;;  %v3567_v33 = vrot.slane %v3539_v59, %v9804_v26  ;;  %v3571_v42 = vrot.slane %v3541_v27, %v9804_v26 }
 0x343   :  { %v3575_v34 = vrot.slane %v3543_v28, %v9804_v26 }
 0x405   :  { %v7385_v35 = vpop.f32.mrb[64].mxu0 }
 0x406   :  { %v3398_v36 = vpop.f32.mrb[65].mxu0  ;;  %v3587_v37 = vmul.f32 %v7385_v35, %v3551_v30  ;;  %v3585_v38 = vmul.f32 %v7385_v35, %v3547_v29  ;;  %v3589_v39 = vmul.f32 %v7385_v35, %v3555_v31  ;;  %v3591_v40 = vmul.f32 %v7385_v35, %v3559_v14 }
 0x407   :  { %v3584_v52 = vmul.f32 %v3547_v29, %v3398_v36  ;;  %v3588_v41 = vmul.f32 %v3555_v31, %v3398_v36  ;;  %v3593_v43 = vmul.f32 %v7385_v35, %v3563_v32  ;;  %v3590_v45 = vmul.f32 %v3559_v14, %v3398_v36 }
 0x408   :  { %8028 = vtanh.f32 %v3587_v37  ;;  %v3595_v46 = vmul.f32 %v7385_v35, %v3567_v33  ;;  %v3592_v47 = vmul.f32 %v3563_v32, %v3398_v36  ;;  %v3597_v48 = vmul.f32 %v7385_v35, %v3571_v42 }
 0x409   :  { %8030 = vtanh.f32 %v3585_v38  ;;  %v3594_v63 = vmul.f32 %v3567_v33, %v3398_v36  ;;  %v3599_v50 = vmul.f32 %v7385_v35, %v3575_v34  ;;  %v3596_v53 = vmul.f32 %v3571_v42, %v3398_v36 }
 0x40a   :  { %8032 = vtanh.f32 %v3589_v39  ;;  %v3586_v49 = vmul.f32 %v3551_v30, %v3398_v36  ;;  %v9814_v54 = vmul.f32 %v3575_v34, %v3398_v36 }
 0x40b   :  { %8034 = vtanh.f32 %v3584_v52 }
 0x40c   :  { %8036 = vtanh.f32 %v3591_v40 }
 0x40d   :  { %v7388_v55 = vpop.f32.mrb[66].mxu0  ;;  %8038 = vtanh.f32 %v3588_v41 }
 0x40e   :  { %v3408_v56 = vpop.f32.mrb[67].mxu0  ;;  %v9816_v57 = vmul.f32 %v7388_v55, %v3547_v29  ;;  %v9818_v44 = vmul.f32 %v7388_v55, %v3551_v30  ;;  %v9820_v58 = vmul.f32 %v7388_v55, %v3555_v31  ;;  %8040 = vtanh.f32 %v3593_v43 }
 0x40f   :  { %v9822_v60 = vmul.f32 %v3547_v29, %v3408_v56  ;;  %v9824_v61 = vmul.f32 %v3551_v30, %v3408_v56  ;;  %v9826_v62 = vmul.f32 %v3555_v31, %v3408_v56  ;;  %v9833_v1 = vmul.f32 %v7388_v55, %v3559_v14 }
 0x410   :  { %v9835_v2 = vmul.f32 %v3559_v14, %v3408_v56  ;;  %v9837_v4 = vmul.f32 %v7388_v55, %v3563_v32  ;;  %8042 = vtanh.f32 %v3590_v45  ;;  %v9839_v5 = vmul.f32 %v3563_v32, %v3408_v56 }
 0x411   :  { %v9841_v6 = vmul.f32 %v7388_v55, %v3567_v33  ;;  %v9843_v7 = vmul.f32 %v3567_v33, %v3408_v56  ;;  %v9845_v9 = vmul.f32 %v7388_v55, %v3571_v42  ;;  %v9847_v10 = vmul.f32 %v3571_v42, %v3408_v56 }
 0x412   :  { %v8029_v8 = vpop.eup %8028  ;;  %v9849_v11 = vmul.f32 %v7388_v55, %v3575_v34  ;;  %v9852_v17 = vmul.f32 %v3575_v34, %v3408_v56  ;;  %8044 = vtanh.f32 %v3595_v46 }
 0x413   :  { %v8031_v13 = vpop.eup %8030  ;;  %v3658_v16 = vmul.f32 %v8029_v8, %v9831_v0  ;;  %8046 = vtanh.f32 %v3592_v47 }
 0x414   :  { %v8033_v18 = vpop.eup %8032  ;;  %v3656_v19 = vmul.f32 %v8031_v13, %v9831_v0  ;;  %8048 = vtanh.f32 %v3597_v48 }
 0x415   :  { %v8035_v20 = vpop.eup %8034  ;;  %v3697_v21 = vsel %vm3687_vm3, %v3658_v16, 0.0  ;;  %v3660_v22 = vmul.f32 %v8033_v18, %v9831_v0  ;;  %8050 = vtanh.f32 %v3594_v63 }
 0x416   :  { %v8037_v23 = vpop.eup %8036  ;;  %3698 = vadd.xlane.f32.xlu1 %v3697_v21  ;;  %v3691_v24 = vsel %vm3687_vm3, %v3656_v19, 0.0  ;;  %v3655_v59 = vmul.f32 %v8035_v20, %v9831_v0  ;;  %8052 = vtanh.f32 %v3599_v50 }
 0x417   :  { %v8039_v3 = vpop.eup %8038  ;;  %3692 = vadd.xlane.f32.xlu0 %v3691_v24  ;;  %v3703_v25 = vsel %vm3687_vm3, %v3660_v22, 0.0  ;;  %v3662_v27 = vmul.f32 %v8037_v23, %v9831_v0  ;;  %8054 = vtanh.f32 %v3596_v53 }
 0x418   :  { %v8041_v28 = vpop.eup %8040  ;;  %v3688_v29 = vsel %vm3687_vm3, %v3655_v59, 0.0  ;;  %v3659_v30 = vmul.f32 %v8039_v3, %v9831_v0  ;;  %8056 = vtanh.f32 %v3586_v49 }
 0x419   :  { %v3709_v14 = vsel %vm3687_vm3, %v3662_v27, 0.0  ;;  %v3664_v32 = vmul.f32 %v8041_v28, %v9831_v0  ;;  %8058 = vtanh.f32 %v9814_v54 }
 0x41a   :  { %3704 = vadd.xlane.f32.xlu1 %v3703_v25  ;;  %v8043_v31 = vpop.eup %8042  ;;  %v3700_v42 = vsel %vm3687_vm3, %v3659_v30, 0.0  ;;  %8060 = vtanh.f32 %v9816_v57 }
 0x41b   :  { %3689 = vadd.xlane.f32.xlu0 %v3688_v29  ;;  %v3661_v34 = vmul.f32 %v8043_v31, %v9831_v0  ;;  %v3715_v36 = vsel %vm3687_vm3, %v3664_v32, 0.0  ;;  %8062 = vtanh.f32 %v9822_v60 }
 0x41c   :  { %v8045_v33 = vpop.eup %8044  ;;  %8064 = vtanh.f32 %v9818_v44 }
 0x41d   :  { %v8047_v35 = vpop.eup %8046  ;;  %v3666_v37 = vmul.f32 %v8045_v33, %v9831_v0  ;;  %v3706_v39 = vsel %vm3687_vm3, %v3661_v34, 0.0  ;;  %8066 = vtanh.f32 %v9824_v61 }
 0x41e   :  { %3710 = vadd.xlane.f32.xlu1 %v3709_v14  ;;  %v8049_v38 = vpop.eup %8048  ;;  %v3663_v40 = vmul.f32 %v8047_v35, %v9831_v0  ;;  %8068 = vtanh.f32 %v9820_v58 }
 0x41f   :  { %3701 = vadd.xlane.f32.xlu0 %v3700_v42  ;;  %v8051_v52 = vpop.eup %8050  ;;  %v3721_v41 = vsel %vm3687_vm3, %v3666_v37, 0.0  ;;  %v3668_v43 = vmul.f32 %v8049_v38, %v9831_v0  ;;  %8070 = vtanh.f32 %v9826_v62 }
 0x420   :  { %v8053_v45 = vpop.eup %8052  ;;  %v3712_v46 = vsel %vm3687_vm3, %v3663_v40, 0.0  ;;  %v3665_v47 = vmul.f32 %v8051_v52, %v9831_v0  ;;  %8072 = vtanh.f32 %v9833_v1 }
 0x421   :  { %v8055_v48 = vpop.eup %8054  ;;  %v3727_v63 = vsel %vm3687_vm3, %v3668_v43, 0.0  ;;  %v3670_v50 = vmul.f32 %v8053_v45, %v9831_v0  ;;  %8074 = vtanh.f32 %v9835_v2 }
 0x422   :  { %3716 = vadd.xlane.f32.xlu1 %v3715_v36  ;;  %v8057_v53 = vpop.eup %8056  ;;  %v3718_v49 = vsel %vm3687_vm3, %v3665_v47, 0.0  ;;  %v3667_v54 = vmul.f32 %v8055_v48, %v9831_v0  ;;  %8076 = vtanh.f32 %v9837_v4 }
 0x423   :  { %3707 = vadd.xlane.f32.xlu0 %v3706_v39  ;;  %v8059_v55 = vpop.eup %8058  ;;  %v3733_v56 = vsel %vm3687_vm3, %v3670_v50, 0.0  ;;  %v3657_v57 = vmul.f32 %v8057_v53, %v9831_v0  ;;  %8078 = vtanh.f32 %v9839_v5  ;;  %v6983_v50 = vld [vmem:[#allocation2] ss:$0 sm:$0xff] }
 0x424   :  { %v8061_v44 = vpop.eup %8060  ;;  %v3724_v60 = vsel %vm3687_vm3, %v3667_v54, 0.0  ;;  %v3669_v61 = vmul.f32 %v8059_v55, %v9831_v0  ;;  %8080 = vtanh.f32 %v9841_v6 }
 0x425   :  { %v8063_v8 = vpop.eup %8062  ;;  %v3694_v13 = vsel %vm3687_vm3, %v3657_v57, 0.0  ;;  %v3672_v58 = vmul.f32 %v8061_v44, %v9831_v0  ;;  %8082 = vtanh.f32 %v9843_v7 }
 0x426   :  { %3722 = vadd.xlane.f32.xlu1 %v3721_v41  ;;  %v8065_v16 = vpop.eup %8064  ;;  %v3730_v62 = vsel %vm3687_vm3, %v3669_v61, 0.0  ;;  %v3671_v18 = vmul.f32 %v8063_v8, %v9831_v0  ;;  %8084 = vtanh.f32 %v9845_v9 }
 0x427   :  { %3713 = vadd.xlane.f32.xlu0 %v3712_v46  ;;  %v8067_v19 = vpop.eup %8066  ;;  %v3739_v20 = vsel %vm3687_vm3, %v3672_v58, 0.0  ;;  %v3674_v1 = vmul.f32 %v8065_v16, %v9831_v0  ;;  %8086 = vtanh.f32 %v9847_v10 }
 0x428   :  { %v8069_v21 = vpop.eup %8068  ;;  %v3736_v2 = vsel %vm3687_vm3, %v3671_v18, 0.0  ;;  %v3673_v22 = vmul.f32 %v8067_v19, %v9831_v0  ;;  %8088 = vtanh.f32 %v9849_v11 }
 0x429   :  { %v8071_v23 = vpop.eup %8070  ;;  %v3745_v24 = vsel %vm3687_vm3, %v3674_v1, 0.0  ;;  %v3676_v4 = vmul.f32 %v8069_v21, %v9831_v0  ;;  %8090 = vtanh.f32 %v9852_v17 }
 0x42a   :  { %3728 = vadd.xlane.f32.xlu1 %v3727_v63  ;;  %v8073_v59 = vpop.eup %8072  ;;  %v3742_v5 = vsel %vm3687_vm3, %v3673_v22, 0.0  ;;  %v3675_v3 = vmul.f32 %v8071_v23, %v9831_v0 }
 0x42b   :  { %3719 = vadd.xlane.f32.xlu0 %v3718_v49  ;;  %v8075_v25 = vpop.eup %8074  ;;  %v3751_v27 = vsel %vm3687_vm3, %v3676_v4, 0.0  ;;  %v3678_v6 = vmul.f32 %v8073_v59, %v9831_v0 }
 0x42c   :  { %v8077_v28 = vpop.eup %8076  ;;  %v3748_v7 = vsel %vm3687_vm3, %v3675_v3, 0.0  ;;  %v3677_v29 = vmul.f32 %v8075_v25, %v9831_v0 }
 0x42d   :  { %v8079_v30 = vpop.eup %8078  ;;  %v3757_v31 = vsel %vm3687_vm3, %v3678_v6, 0.0  ;;  %v3680_v9 = vmul.f32 %v8077_v28, %v9831_v0 }
 0x42e   :  { %3734 = vadd.xlane.f32.xlu1 %v3733_v56  ;;  %v8081_v14 = vpop.eup %8080  ;;  %v3754_v10 = vsel %vm3687_vm3, %v3677_v29, 0.0  ;;  %v3679_v32 = vmul.f32 %v8079_v30, %v9831_v0 }
 0x42f   :  { %3725 = vadd.xlane.f32.xlu0 %v3724_v60  ;;  %v8083_v33 = vpop.eup %8082  ;;  %v3763_v42 = vsel %vm3687_vm3, %v3680_v9, 0.0  ;;  %v3682_v34 = vmul.f32 %v8081_v14, %v9831_v0 }
 0x430   :  { %v8085_v35 = vpop.eup %8084  ;;  %v3760_v11 = vsel %vm3687_vm3, %v3679_v32, 0.0  ;;  %v3681_v36 = vmul.f32 %v8083_v33, %v9831_v0 }
 0x431   :  { %v8087_v37 = vpop.eup %8086  ;;  %v3769_v17 = vsel %vm3687_vm3, %v3682_v34, 0.0  ;;  %v3684_v38 = vmul.f32 %v8085_v35, %v9831_v0 }
 0x432   :  { %3695 = vadd.xlane.f32.xlu1 %v3694_v13  ;;  %v8089_v39 = vpop.eup %8088  ;;  %v3766_v40 = vsel %vm3687_vm3, %v3681_v36, 0.0  ;;  %v3683_v52 = vmul.f32 %v8087_v37, %v9831_v0 }
 0x433   :  { %3731 = vadd.xlane.f32.xlu0 %v3730_v62  ;;  %v8091_v41 = vpop.eup %8090  ;;  %v3775_v43 = vsel %vm3687_vm3, %v3684_v38, 0.0  ;;  %v3686_v45 = vmul.f32 %v8089_v39, %v9831_v0 }
 0x434   :  { %v3772_v46 = vsel %vm3687_vm3, %v3683_v52, 0.0  ;;  %v3685_v47 = vmul.f32 %v8091_v41, %v9831_v0 }
 0x435   :  { %v3781_v48 = vsel %vm3687_vm3, %v3686_v45, 0.0 }
 0x436   :  { %3740 = vadd.xlane.f32.xlu1 %v3739_v20  ;;  %v3778_v63 = vsel %vm3687_vm3, %v3685_v47, 0.0 }
 0x437   :  { %3737 = vadd.xlane.f32.xlu0 %v3736_v2 }
 0x43a   :  { %3746 = vadd.xlane.f32.xlu1 %v3745_v24 }
 0x43b   :  { %3743 = vadd.xlane.f32.xlu0 %v3742_v5  ;;  %v3859_v5 = vand.u32 127, %v3499_v12 }
 0x43d   :  { %v3864_v25 = vadd.s32 4294967288, %v3859_v5  ;;  %v9960_v6 = vsub.s32 %v3859_v5, %v9800_v15 }
 0x43e   :  { %3752 = vadd.xlane.f32.xlu1 %v3751_v27 }
 0x43f   :  { %3749 = vadd.xlane.f32.xlu0 %v3748_v7  ;;  %v9965_v7 = vsub.s32 %v3864_v25, %v9800_v15 }
 0x442   :  { %3758 = vadd.xlane.f32.xlu1 %v3757_v31 }
 0x443   :  { %3755 = vadd.xlane.f32.xlu0 %v3754_v10 }
 0x446   :  { %3764 = vadd.xlane.f32.xlu1 %v3763_v42 }
 0x447   :  { %3761 = vadd.xlane.f32.xlu0 %v3760_v11 }
 0x44a   :  { %3770 = vadd.xlane.f32.xlu1 %v3769_v17 }
 0x44b   :  { %3767 = vadd.xlane.f32.xlu0 %v3766_v40 }
 0x44e   :  { %3776 = vadd.xlane.f32.xlu1 %v3775_v43 }
 0x44f   :  { %3773 = vadd.xlane.f32.xlu0 %v3772_v46 }
 0x452   :  { %3782 = vadd.xlane.f32.xlu1 %v3781_v48 }
 0x453   :  { %3779 = vadd.xlane.f32.xlu0 %v3778_v63 }
 0x469   :  { %3791 = vperm.xlu0 %7892, %v6983_v50  }
 0x4a3   :  { %v3699_v53 = vpop.xlane.xlu1 %3698 }
 0x4a4   :  { %v3693_v49 = vpop.xlane.xlu0 %3692 }
 0x4a7   :  { %v3705_v54 = vpop.xlane.xlu1 %3704 }
 0x4a8   :  { %v3690_v55 = vpop.xlane.xlu0 %3689 }
 0x4ab   :  { %v3711_v56 = vpop.xlane.xlu1 %3710 }
 0x4ac   :  { %v3702_v57 = vpop.xlane.xlu0 %3701 }
 0x4af   :  { %v3717_v60 = vpop.xlane.xlu1 %3716 }
 0x4b0   :  { %v3708_v44 = vpop.xlane.xlu0 %3707 }
 0x4b3   :  { %v3723_v8 = vpop.xlane.xlu1 %3722 }
 0x4b4   :  { %v3714_v61 = vpop.xlane.xlu0 %3713 }
 0x4b7   :  { %v3729_v58 = vpop.xlane.xlu1 %3728 }
 0x4b8   :  { %v3720_v0 = vpop.xlane.xlu0 %3719 }
 0x4bb   :  { %v3735_v62 = vpop.xlane.xlu1 %3734 }
 0x4bc   :  { %v3726_v13 = vpop.xlane.xlu0 %3725 }
 0x4bf   :  { %v3696_v20 = vpop.xlane.xlu1 %3695 }
 0x4c0   :  { %v3732_v16 = vpop.xlane.xlu0 %3731 }
 0x4c3   :  { %v9940_v21 = vpop.xlane.xlu1 %3740 }
 0x4c4   :  { %v9934_v18 = vpop.xlane.xlu0 %3737 }
 0x4c7   :  { %v9946_v23 = vpop.xlane.xlu1 %3746 }
 0x4c8   :  { %v9936_v19 = vpop.xlane.xlu0 %3743 }
 0x4cb   :  { %v9950_v4 = vpop.xlane.xlu1 %3752 }
 0x4cc   :  { %v9938_v1 = vpop.xlane.xlu0 %3749 }
 0x4cf   :  { %v9955_v3 = vpop.xlane.xlu1 %3758 }
 0x4d0   :  { %v9942_v2 = vpop.xlane.xlu0 %3755 }
 0x4d3   :  { %v9962_v28 = vpop.xlane.xlu1 %3764 }
 0x4d4   :  { %v9944_v22 = vpop.xlane.xlu0 %3761 }
 0x4d7   :  { %v3771_v39 = vpop.xlane.xlu1 %3770 }
 0x4d8   :  { %v9948_v24 = vpop.xlane.xlu0 %3767 }
 0x4dc   :  { %v9952_v59 = vpop.xlane.xlu0 %3773 }
 0x4e0   :  { %v9957_v27 = vpop.xlane.xlu0 %3779 }
 0x4e8   :  { %v9967_v29 = vpop.permute.xlu0 %3791 }
 0x4e9   :  { %v9970_v12 = vadd.f32 %v9967_v29, %v3690_v55  ;;  %v9973_v30 = vadd.f32 %v9967_v29, %v3693_v49  ;;  %v9976_v31 = vadd.f32 %v9967_v29, %v3696_v20  ;;  %v9979_v9 = vadd.f32 %v9967_v29, %v3699_v53 }
 0x4ea   :  { %v9982_v14 = vadd.f32 %v9967_v29, %v3702_v57  ;;  %v9985_v10 = vadd.f32 %v9967_v29, %v3705_v54  ;;  %v9988_v32 = vadd.f32 %v9967_v29, %v3708_v44  ;;  %v9991_v33 = vadd.f32 %v9967_v29, %v3711_v56 }
 0x4eb   :  { %v9994_v42 = vadd.f32 %v9967_v29, %v3714_v61  ;;  %v9997_v34 = vadd.f32 %v9967_v29, %v3717_v60  ;;  %v10000_v35 = vadd.f32 %v9967_v29, %v3720_v0  ;;  %v10003_v11 = vadd.f32 %v9967_v29, %v3723_v8 }
 0x4ec   :  { %v10006_v36 = vadd.f32 %v9967_v29, %v3726_v13  ;;  %v10009_v37 = vadd.f32 %v9967_v29, %v3729_v58  ;;  %v10012_v17 = vadd.f32 %v9967_v29, %v3732_v16  ;;  %v10015_v38 = vadd.f32 %v9967_v29, %v3735_v62  ;;  %v3777_v58 = vpop.xlane.xlu1 %3776 }
 0x4ed   :  { %v3863_v40 = vrot.slane %v9970_v12, %v9960_v6  ;;  %v3868_v52 = vrot.slane %v9973_v30, %v9965_v7  ;;  %v3874_v41 = vrot.slane %v9976_v31, %v9960_v6  ;;  %v3878_v43 = vrot.slane %v9979_v9, %v9965_v7 }
 0x4ee   :  { %v3883_v45 = vrot.slane %v9982_v14, %v9960_v6  ;;  %v3887_v46 = vrot.slane %v9985_v10, %v9965_v7  ;;  %v3892_v47 = vrot.slane %v9988_v32, %v9960_v6  ;;  %v3896_v48 = vrot.slane %v9991_v33, %v9965_v7 }
 0x4ef   :  { %v3870_v63 = vsel %vm3869_vm4, %v3868_v52, %v3863_v40  ;;  %v3879_v50 = vsel %vm3869_vm4, %v3878_v43, %v3874_v41  ;;  %v3901_v53 = vrot.slane %v9994_v42, %v9960_v6  ;;  %v3905_v49 = vrot.slane %v9997_v34, %v9965_v7 }
 0x4f0   :  { %v3888_v54 = vsel %vm3869_vm4, %v3887_v46, %v3883_v45  ;;  %v3910_v55 = vrot.slane %v10000_v35, %v9960_v6  ;;  %v3914_v56 = vrot.slane %v10003_v11, %v9965_v7  ;;  %v3919_v57 = vrot.slane %v10006_v36, %v9960_v6 }
 0x4f1   :  { %v3923_v44 = vrot.slane %v10009_v37, %v9965_v7  ;;  %v3928_v60 = vrot.slane %v10012_v17, %v9960_v6  ;;  %v3897_v61 = vsel %vm3869_vm4, %v3896_v48, %v3892_v47  ;;  %v3906_v8 = vsel %vm3869_vm4, %v3905_v49, %v3901_v53 }
 0x4f2   :  { %v3932_v0 = vrot.slane %v10015_v38, %v9965_v7  ;;  %v4007_v13 = vsel %vm4006_vm5, %v3879_v50, %v3870_v63  ;;  %v3915_v16 = vsel %vm3869_vm4, %v3914_v56, %v3910_v55  ;;  %v10060_v5 = vadd.f32 %v9967_v29, %v9934_v18  ;;  %v3783_v50 = vpop.xlane.xlu1 %3782 }
 0x4f3   :  { %v3924_v62 = vsel %vm3869_vm4, %v3923_v44, %v3919_v57  ;;  %v4009_v20 = vsel %vm4008_vm6, %v3888_v54, %v4007_v13  ;;  %v10066_v52 = vadd.f32 %v9967_v29, %v9940_v21  ;;  %v10070_v41 = vadd.f32 %v9967_v29, %v9936_v19 }
 0x4f4   :  { %v3933_v25 = vsel %vm3869_vm4, %v3932_v0, %v3928_v60  ;;  %v4011_v40 = vsel %vm4010_vm7, %v3897_v61, %v4009_v20  ;;  %v10075_v45 = vadd.f32 %v9967_v29, %v9946_v23  ;;  %v10079_v18 = vadd.f32 %v9967_v29, %v9938_v1 }
 0x4f5   :  { %v4013_v43 = vsel %vm4012_vm8, %v3906_v8, %v4011_v40  ;;  %v10083_v46 = vadd.f32 %v9967_v29, %v9950_v4  ;;  %v10088_v19 = vadd.f32 %v9967_v29, %v9942_v2  ;;  %v10092_v47 = vadd.f32 %v9967_v29, %v9955_v3 }
 0x4f6   :  { %v4015_v21 = vsel %vm4014_vm9, %v3915_v16, %v4013_v43  ;;  %v10096_v23 = vadd.f32 %v9967_v29, %v9944_v22  ;;  %v10101_v4 = vadd.f32 %v9967_v29, %v9962_v28  ;;  %v10105_v48 = vadd.f32 %v9967_v29, %v9948_v24 }
 0x4f7   :  { %v4017_v1 = vsel %vm4016_vm10, %v3924_v62, %v4015_v21  ;;  %v10108_v2 = vadd.f32 %v9967_v29, %v3771_v39  ;;  %v10113_v63 = vadd.f32 %v9967_v29, %v9952_v59  ;;  %v10116_v22 = vadd.f32 %v9967_v29, %v3777_v58 }
 0x4f8   :  { %v4019_v3 = vsel %vm4018_vm11, %v3933_v25, %v4017_v1  ;;  %v3937_v28 = vrot.slane %v10060_v5, %v9960_v6  ;;  %v3941_v24 = vrot.slane %v10066_v52, %v9965_v7  ;;  %v3946_v39 = vrot.slane %v10070_v41, %v9960_v6 }
 0x4f9   :  { %v4029_v53 = vsel %vm3420_vm2, %v4019_v3, -inf  ;;  %v3950_v49 = vrot.slane %v10075_v45, %v9965_v7  ;;  %v10129_v59 = vadd.f32 %v9967_v29, %v9957_v27  ;;  %v10132_v54 = vadd.f32 %v9967_v29, %v3783_v50 }
 0x4fa   :  { %4030 = vmax.xlane.f32.xlu1 %v4029_v53  ;;  %v3955_v55 = vrot.slane %v10079_v18, %v9960_v6  ;;  %v3959_v56 = vrot.slane %v10083_v46, %v9965_v7  ;;  %v3942_v57 = vsel %vm3869_vm4, %v3941_v24, %v3937_v28  ;;  %v3964_v60 = vrot.slane %v10088_v19, %v9960_v6 }
 0x4fb   :  { %v3951_v44 = vsel %vm3869_vm4, %v3950_v49, %v3946_v39  ;;  %v3968_v27 = vrot.slane %v10092_v47, %v9965_v7  ;;  %v3973_v29 = vrot.slane %v10096_v23, %v9960_v6  ;;  %v3977_v8 = vrot.slane %v10101_v4, %v9965_v7 }
 0x4fc   :  { %v3960_v61 = vsel %vm3869_vm4, %v3959_v56, %v3955_v55  ;;  %v3982_v0 = vrot.slane %v10105_v48, %v9960_v6  ;;  %v3986_v13 = vrot.slane %v10108_v2, %v9965_v7  ;;  %v3991_v58 = vrot.slane %v10113_v63, %v9960_v6 }
 0x4fd   :  { %v3995_v16 = vrot.slane %v10116_v22, %v9965_v7  ;;  %v4020_v62 = vsel %vm4006_vm5, %v3951_v44, %v3942_v57  ;;  %v3969_v20 = vsel %vm3869_vm4, %v3968_v27, %v3964_v60  ;;  %v4000_v25 = vrot.slane %v10129_v59, %v9960_v6 }
 0x4fe   :  { %v4004_v40 = vrot.slane %v10132_v54, %v9965_v7  ;;  %v4021_v43 = vsel %vm4008_vm6, %v3960_v61, %v4020_v62  ;;  %v3978_v21 = vsel %vm3869_vm4, %v3977_v8, %v3973_v29  ;;  %v3987_v3 = vsel %vm3869_vm4, %v3986_v13, %v3982_v0 }
 0x4ff   :  { %v4022_v1 = vsel %vm4010_vm7, %v3969_v20, %v4021_v43  ;;  %v3996_v50 = vsel %vm3869_vm4, %v3995_v16, %v3991_v58  ;;  %v10175_v56 = vsub.s32 2, %v9800_v15  ;;  %v10178_v57 = vsub.s32 1, %v9800_v15 }
 0x500   :  { %v4023_v28 = vsel %vm4012_vm8, %v3978_v21, %v4022_v1  ;;  %v4005_v24 = vsel %vm3869_vm4, %v4004_v40, %v4000_v25  ;;  %v10181_v60 = vsub.s32 3, %v9800_v15  ;;  %v10189_v13 = vsub.s32 4, %v9800_v15 }
 0x501   :  { %v4024_v53 = vsel %vm4014_vm9, %v3987_v3, %v4023_v28  ;;  %v10194_v20 = vsub.s32 5, %v9800_v15  ;;  %v10200_v21 = vsub.s32 6, %v9800_v15 }
 0x502   :  { %v4025_v39 = vsel %vm4016_vm10, %v3996_v50, %v4024_v53  ;;  %v10206_v50 = vsub.s32 7, %v9800_v15 }
 0x503   :  { %v4026_v49 = vsel %vm4018_vm11, %v4005_v24, %v4025_v39 }
 0x504   :  { %v4032_v55 = vsel %vm3420_vm2, %v4026_v49, -inf }
 0x505   :  { %4033 = vmax.xlane.f32.xlu1 %v4032_v55 }
 0x587   :  { %v4031_v44 = vpop.xlane.xlu1 %4030 }
 0x588   :  { %v4040_v27 = vrot.slane %v4031_v44, %v9804_v26  ;;  %v4048_v61 = vrot.slane %v4031_v44, %v10175_v56  ;;  %v4044_v8 = vrot.slane %v4031_v44, %v10178_v57  ;;  %v4052_v58 = vrot.slane %v4031_v44, %v10181_v60 }
 0x589   :  { %v4060_v3 = vrot.slane %v4031_v44, %v10194_v20  ;;  %v4064_v24 = vrot.slane %v4031_v44, %v10200_v21  ;;  %v4068_v15 = vrot.slane %v4031_v44, %v10206_v50 }
 0x58a   :  { %v4117_v29 = vsub.f32 %v9970_v12, %v4040_v27  ;;  %v4118_v0 = vsub.f32 %v9973_v30, %v4040_v27  ;;  %v4121_v16 = vsub.f32 %v9982_v14, %v4048_v61  ;;  %v4119_v25 = vsub.f32 %v9976_v31, %v4044_v8 }
 0x58b   :  { %v4056_v12 = vrot.slane %v4031_v44, %v10189_v13  ;;  %v4123_v43 = vsub.f32 %v9988_v32, %v4052_v58  ;;  %v4120_v1 = vsub.f32 %v9979_v9, %v4044_v8  ;;  %v4122_v32 = vsub.f32 %v9985_v10, %v4048_v61 }
 0x58c   :  { %v4149_v62 = vmul.f32 1.442695, %v4117_v29  ;;  %v4151_v40 = vmul.f32 1.442695, %v4118_v0  ;;  %v4157_v30 = vmul.f32 1.442695, %v4121_v16  ;;  %v4127_v39 = vsub.f32 %v10000_v35, %v4060_v3 }
 0x58d   :  { %v4153_v14 = vmul.f32 1.442695, %v4119_v25  ;;  %v4125_v28 = vsub.f32 %v9994_v42, %v4056_v12  ;;  %v4161_v31 = vmul.f32 1.442695, %v4123_v43  ;;  %v4155_v53 = vmul.f32 1.442695, %v4120_v1 }
 0x58e   :  { %8092 = vpow2.f32 %v4149_v62  ;;  %v4124_v55 = vsub.f32 %v9991_v33, %v4052_v58  ;;  %v4159_v42 = vmul.f32 1.442695, %v4122_v32  ;;  %v4129_v10 = vsub.f32 %v10006_v36, %v4064_v24 }
 0x58f   :  { %8094 = vpow2.f32 %v4151_v40  ;;  %v4165_v9 = vmul.f32 1.442695, %v4125_v28  ;;  %v4169_v27 = vmul.f32 1.442695, %v4127_v39  ;;  %v4126_v8 = vsub.f32 %v9997_v34, %v4056_v12 }
 0x590   :  { %8096 = vpow2.f32 %v4157_v30  ;;  %v4163_v33 = vmul.f32 1.442695, %v4124_v55  ;;  %v4131_v44 = vsub.f32 %v10012_v17, %v4068_v15  ;;  %v4173_v36 = vmul.f32 1.442695, %v4129_v10 }
 0x591   :  { %8098 = vpow2.f32 %v4153_v14  ;;  %v4128_v34 = vsub.f32 %v10003_v11, %v4060_v3  ;;  %v4167_v62 = vmul.f32 1.442695, %v4126_v8  ;;  %v4130_v11 = vsub.f32 %v10009_v37, %v4064_v24 }
 0x592   :  { %8100 = vpow2.f32 %v4161_v31  ;;  %v10219_v29 = vpop.xlane.xlu1 %4033  ;;  %v4177_v17 = vmul.f32 1.442695, %v4131_v44  ;;  %v4132_v37 = vsub.f32 %v10015_v38, %v4068_v15 }
 0x593   :  { %8102 = vpow2.f32 %v4155_v53  ;;  %v10229_v0 = vrot.slane %v10219_v29, %v10178_v57  ;;  %v10240_v25 = vrot.slane %v10219_v29, %v10175_v56  ;;  %v4171_v30 = vmul.f32 1.442695, %v4128_v34 }
 0x594   :  { %8104 = vpow2.f32 %v4165_v9  ;;  %v10253_v1 = vrot.slane %v10219_v29, %v10181_v60  ;;  %v4175_v31 = vmul.f32 1.442695, %v4130_v11  ;;  %v4072_v32 = vrot.slane %v10219_v29, %v9804_v26 }
 0x595   :  { %8106 = vpow2.f32 %v4159_v42  ;;  %v4135_v40 = vsub.f32 %v10070_v41, %v10229_v0  ;;  %v4137_v41 = vsub.f32 %v10079_v18, %v10240_v25  ;;  %v10268_v53 = vrot.slane %v10219_v29, %v10189_v13 }
 0x596   :  { %8108 = vpow2.f32 %v4169_v27  ;;  %v4139_v18 = vsub.f32 %v10088_v19, %v10253_v1  ;;  %v4179_v9 = vmul.f32 1.442695, %v4132_v37  ;;  %v4133_v55 = vsub.f32 %v10060_v5, %v4072_v32 }
 0x597   :  { %8110 = vpow2.f32 %v4163_v33  ;;  %v4185_v14 = vmul.f32 1.442695, %v4135_v40  ;;  %v4189_v24 = vmul.f32 1.442695, %v4137_v41  ;;  %v10281_v42 = vrot.slane %v10219_v29, %v10194_v20 }
 0x598   :  { %v10211_v49 = vpop.eup %8092  ;;  %8112 = vpow2.f32 %v4173_v36  ;;  %v4141_v19 = vsub.f32 %v10096_v23, %v10268_v53  ;;  %v4193_v15 = vmul.f32 1.442695, %v4139_v18  ;;  %v4134_v5 = vsub.f32 %v10066_v52, %v4072_v32 }
 0x599   :  { %4246 = vperm.xlu1 %7893, %v10211_v49   ;;  %v10217_v61 = vpop.eup %8094  ;;  %8114 = vpow2.f32 %v4167_v62  ;;  %v4181_v8 = vmul.f32 1.442695, %v4133_v55  ;;  %v4096_v33 = vrot.slane %v10219_v29, %v10200_v21  ;;  %v4143_v23 = vsub.f32 %v10105_v48, %v10281_v42 }
 0x59a   :  { %v10221_v35 = vpop.eup %8096  ;;  %8116 = vpow2.f32 %v4177_v17  ;;  %v4197_v44 = vmul.f32 1.442695, %v4141_v19  ;;  %v4136_v52 = vsub.f32 %v10075_v45, %v10229_v0  ;;  %v4183_v62 = vmul.f32 1.442695, %v4134_v5 }
 0x59b   :  { %4258 = vperm.xlu0 %7892, %v10221_v35   ;;  %v10231_v58 = vpop.eup %8098  ;;  %8118 = vpow2.f32 %v4171_v30  ;;  %v4100_v17 = vrot.slane %v10219_v29, %v10206_v50  ;;  %v4145_v48 = vsub.f32 %v10113_v63, %v4096_v33  ;;  %v4201_v40 = vmul.f32 1.442695, %v4143_v23 }
 0x59c   :  { %v10233_v16 = vpop.eup %8100  ;;  %8120 = vpow2.f32 %v4185_v14  ;;  %v4138_v45 = vsub.f32 %v10083_v46, %v10240_v25  ;;  %v4187_v0 = vmul.f32 1.442695, %v4136_v52  ;;  %v4140_v46 = vsub.f32 %v10092_v47, %v10253_v1 }
 0x59d   :  { %4249 = vperm.xlu1 %7893, %v10217_v61   ;;  %v10244_v12 = vpop.eup %8102  ;;  %8122 = vpow2.f32 %v4175_v31  ;;  %v4147_v41 = vsub.f32 %v10129_v59, %v4100_v17  ;;  %v4205_v29 = vmul.f32 1.442695, %v4145_v48  ;;  %v4142_v32 = vsub.f32 %v10101_v4, %v10268_v53 }
 0x59e   :  { %v10246_v43 = vpop.eup %8104  ;;  %8124 = vpow2.f32 %v4189_v24  ;;  %v4191_v37 = vmul.f32 1.442695, %v4138_v45  ;;  %v4195_v18 = vmul.f32 1.442695, %v4140_v46  ;;  %v4144_v47 = vsub.f32 %v10108_v2, %v10281_v42 }
 0x59f   :  { %4264 = vperm.xlu0 %7892, %v10233_v16   ;;  %v10257_v3 = vpop.eup %8106  ;;  %8126 = vpow2.f32 %v4179_v9  ;;  %v4209_v25 = vmul.f32 1.442695, %v4147_v41  ;;  %v4199_v1 = vmul.f32 1.442695, %v4142_v32  ;;  %v4146_v4 = vsub.f32 %v10116_v22, %v4096_v33 }
 0x5a0   :  { %v10259_v28 = vpop.eup %8108  ;;  %8128 = vpow2.f32 %v4193_v15  ;;  %v4203_v53 = vmul.f32 1.442695, %v4144_v47  ;;  %v4148_v2 = vsub.f32 %v10132_v54, %v4100_v17 }
 0x5a1   :  { %4252 = vperm.xlu1 %7893, %v10231_v58   ;;  %v10272_v39 = vpop.eup %8110  ;;  %8130 = vpow2.f32 %v4181_v8  ;;  %v4207_v42 = vmul.f32 1.442695, %v4146_v4 }
 0x5a2   :  { %v10274_v38 = vpop.eup %8112  ;;  %8132 = vpow2.f32 %v4197_v44  ;;  %v4211_v22 = vmul.f32 1.442695, %v4148_v2 }
 0x5a3   :  { %4270 = vperm.xlu0 %7892, %v10246_v43   ;;  %v10285_v10 = vpop.eup %8114  ;;  %8134 = vpow2.f32 %v4183_v62 }
 0x5a4   :  { %v10287_v27 = vpop.eup %8116  ;;  %8136 = vpow2.f32 %v4201_v40 }
 0x5a5   :  { %4255 = vperm.xlu1 %7893, %v10244_v12   ;;  %v10296_v36 = vpop.eup %8118  ;;  %8138 = vpow2.f32 %v4187_v0 }
 0x5a6   :  { %v10298_v34 = vpop.eup %8120  ;;  %8140 = vpow2.f32 %v4205_v29 }
 0x5a7   :  { %4276 = vperm.xlu0 %7892, %v10259_v28   ;;  %v10307_v11 = vpop.eup %8122  ;;  %8142 = vpow2.f32 %v4191_v37 }
 0x5a8   :  { %v10309_v30 = vpop.eup %8124  ;;  %8144 = vpow2.f32 %v4209_v25 }
 0x5a9   :  { %4261 = vperm.xlu1 %7893, %v10257_v3   ;;  %v10316_v63 = vpop.eup %8126  ;;  %8146 = vpow2.f32 %v4195_v18 }
 0x5aa   :  { %v10318_v14 = vpop.eup %8128  ;;  %8148 = vpow2.f32 %v4199_v1 }
 0x5ab   :  { %4282 = vperm.xlu0 %7892, %v10274_v38   ;;  %v10324_v31 = vpop.eup %8130  ;;  %8150 = vpow2.f32 %v4203_v53 }
 0x5ac   :  { %v10326_v59 = vpop.eup %8132  ;;  %8152 = vpow2.f32 %v4207_v42 }
 0x5ad   :  { %4267 = vperm.xlu1 %7893, %v10272_v39   ;;  %v10332_v24 = vpop.eup %8134  ;;  %8154 = vpow2.f32 %v4211_v22 }
 0x5ae   :  { %v10334_v9 = vpop.eup %8136 }
 0x5af   :  { %4288 = vperm.xlu0 %7892, %v10287_v27   ;;  %v10340_v55 = vpop.eup %8138 }
 0x5b0   :  { %v10342_v19 = vpop.eup %8140 }
 0x5b1   :  { %4273 = vperm.xlu1 %7893, %v10285_v10   ;;  %11062 = vst [vmem:[#allocation25_spill] sm:$0xff] %v10342_v19  ;;  %v10347_v15 = vpop.eup %8142 }
 0x5b2   :  { %v10349_v5 = vpop.eup %8144 }
 0x5b3   :  { %4300 = vperm.xlu0 %7892, %v10298_v34   ;;  %11063 = vst [vmem:[#allocation26_spill] sm:$0xff] %v10349_v5  ;;  %v10354_v8 = vpop.eup %8146 }
 0x5b4   :  { %v10357_v33 = vpop.eup %8148 }
 0x5b5   :  { %4279 = vperm.xlu1 %7893, %v10296_v36   ;;  %v10360_v23 = vpop.eup %8150 }
 0x5b6   :  { %v10363_v44 = vpop.eup %8152 }
 0x5b7   :  { %4306 = vperm.xlu0 %7892, %v10309_v30   ;;  %v10366_v54 = vpop.eup %8154 }
 0x5b8   :  { %11064 = vst [vmem:[#allocation27_spill] sm:$0xff] %v10366_v54 }
 0x5b9   :  { %4285 = vperm.xlu1 %7893, %v10307_v11  }
 0x5bb   :  { %4312 = vperm.xlu0 %7892, %v10318_v14  }
 0x5bd   :  { %4291 = vperm.xlu1 %7893, %v10316_v63  }
 0x5bf   :  { %4318 = vperm.xlu0 %7892, %v10326_v59  }
 0x5c1   :  { %4294 = vperm.xlu1 %7893, %v10324_v31  }
 0x5c3   :  { %4324 = vperm.xlu0 %7892, %v10334_v9  }
 0x5c5   :  { %4297 = vperm.xlu1 %7893, %v10332_v24  }
 0x5c7   :  { %4330 = vperm.xlu0 %7892, %v10342_v19  }
 0x5c9   :  { %4303 = vperm.xlu1 %7893, %v10340_v55  }
 0x5cb   :  { %4336 = vperm.xlu0 %7892, %v10349_v5  }
 0x5cd   :  { %4309 = vperm.xlu1 %7893, %v10347_v15  }
 0x5d1   :  { %4315 = vperm.xlu1 %7893, %v10354_v8  }
 0x5d5   :  { %4321 = vperm.xlu1 %7893, %v10357_v33  }
 0x5d9   :  { %4327 = vperm.xlu1 %7893, %v10360_v23  }
 0x5dd   :  { %4333 = vperm.xlu1 %7893, %v10363_v44  }
 0x5e1   :  { %4339 = vperm.xlu1 %7893, %v10366_v54  }
 0x618   :  { %v4247_v52 = vpop.permute.xlu1 %4246 }
 0x619   :  { %v4344_v51 = vrot.slane %v4247_v52, %v9960_v6 }
 0x61a   :  { %v4259_v62 = vpop.permute.xlu0 %4258 }
 0x61b   :  { %v4362_v42 = vrot.slane %v4259_v62, %v9960_v6 }
 0x61c   :  { %v4250_v17 = vpop.permute.xlu1 %4249 }
 0x61d   :  { %v4348_v4 = vrot.slane %v4250_v17, %v9965_v7 }
 0x61e   :  { %v4265_v48 = vpop.permute.xlu0 %4264 }
 0x61f   :  { %v4371_v5 = vrot.slane %v4265_v48, %v9960_v6 }
 0x620   :  { %v4253_v40 = vpop.permute.xlu1 %4252 }
 0x621   :  { %v4353_v53 = vrot.slane %v4253_v40, %v9960_v6  ;;  %v4349_v40 = vsel %vm3869_vm4, %v4348_v4, %v4344_v51 }
 0x622   :  { %v4271_v45 = vpop.permute.xlu0 %4270 }
 0x623   :  { %v4380_v54 = vrot.slane %v4271_v45, %v9960_v6 }
 0x624   :  { %v4256_v0 = vpop.permute.xlu1 %4255 }
 0x625   :  { %v4357_v32 = vrot.slane %v4256_v0, %v9965_v7 }
 0x626   :  { %v4277_v41 = vpop.permute.xlu0 %4276 }
 0x627   :  { %v4358_v0 = vsel %vm3869_vm4, %v4357_v32, %v4353_v53 }
 0x628   :  { %v4262_v29 = vpop.permute.xlu1 %4261  ;;  %v4485_v52 = vsel %vm4006_vm5, %v4358_v0, %v4349_v40 }
 0x629   :  { %v4366_v18 = vrot.slane %v4262_v29, %v9965_v7 }
 0x62a   :  { %v4283_v46 = vpop.permute.xlu0 %4282 }
 0x62b   :  { %v4367_v17 = vsel %vm3869_vm4, %v4366_v18, %v4362_v42  ;;  %v4398_v48 = vrot.slane %v4283_v46, %v9960_v6 }
 0x62c   :  { %v4268_v37 = vpop.permute.xlu1 %4267  ;;  %v4486_v45 = vsel %vm4008_vm6, %v4367_v17, %v4485_v52 }
 0x62d   :  { %v4375_v2 = vrot.slane %v4268_v37, %v9965_v7  ;;  %v4389_v37 = vrot.slane %v4277_v41, %v9960_v6 }
 0x62e   :  { %v4289_v47 = vpop.permute.xlu0 %4288 }
 0x62f   :  { %v4376_v62 = vsel %vm3869_vm4, %v4375_v2, %v4371_v5  ;;  %v4407_v5 = vrot.slane %v4289_v47, %v9960_v6 }
 0x630   :  { %v4274_v25 = vpop.permute.xlu1 %4273  ;;  %v4487_v53 = vsel %vm4010_vm7, %v4376_v62, %v4486_v45 }
 0x631   :  { %v4384_v22 = vrot.slane %v4274_v25, %v9965_v7 }
 0x632   :  { %v4301_v32 = vpop.permute.xlu0 %4300 }
 0x634   :  { %v4280_v1 = vpop.permute.xlu1 %4279 }
 0x635   :  { %v4393_v29 = vrot.slane %v4280_v1, %v9965_v7  ;;  %v4385_v1 = vsel %vm3869_vm4, %v4384_v22, %v4380_v54 }
 0x636   :  { %v4307_v42 = vpop.permute.xlu0 %4306 }
 0x637   :  { %v4394_v18 = vsel %vm3869_vm4, %v4393_v29, %v4389_v37 }
 0x638   :  { %v4286_v19 = vpop.permute.xlu1 %4285 }
 0x639   :  { %v4402_v25 = vrot.slane %v4286_v19, %v9965_v7  ;;  %v4488_v19 = vsel %vm4012_vm8, %v4385_v1, %v4487_v53 }
 0x63a   :  { %v4489_v46 = vsel %vm4014_vm9, %v4394_v18, %v4488_v19  ;;  %v4313_v40 = vpop.permute.xlu0 %4312  ;;  %v4434_v19 = vrot.slane %v4307_v42, %v9960_v6 }
 0x63b   :  { %v4403_v51 = vsel %vm3869_vm4, %v4402_v25, %v4398_v48 }
 0x63c   :  { %v4292_v41 = vpop.permute.xlu1 %4291  ;;  %v4490_v54 = vsel %vm4016_vm10, %v4403_v51, %v4489_v46  ;;  %v4425_v51 = vrot.slane %v4301_v32, %v9960_v6  ;;  %v4443_v46 = vrot.slane %v4313_v40, %v9960_v6 }
 0x63d   :  { %v4411_v4 = vrot.slane %v4292_v41, %v9965_v7 }
 0x63e   :  { %v4319_v37 = vpop.permute.xlu0 %4318 }
 0x63f   :  { %v4412_v2 = vsel %vm3869_vm4, %v4411_v4, %v4407_v5 }
 0x640   :  { %v4295_v22 = vpop.permute.xlu1 %4294  ;;  %v4491_v0 = vsel %vm4018_vm11, %v4412_v2, %v4490_v54 }
 0x641   :  { %v4501_v29 = vsel %vm3420_vm2, %v4491_v0, 0.0  ;;  %v4416_v2 = vrot.slane %v4295_v22, %v9960_v6 }
 0x642   :  { %4502 = vadd.xlane.f32.xlu0 %v4501_v29  ;;  %v4325_v52 = vpop.permute.xlu0 %4324  ;;  %v4452_v29 = vrot.slane %v4319_v37, %v9960_v6 }
 0x644   :  { %v4298_v17 = vpop.permute.xlu1 %4297 }
 0x645   :  { %v4420_v41 = vrot.slane %v4298_v17, %v9965_v7  ;;  %v4461_v17 = vrot.slane %v4325_v52, %v9960_v6 }
 0x646   :  { %v4331_v45 = vpop.permute.xlu0 %4330 }
 0x647   :  { %v4470_v40 = vrot.slane %v4331_v45, %v9960_v6 }
 0x648   :  { %v4304_v47 = vpop.permute.xlu1 %4303 }
 0x649   :  { %v4429_v1 = vrot.slane %v4304_v47, %v9965_v7 }
 0x64a   :  { %v4337_v22 = vpop.permute.xlu0 %4336 }
 0x64b   :  { %v4430_v54 = vsel %vm3869_vm4, %v4429_v1, %v4425_v51 }
 0x64c   :  { %v4310_v62 = vpop.permute.xlu1 %4309 }
 0x64d   :  { %v4438_v18 = vrot.slane %v4310_v62, %v9965_v7  ;;  %v4421_v62 = vsel %vm3869_vm4, %v4420_v41, %v4416_v2  ;;  %v4479_v41 = vrot.slane %v4337_v22, %v9960_v6 }
 0x64f   :  { %v4439_v32 = vsel %vm3869_vm4, %v4438_v18, %v4434_v19 }
 0x650   :  { %v4316_v25 = vpop.permute.xlu1 %4315 }
 0x651   :  { %v4447_v5 = vrot.slane %v4316_v25, %v9965_v7 }
 0x653   :  { %v4448_v42 = vsel %vm3869_vm4, %v4447_v5, %v4443_v46 }
 0x654   :  { %v4322_v48 = vpop.permute.xlu1 %4321 }
 0x655   :  { %v4456_v4 = vrot.slane %v4322_v48, %v9965_v7  ;;  %v4492_v48 = vsel %vm4006_vm5, %v4430_v54, %v4421_v62 }
 0x656   :  { %v4493_v37 = vsel %vm4008_vm6, %v4439_v32, %v4492_v48 }
 0x657   :  { %v4457_v1 = vsel %vm3869_vm4, %v4456_v4, %v4452_v29 }
 0x658   :  { %v4328_v53 = vpop.permute.xlu1 %4327 }
 0x659   :  { %v4465_v0 = vrot.slane %v4328_v53, %v9965_v7  ;;  %v4494_v53 = vsel %vm4010_vm7, %v4448_v42, %v4493_v37 }
 0x65a   :  { %v4495_v5 = vsel %vm4012_vm8, %v4457_v1, %v4494_v53 }
 0x65b   :  { %v4466_v18 = vsel %vm3869_vm4, %v4465_v0, %v4461_v17 }
 0x65c   :  { %v4334_v47 = vpop.permute.xlu1 %4333  ;;  %v4496_v19 = vsel %vm4014_vm9, %v4466_v18, %v4495_v5 }
 0x65d   :  { %v4474_v25 = vrot.slane %v4334_v47, %v9965_v7 }
 0x65f   :  { %v4475_v52 = vsel %vm3869_vm4, %v4474_v25, %v4470_v40 }
 0x660   :  { %v4340_v51 = vpop.permute.xlu1 %4339  ;;  %v4497_v4 = vsel %vm4016_vm10, %v4475_v52, %v4496_v19 }
 0x661   :  { %v4483_v45 = vrot.slane %v4340_v51, %v9965_v7 }
 0x663   :  { %v4484_v46 = vsel %vm3869_vm4, %v4483_v45, %v4479_v41 }
 0x664   :  { %v4498_v2 = vsel %vm4018_vm11, %v4484_v46, %v4497_v4 }
 0x665   :  { %v4504_v54 = vsel %vm3420_vm2, %v4498_v2, 0.0 }
 0x666   :  { %4505 = vadd.xlane.f32.xlu1 %v4504_v54 }
 0x6cf   :  { %v4503_v0 = vpop.xlane.xlu0 %4502 }
 0x6d0   :  { %v4512_v29 = vrot.slane %v4503_v0, %v9804_v26  ;;  %v4516_v32 = vrot.slane %v4503_v0, %v10178_v57  ;;  %v4520_v47 = vrot.slane %v4503_v0, %v10175_v56  ;;  %v4524_v17 = vrot.slane %v4503_v0, %v10181_v60 }
 0x6d1   :  { %v4528_v42 = vrot.slane %v4503_v0, %v10189_v13  ;;  %v4532_v48 = vrot.slane %v4503_v0, %v10194_v20  ;;  %v4536_v53 = vrot.slane %v4503_v0, %v10200_v21  ;;  %v4540_v51 = vrot.slane %v4503_v0, %v10206_v50 }
 0x6d2   :  { %8156 = vrcp.f32 %v4512_v29 }
 0x6d3   :  { %8158 = vrcp.f32 %v4516_v32 }
 0x6d4   :  { %8160 = vrcp.f32 %v4520_v47 }
 0x6d5   :  { %8162 = vrcp.f32 %v4524_v17 }
 0x6d6   :  { %8164 = vrcp.f32 %v4528_v42 }
 0x6d7   :  { %8166 = vrcp.f32 %v4532_v48 }
 0x6d8   :  { %8168 = vrcp.f32 %v4536_v53 }
 0x6d9   :  { %8170 = vrcp.f32 %v4540_v51 }
 0x6dc   :  { %v8157_v62 = vpop.eup %8156 }
 0x6dd   :  { %v4590_v25 = vmul.f32 %v8157_v62, %v10211_v49  ;;  %v4591_v40 = vmul.f32 %v8157_v62, %v10217_v61  ;;  %v8159_v22 = vpop.eup %8158 }
 0x6de   :  { %v4593_v1 = vmul.f32 %v8159_v22, %v10231_v58  ;;  %v4594_v37 = vmul.f32 %v8159_v22, %v10244_v12  ;;  %v8161_v18 = vpop.eup %8160 }
 0x6df   :  { %4654 = vperm.xlu0 %7892, %v4590_v25   ;;  %4657 = vperm.xlu1 %7893, %v4591_v40   ;;  %v4596_v49 = vmul.f32 %v8161_v18, %v10221_v35  ;;  %v4597_v61 = vmul.f32 %v8161_v18, %v10257_v3  ;;  %v8163_v52 = vpop.eup %8162 }
 0x6e0   :  { %v4599_v58 = vmul.f32 %v8163_v52, %v10233_v16  ;;  %v4600_v12 = vmul.f32 %v8163_v52, %v10272_v39  ;;  %v8165_v41 = vpop.eup %8164 }
 0x6e1   :  { %v4602_v5 = vmul.f32 %v8165_v41, %v10246_v43  ;;  %v4603_v35 = vmul.f32 %v8165_v41, %v10285_v10  ;;  %v8167_v45 = vpop.eup %8166 }
 0x6e2   :  { %v4605_v3 = vmul.f32 %v8167_v45, %v10259_v28  ;;  %v4606_v19 = vmul.f32 %v8167_v45, %v10296_v36  ;;  %v8169_v46 = vpop.eup %8168 }
 0x6e3   :  { %4660 = vperm.xlu0 %7892, %v4593_v1   ;;  %4663 = vperm.xlu1 %7893, %v4594_v37   ;;  %v4608_v2 = vmul.f32 %v8169_v46, %v10274_v38  ;;  %v4609_v43 = vmul.f32 %v8169_v46, %v10307_v11  ;;  %v8171_v10 = vpop.eup %8170 }
 0x6e4   :  { %v4611_v36 = vmul.f32 %v8171_v10, %v10287_v27  ;;  %v4612_v54 = vmul.f32 %v8171_v10, %v10316_v63 }
 0x6e7   :  { %4666 = vperm.xlu0 %7892, %v4596_v49   ;;  %4669 = vperm.xlu1 %7893, %v4597_v61  }
 0x6eb   :  { %4672 = vperm.xlu0 %7892, %v4599_v58   ;;  %4675 = vperm.xlu1 %7893, %v4600_v12  }
 0x6ef   :  { %4678 = vperm.xlu0 %7892, %v4602_v5   ;;  %4681 = vperm.xlu1 %7893, %v4603_v35  }
 0x6f3   :  { %4684 = vperm.xlu0 %7892, %v4605_v3   ;;  %4687 = vperm.xlu1 %7893, %v4606_v19   ;;  %v4506_v16 = vpop.xlane.xlu1 %4505 }
 0x6f4   :  { %v4544_v39 = vrot.slane %v4506_v16, %v9804_v26  ;;  %v4548_v4 = vrot.slane %v4506_v16, %v10178_v57  ;;  %v4552_v28 = vrot.slane %v4506_v16, %v10175_v56  ;;  %v4556_v0 = vrot.slane %v4506_v16, %v10181_v60 }
 0x6f5   :  { %v4560_v38 = vrot.slane %v4506_v16, %v10189_v13  ;;  %v4564_v56 = vrot.slane %v4506_v16, %v10194_v20  ;;  %v4568_v60 = vrot.slane %v4506_v16, %v10200_v21  ;;  %v4572_v20 = vrot.slane %v4506_v16, %v10206_v50 }
 0x6f6   :  { %8172 = vrcp.f32 %v4544_v39 }
 0x6f7   :  { %4690 = vperm.xlu0 %7892, %v4608_v2   ;;  %4693 = vperm.xlu1 %7893, %v4609_v43   ;;  %8174 = vrcp.f32 %v4548_v4 }
 0x6f8   :  { %8176 = vrcp.f32 %v4552_v28 }
 0x6f9   :  { %8178 = vrcp.f32 %v4556_v0 }
 0x6fa   :  { %8180 = vrcp.f32 %v4560_v38 }
 0x6fb   :  { %4696 = vperm.xlu0 %7892, %v4611_v36   ;;  %4699 = vperm.xlu1 %7893, %v4612_v54   ;;  %8182 = vrcp.f32 %v4564_v56 }
 0x6fc   :  { %8184 = vrcp.f32 %v4568_v60 }
 0x6fd   :  { %8186 = vrcp.f32 %v4572_v20 }
 0x700   :  { %v8173_v29 = vpop.eup %8172 }
 0x701   :  { %v4615_v11 = vmul.f32 %v8173_v29, %v10332_v24  ;;  %v4614_v32 = vmul.f32 %v8173_v29, %v10324_v31  ;;  %v8175_v47 = vpop.eup %8174 }
 0x702   :  { %v4618_v27 = vmul.f32 %v8175_v47, %v10340_v55  ;;  %v4617_v63 = vmul.f32 %v8175_v47, %v10298_v34  ;;  %v8177_v17 = vpop.eup %8176 }
 0x703   :  { %4872 = vperm.xlu1 %7893, %v4615_v11   ;;  %4869 = vperm.xlu0 %7892, %v4614_v32   ;;  %v4621_v13 = vmul.f32 %v8177_v17, %v10347_v15  ;;  %v4620_v31 = vmul.f32 %v8177_v17, %v10309_v30  ;;  %v8179_v24 = vpop.eup %8178 }
 0x704   :  { %v4624_v55 = vmul.f32 %v8179_v24, %v10354_v8  ;;  %v4623_v34 = vmul.f32 %v8179_v24, %v10318_v14  ;;  %v8181_v62 = vpop.eup %8180  ;;  %v11065_v8 = vld [vmem:[#allocation25_spill] sm:$0xff] }
 0x705   :  { %v4627_v21 = vmul.f32 %v8181_v62, %v10357_v33  ;;  %v4626_v15 = vmul.f32 %v8181_v62, %v10326_v59  ;;  %v8183_v42 = vpop.eup %8182  ;;  %v11066_v33 = vld [vmem:[#allocation27_spill] sm:$0xff]  ;;  %v11067_v59 = vld [vmem:[#allocation26_spill] sm:$0xff] }
 0x706   :  { %v4630_v30 = vmul.f32 %v8183_v42, %v10360_v23  ;;  %v4629_v25 = vmul.f32 %v8183_v42, %v10334_v9  ;;  %v8185_v50 = vpop.eup %8184 }
 0x707   :  { %4878 = vperm.xlu1 %7893, %v4618_v27   ;;  %4875 = vperm.xlu0 %7892, %v4617_v63   ;;  %v4633_v14 = vmul.f32 %v8185_v50, %v10363_v44  ;;  %v4632_v40 = vmul.f32 %v8185_v50, %v11065_v8  ;;  %v8187_v22 = vpop.eup %8186 }
 0x708   :  { %v4636_v48 = vmul.f32 %v8187_v22, %v11066_v33  ;;  %v4635_v1 = vmul.f32 %v8187_v22, %v11067_v59 }
 0x70b   :  { %4884 = vperm.xlu1 %7893, %v4621_v13   ;;  %4881 = vperm.xlu0 %7892, %v4620_v31  }
 0x70f   :  { %4890 = vperm.xlu1 %7893, %v4624_v55   ;;  %4887 = vperm.xlu0 %7892, %v4623_v34  }
 0x713   :  { %4896 = vperm.xlu1 %7893, %v4627_v21   ;;  %4893 = vperm.xlu0 %7892, %v4626_v15  }
 0x717   :  { %4902 = vperm.xlu1 %7893, %v4630_v30   ;;  %4899 = vperm.xlu0 %7892, %v4629_v25  }
 0x71b   :  { %4908 = vperm.xlu1 %7893, %v4633_v14   ;;  %4905 = vperm.xlu0 %7892, %v4632_v40  }
 0x71f   :  { %4914 = vperm.xlu1 %7893, %v4636_v48   ;;  %4911 = vperm.xlu0 %7892, %v4635_v1  }
 0x75e   :  { %v4655_v37 = vpop.permute.xlu0 %4654  ;;  %v4658_v23 = vpop.permute.xlu1 %4657 }
 0x75f   :  { %v4704_v3 = vrot.slane %v4655_v37, %v9960_v6  ;;  %v4708_v19 = vrot.slane %v4658_v23, %v9965_v7 }
 0x761   :  { %v4709_v0 = vsel %vm3869_vm4, %v4708_v19, %v4704_v3 }
 0x762   :  { %v4661_v18 = vpop.permute.xlu0 %4660  ;;  %v4664_v9 = vpop.permute.xlu1 %4663 }
 0x763   :  { %v4713_v58 = vrot.slane %v4661_v18, %v9960_v6  ;;  %v4717_v12 = vrot.slane %v4664_v9, %v9965_v7 }
 0x765   :  { %v4718_v2 = vsel %vm3869_vm4, %v4717_v12, %v4713_v58 }
 0x766   :  { %v4667_v53 = vpop.permute.xlu0 %4666  ;;  %v4670_v49 = vpop.permute.xlu1 %4669  ;;  %v4773_v32 = vsel %vm4006_vm5, %v4718_v2, %v4709_v0 }
 0x767   :  { %v4722_v41 = vrot.slane %v4667_v53, %v9960_v6  ;;  %v4726_v5 = vrot.slane %v4670_v49, %v9965_v7 }
 0x769   :  { %v4727_v28 = vsel %vm3869_vm4, %v4726_v5, %v4722_v41 }
 0x76a   :  { %v4673_v61 = vpop.permute.xlu0 %4672  ;;  %v4676_v52 = vpop.permute.xlu1 %4675  ;;  %v4774_v56 = vsel %vm4008_vm6, %v4727_v28, %v4773_v32 }
 0x76b   :  { %v4731_v46 = vrot.slane %v4673_v61, %v9960_v6  ;;  %v4735_v16 = vrot.slane %v4676_v52, %v9965_v7 }
 0x76d   :  { %v4736_v29 = vsel %vm3869_vm4, %v4735_v16, %v4731_v46 }
 0x76e   :  { %v4679_v44 = vpop.permute.xlu0 %4678  ;;  %v4682_v51 = vpop.permute.xlu1 %4681  ;;  %v4775_v63 = vsel %vm4010_vm7, %v4736_v29, %v4774_v56  ;;  %v10545_v56 = vld [vmem:[#allocation9] sm:$0xff] }
 0x76f   :  { %v4740_v39 = vrot.slane %v4679_v44, %v9960_v6  ;;  %v4744_v4 = vrot.slane %v4682_v51, %v9965_v7 }
 0x771   :  { %v4745_v47 = vsel %vm3869_vm4, %v4744_v4, %v4740_v39 }
 0x772   :  { %v4685_v35 = vpop.permute.xlu0 %4684  ;;  %v4688_v45 = vpop.permute.xlu1 %4687  ;;  %v4776_v31 = vsel %vm4012_vm8, %v4745_v47, %v4775_v63 }
 0x773   :  { %v4749_v43 = vrot.slane %v4685_v35, %v9960_v6  ;;  %v4753_v10 = vrot.slane %v4688_v45, %v9965_v7 }
 0x775   :  { %v4754_v27 = vsel %vm3869_vm4, %v4753_v10, %v4749_v43 }
 0x776   :  { %v4691_v36 = vpop.permute.xlu0 %4690  ;;  %v4694_v54 = vpop.permute.xlu1 %4693  ;;  %v4777_v55 = vsel %vm4014_vm9, %v4754_v27, %v4776_v31  ;;  %v10549_v27 = vld [vmem:[#allocation8] sm:$0xff] }
 0x777   :  { %v4758_v38 = vrot.slane %v4691_v36, %v9960_v6  ;;  %v4762_v11 = vrot.slane %v4694_v54, %v9965_v7 }
 0x779   :  { %v4763_v17 = vsel %vm3869_vm4, %v4762_v11, %v4758_v38 }
 0x77a   :  { %v4697_v60 = vpop.permute.xlu0 %4696  ;;  %v4700_v13 = vpop.permute.xlu1 %4699  ;;  %v4778_v34 = vsel %vm4016_vm10, %v4763_v17, %v4777_v55  ;;  %v5364_v17 = vld [vmem:[#allocation11] sm:$0xff]  ;;  %v5366_v55 = vld [vmem:[#allocation11 + $0x10] sm:$0xff] }
 0x77b   :  { %v4767_v24 = vrot.slane %v4697_v60, %v9960_v6  ;;  %v4771_v20 = vrot.slane %v4700_v13, %v9965_v7  ;;  %v5365_v60 = vld [vmem:[#allocation11 + $0x8] sm:$0xff] }
 0x77d   :  { %v4772_v62 = vsel %vm3869_vm4, %v4771_v20, %v4767_v24  ;;  %v10559_v20 = vpack.c.bf16 %v5365_v60, %v5364_v17  ;;  %v5269_v17 = vld [vmem:[%s11030_s11 + $0xd0] sm:$0xff]  ;;  %v5272_v60 = vld [vmem:[%s11030_s11 + $0xe8] sm:$0xff] }
 0x77e   :  { %v4779_v21 = vsel %vm4018_vm11, %v4772_v62, %v4778_v34  ;;  %v5367_v34 = vld [vmem:[#allocation11 + $0x18] sm:$0xff] }
 0x77f   :  { %7401 = vmatmul.mubr.msk.f32.vlgmr.msra.gmra.mrb[66].mxu1 %vm3420_vm2, %v4779_v21  ;;  %v10561_v62 = vld [vmem:[#allocation9 + $0x8] sm:$0xff]  ;;  %v10563_v21 = vld [vmem:[#allocation8 + $0x8] sm:$0xff] }
 0x780   :  { %7414 = vmatprep.mubr.msk.f32.mxu1 %vm3420_vm2, %v10549_v27 }
 0x782   :  { %v4870_v15 = vpop.permute.xlu0 %4869  ;;  %v4873_v42 = vpop.permute.xlu1 %4872 }
 0x783   :  { %v4919_v9 = vrot.slane %v4870_v15, %v9960_v6  ;;  %v4923_v53 = vrot.slane %v4873_v42, %v9965_v7  ;;  %v10566_v15 = vpack.c.bf16 %v5367_v34, %v5366_v55  ;;  %v5368_v42 = vld [vmem:[#allocation11 + $0x20] sm:$0xff]  ;;  %v5271_v34 = vld [vmem:[%s11030_s11 + $0xe0] sm:$0xff] }
 0x785   :  { %v4924_v45 = vsel %vm3869_vm4, %v4923_v53, %v4919_v9  ;;  %v5247_v53 = vld [vmem:[%s11030_s11 + $0x20] sm:$0xff] }
 0x786   :  { %v4876_v30 = vpop.permute.xlu0 %4875  ;;  %v4879_v25 = vpop.permute.xlu1 %4878 }
 0x787   :  { %v4928_v48 = vrot.slane %v4876_v30, %v9960_v6  ;;  %v4932_v59 = vrot.slane %v4879_v25, %v9965_v7  ;;  %v5369_v30 = vld [vmem:[#allocation11 + $0x28] sm:$0xff] }
 0x788   :  { %v10576_v25 = vpack.c.bf16 %v5369_v30, %v5368_v42  ;;  %v5273_v42 = vld [vmem:[%s11030_s11 + $0xf0] sm:$0xff] }
 0x789   :  { %v4933_v51 = vsel %vm3869_vm4, %v4932_v59, %v4928_v48  ;;  %v5243_v48 = vld [vmem:[%s11030_s11] sm:$0xff]  ;;  %v10728_v30 = vpack.c.bf16 %v5273_v42, %v5271_v34 }
 0x78a   :  { %v4882_v50 = vpop.permute.xlu0 %4881  ;;  %v4885_v14 = vpop.permute.xlu1 %4884  ;;  %v4988_v16 = vsel %vm4006_vm5, %v4933_v51, %v4924_v45 }
 0x78b   :  { %v4937_v1 = vrot.slane %v4882_v50, %v9960_v6  ;;  %v4941_v37 = vrot.slane %v4885_v14, %v9965_v7  ;;  %v11068_v50 = vmov 0.0   ;;  %v5370_v14 = vld [vmem:[#allocation11 + $0x30] sm:$0xff] }
 0x78d   :  { %v4942_v41 = vsel %vm3869_vm4, %v4941_v37, %v4937_v1  ;;  %v5245_v1 = vld [vmem:[%s11030_s11 + $0x10] sm:$0xff]  ;;  %v5248_v37 = vld [vmem:[%s11030_s11 + $0x28] sm:$0xff] }
 0x78e   :  { %v4888_v8 = vpop.permute.xlu0 %4887  ;;  %v4891_v40 = vpop.permute.xlu1 %4890  ;;  %v4989_v4 = vsel %vm4008_vm6, %v4942_v41, %v4988_v16  ;;  %v5256_v41 = vld [vmem:[%s11030_s11 + $0x68] sm:$0xff]  ;;  %v5262_v16 = vld [vmem:[%s11030_s11 + $0x98] sm:$0xff] }
 0x78f   :  { %v4946_v49 = vrot.slane %v4888_v8, %v9960_v6  ;;  %v4950_v61 = vrot.slane %v4891_v40, %v9965_v7  ;;  %v5371_v8 = vld [vmem:[#allocation11 + $0x38] sm:$0xff] }
 0x790   :  { %v10581_v40 = vpack.c.bf16 %v5371_v8, %v5370_v14 }
 0x791   :  { %v4951_v3 = vsel %vm3869_vm4, %v4950_v61, %v4946_v49  ;;  %v5249_v49 = vld [vmem:[%s11030_s11 + $0x30] sm:$0xff]  ;;  %v5252_v61 = vld [vmem:[%s11030_s11 + $0x48] sm:$0xff] }
 0x792   :  { %v4894_v22 = vpop.permute.xlu0 %4893  ;;  %v4897_v33 = vpop.permute.xlu1 %4896  ;;  %v4990_v43 = vsel %vm4010_vm7, %v4951_v3, %v4989_v4  ;;  %v5255_v3 = vld [vmem:[%s11030_s11 + $0x60] sm:$0xff] }
 0x793   :  { %v4955_v52 = vrot.slane %v4894_v22, %v9960_v6  ;;  %v4959_v44 = vrot.slane %v4897_v33, %v9965_v7  ;;  %v5244_v22 = vld [vmem:[%s11030_s11 + $0x8] sm:$0xff]  ;;  %v5246_v33 = vld [vmem:[%s11030_s11 + $0x18] sm:$0xff] }
 0x794   :  { %v10597_v59 = vpack.c.bf16 %v5246_v33, %v5244_v22 }
 0x795   :  { %v4960_v39 = vsel %vm3869_vm4, %v4959_v44, %v4955_v52  ;;  %v5254_v52 = vld [vmem:[%s11030_s11 + $0x58] sm:$0xff]  ;;  %v10626_v44 = vpack.c.bf16 %v5249_v49, %v5247_v53 }
 0x796   :  { %v4900_v23 = vpop.permute.xlu0 %4899  ;;  %v4903_v18 = vpop.permute.xlu1 %4902  ;;  %v4991_v54 = vsel %vm4012_vm8, %v4960_v39, %v4990_v43  ;;  %v10629_v51 = vpack.c.bf16 %v5254_v52, %v5252_v61  ;;  %v5261_v43 = vld [vmem:[%s11030_s11 + $0x90] sm:$0xff]  ;;  %v5483_v52 = vld [vmem:[#allocation12 + $0x8] sm:$0xff] }
 0x797   :  { %v4964_v58 = vrot.slane %v4900_v23, %v9960_v6  ;;  %v4968_v12 = vrot.slane %v4903_v18, %v9965_v7  ;;  %v5250_v23 = vld [vmem:[%s11030_s11 + $0x38] sm:$0xff]  ;;  %v10608_v18 = vpack.c.bf16 %v5245_v1, %v5243_v48 }
 0x798   :  { %v10610_v9 = vpack.c.bf16 %v5250_v23, %v5248_v37  ;;  %v5482_v61 = vld [vmem:[#allocation12] sm:$0xff] }
 0x799   :  { %v4969_v2 = vsel %vm3869_vm4, %v4968_v12, %v4964_v58  ;;  %v5251_v58 = vld [vmem:[%s11030_s11 + $0x40] sm:$0xff]  ;;  %v5253_v12 = vld [vmem:[%s11030_s11 + $0x50] sm:$0xff] }
 0x79a   :  { %v4906_v5 = vpop.permute.xlu0 %4905  ;;  %v4909_v35 = vpop.permute.xlu1 %4908  ;;  %v4992_v38 = vsel %vm4014_vm9, %v4969_v2, %v4991_v54  ;;  %v5259_v2 = vld [vmem:[%s11030_s11 + $0x80] sm:$0xff] }
 0x79b   :  { %v4973_v19 = vrot.slane %v4906_v5, %v9960_v6  ;;  %v4977_v46 = vrot.slane %v4909_v35, %v9965_v7  ;;  %v5258_v5 = vld [vmem:[%s11030_s11 + $0x78] sm:$0xff]  ;;  %v10644_v35 = vpack.c.bf16 %v5253_v12, %v5251_v58  ;;  %v5484_v58 = vld [vmem:[#allocation12 + $0x10] sm:$0xff]  ;;  %v10743_v12 = vpack.c.bf16 %v5483_v52, %v5482_v61 }
 0x79c   :  { %v10647_v45 = vpack.c.bf16 %v5258_v5, %v5256_v41  ;;  %v5485_v41 = vld [vmem:[#allocation12 + $0x18] sm:$0xff] }
 0x79d   :  { %v4978_v10 = vsel %vm3869_vm4, %v4977_v46, %v4973_v19  ;;  %v5257_v19 = vld [vmem:[%s11030_s11 + $0x70] sm:$0xff]  ;;  %v5260_v46 = vld [vmem:[%s11030_s11 + $0x88] sm:$0xff]  ;;  %v10745_v5 = vpack.c.bf16 %v5485_v41, %v5484_v58 }
 0x79e   :  { %v4912_v28 = vpop.permute.xlu0 %4911  ;;  %v4915_v36 = vpop.permute.xlu1 %4914  ;;  %v4993_v11 = vsel %vm4016_vm10, %v4978_v10, %v4992_v38  ;;  %v10662_v39 = vpack.c.bf16 %v5257_v19, %v5255_v3  ;;  %v10665_v4 = vpack.c.bf16 %v5262_v16, %v5260_v46  ;;  %v5264_v10 = vld [vmem:[%s11030_s11 + $0xa8] sm:$0xff]  ;;  %v5486_v3 = vld [vmem:[#allocation12 + $0x20] sm:$0xff]  ;;  %v5487_v19 = vld [vmem:[#allocation12 + $0x28] sm:$0xff] }
 0x79f   :  { %v4982_v0 = vrot.slane %v4912_v28, %v9960_v6  ;;  %v4986_v29 = vrot.slane %v4915_v36, %v9965_v7  ;;  %v5266_v28 = vld [vmem:[%s11030_s11 + $0xb8] sm:$0xff]  ;;  %v10680_v36 = vpack.c.bf16 %v5261_v43, %v5259_v2  ;;  %v5268_v38 = vld [vmem:[%s11030_s11 + $0xc8] sm:$0xff]  ;;  %v10750_v46 = vpack.c.bf16 %v5487_v19, %v5486_v3  ;;  %v5275_v16 = vld [vmem:[%s11031_s12] sm:$0x3] }
 0x7a0   :  { %v10683_v54 = vpack.c.bf16 %v5266_v28, %v5264_v10  ;;  %v10759_v2 = vrot.slane %v5275_v16, %v9804_v26  ;;  %v10764_v43 = vld [vmem:[%s11033_s14] ss:$0 sm:$0xff]  ;;  %v10787_v3 = vrot.slane %v5275_v16, %v10178_v57 }
 0x7a1   :  { %v4987_v32 = vsel %vm3869_vm4, %v4986_v29, %v4982_v0  ;;  %v5263_v0 = vld [vmem:[%s11030_s11 + $0xa0] sm:$0xff]  ;;  %v5265_v29 = vld [vmem:[%s11030_s11 + $0xb0] sm:$0xff] }
 0x7a2   :  { %v4994_v47 = vsel %vm4018_vm11, %v4987_v32, %v4993_v11  ;;  %v5270_v11 = vld [vmem:[%s11030_s11 + $0xd8] sm:$0xff]  ;;  %v10698_v32 = vpack.c.bf16 %v5265_v29, %v5263_v0 }
 0x7a3   :  { %7408 = vmatmul.mubr.msk.f32.vlgmr.msra.gmra.mrb[68].mxu0 %vm3420_vm2, %v4994_v47  ;;  %v10701_v47 = vpack.c.bf16 %v5270_v11, %v5268_v38 }
 0x7a4   :  { %7421 = vmatprep.mubr.msk.f32.mxu0 %vm3420_vm2, %v10545_v56 }
 0x852   :  { %v10553_v7 = vpop.f32.mrb[66].mxu1 }
 0x853   :  { %v7402_v63 = vpop.f32.mrb[67].mxu1 }
 0x854   :  { %v5267_v63 = vld [vmem:[%s11030_s11 + $0xc0] sm:$0xff] }
 0x876   :  { %v10555_v13 = vpop.f32.mrb[68].mxu0 }
 0x877   :  { %v7626_v31 = vpack.c.bf16 %v10555_v13, %v10553_v7  ;;  %v7409_v24 = vpop.f32.mrb[69].mxu0 }
 0x878   :  { %v10716_v24 = vpack.c.bf16 %v5269_v17, %v5267_v63 }
 0x879   :  { %7627 = vmatprep.subr.bf16.mxu1 %v7626_v31  ;;  %7631 = vmatprep.subr.bf16.mxu0 %v7626_v31 }
 0x87a   :  { %7629 = vmatpush3.bf16.msra.mxu1 %v7626_v31  ;;  %7633 = vmatpush3.bf16.msra.mxu0 %v7626_v31  ;;  %v5274_v31 = vld [vmem:[%s11030_s11 + $0xf8] sm:$0xff] }
 0x87b   :  { %7667 = vmatprep.subr.bf16.mxu0 %v10559_v20  ;;  %7635 = vmatprep.subr.bf16.mxu1 %v10597_v59  ;;  %v10719_v55 = vpack.c.bf16 %v5274_v31, %v5272_v60 }
 0x87d   :  { %7422 = vmatmul.mubr.msk.f32.vlgmr.msra.gmra.mrb[70].mxu0 %vm3420_vm2, %v10561_v62  ;;  %7415 = vmatmul.mubr.msk.f32.vlgmr.msra.gmra.mrb[68].mxu1 %vm3420_vm2, %v10563_v21 }
 0x87e   :  { %7669 = vmatpush3.bf16.msra.mxu0 %v10559_v20  ;;  %7440 = vmatprep.mubr.msk.f32.mxu0 %vm1362_vm0, %v10553_v7 }
 0x87f   :  { %7671 = vmatprep.subr.bf16.mxu0 %v10566_v15  ;;  %5351 = vmatprep.mubr.f32.mxu1 %v11068_v50 }
 0x880   :  { %7637 = vmatpush1.bf16.msra.mxu1 %v10608_v18 }
 0x881   :  { %7639 = vmatprep.subr.bf16.mxu1 %v10610_v9 }
 0x882   :  { %7673 = vmatpush3.bf16.msra.mxu0 %v10566_v15 }
 0x883   :  { %7675 = vmatprep.subr.bf16.mxu0 %v10576_v25 }
 0x884   :  { %7641 = vmatpush1.bf16.msra.mxu1 %v10626_v44 }
 0x885   :  { %7643 = vmatprep.subr.bf16.mxu1 %v10629_v51 }
 0x886   :  { %7677 = vmatpush3.bf16.msra.mxu0 %v10576_v25 }
 0x887   :  { %7679 = vmatprep.subr.bf16.mxu0 %v10581_v40 }
 0x888   :  { %7645 = vmatpush1.bf16.msra.mxu1 %v10644_v35 }
 0x889   :  { %7647 = vmatprep.subr.bf16.mxu1 %v10647_v45 }
 0x88a   :  { %7681 = vmatpush3.bf16.msra.mxu0 %v10581_v40 }
 0x88b   :  { %7683 = vmatprep.subr.bf16.mxu0 %v10743_v12 }
 0x88c   :  { %7649 = vmatpush1.bf16.msra.mxu1 %v10662_v39 }
 0x88d   :  { %7441 = vmatmul.mubr.msk.f32.vlgmr.msra.gmra.mrb[72].mxu0 %vm1362_vm0, %v10555_v13  ;;  %7651 = vmatprep.subr.bf16.mxu1 %v10665_v4 }
 0x88e   :  { %7685 = vmatpush3.bf16.msra.mxu0 %v10743_v12 }
 0x88f   :  { %7687 = vmatprep.subr.bf16.mxu0 %v10745_v5 }
 0x890   :  { %7653 = vmatpush1.bf16.msra.mxu1 %v10680_v36 }
 0x891   :  { %7655 = vmatprep.subr.bf16.mxu1 %v10683_v54 }
 0x892   :  { %7689 = vmatpush3.bf16.msra.mxu0 %v10745_v5 }
 0x893   :  { %7691 = vmatprep.subr.bf16.mxu0 %v10750_v46 }
 0x894   :  { %7657 = vmatpush1.bf16.msra.mxu1 %v10698_v32 }
 0x895   :  { %7659 = vmatprep.subr.bf16.mxu1 %v10701_v47 }
 0x896   :  { %7693 = vmatpush3.bf16.msra.mxu0 %v10750_v46 }
 0x898   :  { %7661 = vmatpush1.bf16.msra.mxu1 %v10716_v24 }
 0x899   :  { %7663 = vmatprep.subr.bf16.mxu1 %v10719_v55 }
 0x89c   :  { %7665 = vmatpush1.bf16.msra.mxu1 %v10728_v30 }
 0x950   :  { %v7423_v14 = vpop.f32.mrb[70].mxu0  ;;  %v7416_v8 = vpop.f32.mrb[68].mxu1 }
 0x951   :  { %5237 = vrot.lane.b32.xlu1 %v7423_v14, %s8480_s1  ;;  %v5224_v22 = vpop.f32.mrb[71].mxu0  ;;  %v5141_v33 = vpop.f32.mrb[69].mxu1 }
 0x952   :  { %5235 = vrot.lane.b32.xlu0 %v5224_v22, %s8480_s1  ;;  %v5489_v22 = vld [vmem:[#allocation12 + $0x38] sm:$0xff] }
 0x955   :  { %5476 = vrot.lane.b32.xlu1 %v10555_v13, %s8480_s1 }
 0x956   :  { %5474 = vrot.lane.b32.xlu0 %v10553_v7, %s8480_s1 }
 0x960   :  { %v7442_v48 = vpop.f32.mrb[72].mxu0 }
 0x961   :  { %v5451_v1 = vpop.f32.mrb[73].mxu0  ;;  %v5457_v63 = vadd.f32 %v7442_v48, %v10764_v43 }
 0x962   :  { %v5452_v28 = vadd.f32 %v10764_v43, %v5451_v1 }
 0x9c3   :  { %v5238_v53 = vpop.permute.xlu1 %5237 }
 0x9c4   :  { %v5236_v37 = vpop.permute.xlu0 %5235  ;;  %v5242_v49 = vsel %vm1362_vm0, %v7416_v8, %v5238_v53  ;;  %v5488_v8 = vld [vmem:[#allocation12 + $0x30] sm:$0xff] }
 0x9c5   :  { %v5241_v23 = vsel %vm1362_vm0, %v5141_v33, %v5236_v37  ;;  %v10770_v33 = vpack.c.bf16 %v5489_v22, %v5488_v8 }
 0x9c6   :  { %5352 = vmatmul.mubr.f32.vlgmr.msra.gmra.mrb[70].mxu1 %v5241_v23 }
 0x9c7   :  { %5357 = vmatprep.mubr.f32.mxu1 %v11068_v50  ;;  %7695 = vmatprep.subr.bf16.mxu0 %v10770_v33  ;;  %v10778_v61 = vpop.permute.xlu1 %5476 }
 0x9c8   :  { %7697 = vmatpush3.bf16.msra.mxu0 %v10770_v33  ;;  %v10774_v23 = vpop.permute.xlu0 %5474 }
 0x9ca   :  { %5358 = vmatmul.mubr.f32.gmra.mrb[72].mxu1 %v5242_v49 }
 0x9cb   :  { %7473 = vmatprep.mubr.msk.f32.mxu1 %vm3420_vm2, %v10545_v56 }
 0xa99   :  { %v5353_v10 = vpop.f32.mrb[70].mxu1 }
 0xa9a   :  { %v5354_v0 = vadd.f32 %v5353_v10, %v10759_v2  ;;  %v5355_v29 = vpop.f32.mrb[71].mxu1 }
 0xa9b   :  { %v5356_v10 = vadd.f32 %v5355_v29, %v10787_v3 }
 0xa9c   :  { %v5460_v38 = vadd.f32 %v5452_v28, %v5354_v0  ;;  %v10791_v0 = vld [vmem:[#allocation14] ss:$0 sm:$0xff] }
 0xa9d   :  { %v5359_v11 = vpop.f32.mrb[72].mxu1 }
 0xa9e   :  { %v6993_v17 = vmul.f32 -1.442695, %v5460_v38  ;;  %v5360_v60 = vadd.f32 %v5359_v11, %v10759_v2  ;;  %v5361_v26 = vpop.f32.mrb[73].mxu1 }
 0xa9f   :  { %v5362_v19 = vadd.f32 %v5361_v26, %v10787_v3 }
 0xaa0   :  { %8188 = vpow2.f32 %v6993_v17  ;;  %v5461_v31 = vadd.f32 %v5457_v63, %v5360_v60 }
 0xaa2   :  { %v6994_v34 = vmul.f32 -1.442695, %v5461_v31 }
 0xaa4   :  { %8190 = vpow2.f32 %v6994_v34 }
 0xaaa   :  { %v8189_v42 = vpop.eup %8188 }
 0xaab   :  { %v5468_v14 = vadd.f32 1.0, %v8189_v42 }
 0xaad   :  { %8192 = vrcp.f32 %v5468_v14 }
 0xaae   :  { %v8191_v1 = vpop.eup %8190 }
 0xaaf   :  { %v5469_v37 = vadd.f32 1.0, %v8191_v1 }
 0xab1   :  { %8194 = vrcp.f32 %v5469_v37 }
 0xab7   :  { %v8193_v48 = vpop.eup %8192 }
 0xab8   :  { %v5480_v53 = vmul.f32 %v8193_v48, %v10774_v23  ;;  %v5588_v34 = vsub.f32 1.0, %v8193_v48 }
 0xaba   :  { %5492 = vrot.lane.b32.xlu0 %v5480_v53, %s8480_s1  ;;  %v5590_v14 = vmul.f32 %v5588_v34, %v10553_v7 }
 0xabb   :  { %v8195_v49 = vpop.eup %8194 }
 0xabc   :  { %v5481_v52 = vmul.f32 %v8195_v49, %v10778_v61  ;;  %v5589_v31 = vsub.f32 1.0, %v8195_v49 }
 0xabe   :  { %5494 = vrot.lane.b32.xlu1 %v5481_v52, %s8480_s1  ;;  %v5591_v26 = vmul.f32 %v5589_v31, %v10555_v13 }
 0xb2c   :  { %v5493_v58 = vpop.permute.xlu0 %5492 }
 0xb2d   :  { %7459 = vmatprep.mubr.msk.f32.mxu0 %vm1362_vm0, %v5493_v58 }
 0xb30   :  { %v5495_v41 = vpop.permute.xlu1 %5494 }
 0xb31   :  { %7460 = vmatmul.mubr.msk.f32.vlgmr.msra.gmra.mrb[74].mxu0 %vm1362_vm0, %v5495_v41 }
 0xb32   :  { %7466 = vmatprep.mubr.msk.f32.mxu0 %vm3420_vm2, %v10549_v27 }
 0xc04   :  { %v7461_v28 = vpop.f32.mrb[74].mxu0 }
 0xc05   :  { %v5576_v38 = vadd.f32 %v7461_v28, %v5362_v19  ;;  %v5566_v11 = vpop.f32.mrb[75].mxu0 }
 0xc06   :  { %v5575_v63 = vadd.f32 %v5566_v11, %v5356_v10 }
 0xc07   :  { %v5585_v17 = vadd.f32 %v10791_v0, %v5576_v38 }
 0xc08   :  { %v5584_v60 = vadd.f32 %v10791_v0, %v5575_v63 }
 0xc09   :  { %8196 = vtanh.f32 %v5585_v17 }
 0xc0a   :  { %8198 = vtanh.f32 %v5584_v60 }
 0xc13   :  { %v8197_v57 = vpop.eup %8196 }
 0xc14   :  { %v8199_v16 = vpop.eup %8198  ;;  %v5593_v42 = vmul.f32 %v8197_v57, %v8195_v49 }
 0xc15   :  { %v5592_v29 = vmul.f32 %v8199_v16, %v8193_v48 }
 0xc16   :  { %v10797_v8 = vadd.f32 %v5593_v42, %v5591_v26 }
 0xc17   :  { %v10799_v22 = vadd.f32 %v5592_v29, %v5590_v14 }
 0xc19   :  { %v7698_v1 = vpack.c.bf16 %v10797_v8, %v10799_v22 }
 0xc1b   :  { %7699 = vmatprep.subr.bf16.mxu0 %v7698_v1  ;;  %7703 = vmatprep.subr.bf16.mxu1 %v7698_v1 }
 0xc1c   :  { %7701 = vmatpush3.bf16.msra.mxu0 %v7698_v1  ;;  %7705 = vmatpush3.bf16.msra.mxu1 %v7698_v1 }
 0xc1d   :  { %7707 = vmatprep.subr.bf16.mxu0 %v10597_v59  ;;  %7755 = vmatprep.subr.bf16.mxu1 %v10743_v12 }
 0xc1f   :  { %7474 = vmatmul.mubr.msk.f32.vlgmr.msra.gmra.mrb[74].mxu1 %vm3420_vm2, %v10561_v62  ;;  %7467 = vmatmul.mubr.msk.f32.vlgmr.msra.gmra.mrb[76].mxu0 %vm3420_vm2, %v10563_v21 }
 0xc20   :  { %7709 = vmatpush1.bf16.msra.mxu0 %v10608_v18  ;;  %5820 = vmatprep.mubr.f32.mxu0 %v11068_v50 }
 0xc21   :  { %7711 = vmatprep.subr.bf16.mxu0 %v10610_v9  ;;  %7757 = vmatpush3.bf16.msra.mxu1 %v10743_v12 }
 0xc22   :  { %7759 = vmatprep.subr.bf16.mxu1 %v10745_v5 }
 0xc24   :  { %7713 = vmatpush1.bf16.msra.mxu0 %v10626_v44 }
 0xc25   :  { %7715 = vmatprep.subr.bf16.mxu0 %v10629_v51  ;;  %7761 = vmatpush3.bf16.msra.mxu1 %v10745_v5 }
 0xc26   :  { %7763 = vmatprep.subr.bf16.mxu1 %v10750_v46 }
 0xc28   :  { %7717 = vmatpush1.bf16.msra.mxu0 %v10644_v35 }
 0xc29   :  { %7719 = vmatprep.subr.bf16.mxu0 %v10647_v45  ;;  %7765 = vmatpush3.bf16.msra.mxu1 %v10750_v46 }
 0xc2a   :  { %7767 = vmatprep.subr.bf16.mxu1 %v10770_v33 }
 0xc2c   :  { %7721 = vmatpush1.bf16.msra.mxu0 %v10662_v39 }
 0xc2d   :  { %7723 = vmatprep.subr.bf16.mxu0 %v10665_v4  ;;  %7769 = vmatpush3.bf16.msra.mxu1 %v10770_v33 }
 0xc30   :  { %7725 = vmatpush1.bf16.msra.mxu0 %v10680_v36 }
 0xc31   :  { %7727 = vmatprep.subr.bf16.mxu0 %v10683_v54 }
 0xc34   :  { %7729 = vmatpush1.bf16.msra.mxu0 %v10698_v32 }
 0xc35   :  { %7731 = vmatprep.subr.bf16.mxu0 %v10701_v47 }
 0xc38   :  { %7733 = vmatpush1.bf16.msra.mxu0 %v10716_v24 }
 0xc39   :  { %7735 = vmatprep.subr.bf16.mxu0 %v10719_v55 }
 0xc3c   :  { %7737 = vmatpush1.bf16.msra.mxu0 %v10728_v30 }
 0xc3d   :  { %7739 = vmatprep.subr.bf16.mxu0 %v10559_v20 }
 0xcf2   :  { %v7475_v7 = vpop.f32.mrb[74].mxu1  ;;  %v7468_v13 = vpop.f32.mrb[76].mxu0 }
 0xcf3   :  { %5750 = vrot.lane.b32.xlu1 %v7475_v7, %s8480_s1  ;;  %v5737_v37 = vpop.f32.mrb[75].mxu1  ;;  %v5662_v48 = vpop.f32.mrb[77].mxu0 }
 0xcf4   :  { %5748 = vrot.lane.b32.xlu0 %v5737_v37, %s8480_s1 }
 0xcf7   :  { %5930 = vrot.lane.b32.xlu1 %v10797_v8, %s8480_s1 }
 0xcf8   :  { %5928 = vrot.lane.b32.xlu0 %v10799_v22, %s8480_s1 }
 0xd65   :  { %v5751_v52 = vpop.permute.xlu1 %5750 }
 0xd66   :  { %v5749_v53 = vpop.permute.xlu0 %5748  ;;  %v5755_v58 = vsel %vm1362_vm0, %v7468_v13, %v5751_v52 }
 0xd67   :  { %v5754_v49 = vsel %vm1362_vm0, %v5662_v48, %v5749_v53 }
 0xd68   :  { %5821 = vmatmul.mubr.f32.vlgmr.msra.gmra.mrb[78].mxu0 %v5754_v49 }
 0xd69   :  { %7741 = vmatpush3.bf16.msra.mxu0 %v10559_v20  ;;  %5826 = vmatprep.mubr.f32.mxu0 %v11068_v50  ;;  %v5931_v7 = vpop.permute.xlu1 %5930 }
 0xd6a   :  { %7743 = vmatprep.subr.bf16.mxu0 %v10566_v15  ;;  %v5929_v37 = vpop.permute.xlu0 %5928 }
 0xd6c   :  { %5827 = vmatmul.mubr.f32.gmra.mrb[80].mxu0 %v5755_v58 }
 0xd6d   :  { %7745 = vmatpush3.bf16.msra.mxu0 %v10566_v15  ;;  %7492 = vmatprep.mubr.msk.f32.mxu0 %vm1362_vm0, %v10799_v22 }
 0xd6e   :  { %7747 = vmatprep.subr.bf16.mxu0 %v10576_v25 }
 0xd71   :  { %7749 = vmatpush3.bf16.msra.mxu0 %v10576_v25 }
 0xd72   :  { %7751 = vmatprep.subr.bf16.mxu0 %v10581_v40 }
 0xd75   :  { %7753 = vmatpush3.bf16.msra.mxu0 %v10581_v40 }
 0xd78   :  { %7493 = vmatmul.mubr.msk.f32.vlgmr.msra.gmra.mrb[82].mxu0 %vm1362_vm0, %v10797_v8 }
 0xd79   :  { %7525 = vmatprep.mubr.msk.f32.mxu0 %vm3420_vm2, %v10545_v56 }
 0xe3b   :  { %v5822_v41 = vpop.f32.mrb[78].mxu0 }
 0xe3c   :  { %v5824_v19 = vpop.f32.mrb[79].mxu0  ;;  %v5823_v60 = vadd.f32 %v5822_v41, %v10759_v2 }
 0xe3d   :  { %v5825_v41 = vadd.f32 %v5824_v19, %v10787_v3 }
 0xe3f   :  { %v5828_v10 = vpop.f32.mrb[80].mxu0 }
 0xe40   :  { %v5830_v28 = vpop.f32.mrb[81].mxu0  ;;  %v5829_v11 = vadd.f32 %v5828_v10, %v10759_v2 }
 0xe41   :  { %v5831_v58 = vadd.f32 %v5830_v28, %v10787_v3 }
 0xe4b   :  { %v7494_v38 = vpop.f32.mrb[82].mxu0 }
 0xe4c   :  { %v5911_v63 = vadd.f32 %v7494_v38, %v10764_v43  ;;  %v5905_v17 = vpop.f32.mrb[83].mxu0 }
 0xe4d   :  { %v5906_v31 = vadd.f32 %v10764_v43, %v5905_v17 }
 0xe4e   :  { %v5915_v34 = vadd.f32 %v5911_v63, %v5829_v11 }
 0xe4f   :  { %v5914_v57 = vadd.f32 %v5906_v31, %v5823_v60 }
 0xe50   :  { %v7005_v16 = vmul.f32 -1.442695, %v5915_v34 }
 0xe51   :  { %v7004_v42 = vmul.f32 -1.442695, %v5914_v57 }
 0xe52   :  { %8200 = vpow2.f32 %v7005_v16 }
 0xe53   :  { %8202 = vpow2.f32 %v7004_v42 }
 0xe5c   :  { %v8201_v56 = vpop.eup %8200 }
 0xe5d   :  { %v8203_v26 = vpop.eup %8202  ;;  %v5923_v29 = vadd.f32 1.0, %v8201_v56 }
 0xe5e   :  { %v5922_v14 = vadd.f32 1.0, %v8203_v26 }
 0xe5f   :  { %8204 = vrcp.f32 %v5923_v29 }
 0xe60   :  { %8206 = vrcp.f32 %v5922_v14 }
 0xe69   :  { %v8205_v1 = vpop.eup %8204 }
 0xe6a   :  { %v8207_v13 = vpop.eup %8206  ;;  %v5935_v48 = vmul.f32 %v8205_v1, %v5931_v7  ;;  %v6028_v31 = vsub.f32 1.0, %v8205_v1  ;;  %v6481_v7 = vld [vmem:[%s11036_s17 + $0x28] sm:$0xff] }
 0xe6b   :  { %v5934_v53 = vmul.f32 %v8207_v13, %v5929_v37  ;;  %v6027_v34 = vsub.f32 1.0, %v8207_v13 }
 0xe6c   :  { %5940 = vrot.lane.b32.xlu1 %v5935_v48, %s8480_s1 }
 0xe6d   :  { %5938 = vrot.lane.b32.xlu0 %v5934_v53, %s8480_s1  ;;  %v6029_v19 = vmul.f32 %v6027_v34, %v10799_v22  ;;  %v6479_v22 = vld [vmem:[%s11036_s17 + $0x18] sm:$0xff]  ;;  %v6486_v34 = vld [vmem:[%s11036_s17 + $0x50] sm:$0xff] }
 0xede   :  { %v5941_v52 = vpop.permute.xlu1 %5940 }
 0xedf   :  { %v5939_v49 = vpop.permute.xlu0 %5938 }
 0xee0   :  { %7511 = vmatprep.mubr.msk.f32.mxu1 %vm1362_vm0, %v5939_v49 }
 0xee1   :  { %7512 = vmatmul.mubr.msk.f32.vlgmr.msra.gmra.mrb[76].mxu1 %vm1362_vm0, %v5941_v52 }
 0xee2   :  { %7518 = vmatprep.mubr.msk.f32.mxu1 %vm3420_vm2, %v10549_v27  ;;  %v6030_v27 = vmul.f32 %v6028_v31, %v10797_v8 }
 0xfb4   :  { %v7513_v10 = vpop.f32.mrb[76].mxu1 }
 0xfb5   :  { %v6022_v38 = vadd.f32 %v7513_v10, %v5831_v58  ;;  %v6012_v11 = vpop.f32.mrb[77].mxu1 }
 0xfb6   :  { %v6021_v63 = vadd.f32 %v6012_v11, %v5825_v41  ;;  %v6483_v11 = vld [vmem:[%s11036_s17 + $0x38] sm:$0xff] }
 0xfb7   :  { %v6024_v17 = vadd.f32 %v10791_v0, %v6022_v38  ;;  %v6482_v38 = vld [vmem:[%s11036_s17 + $0x30] sm:$0xff] }
 0xfb8   :  { %v6023_v60 = vadd.f32 %v10791_v0, %v6021_v63  ;;  %v6484_v63 = vld [vmem:[%s11036_s17 + $0x40] sm:$0xff] }
 0xfb9   :  { %8208 = vtanh.f32 %v6024_v17  ;;  %v7854_v17 = vpack.c.bf16 %v6483_v11, %v6482_v38 }
 0xfba   :  { %8210 = vtanh.f32 %v6023_v60  ;;  %v6485_v60 = vld [vmem:[%s11036_s17 + $0x48] sm:$0xff] }
 0xfbb   :  { %v7858_v31 = vpack.c.bf16 %v6485_v60, %v6484_v63 }
 0xfc3   :  { %v8209_v57 = vpop.eup %8208 }
 0xfc4   :  { %v8211_v16 = vpop.eup %8210  ;;  %v6032_v42 = vmul.f32 %v8209_v57, %v8205_v1  ;;  %v6480_v1 = vld [vmem:[%s11036_s17 + $0x20] sm:$0xff]  ;;  %v6487_v57 = vld [vmem:[%s11036_s17 + $0x58] sm:$0xff] }
 0xfc5   :  { %v6031_v28 = vmul.f32 %v8211_v16, %v8207_v13  ;;  %v7850_v13 = vpack.c.bf16 %v6481_v7, %v6480_v1  ;;  %v7862_v16 = vpack.c.bf16 %v6487_v57, %v6486_v34 }
 0xfc6   :  { %v10871_v56 = vadd.f32 %v6032_v42, %v6030_v27  ;;  %v6488_v42 = vld [vmem:[%s11036_s17 + $0x60] sm:$0xff]  ;;  %v6489_v27 = vld [vmem:[%s11036_s17 + $0x68] sm:$0xff] }
 0xfc7   :  { %v10873_v26 = vadd.f32 %v6031_v28, %v6029_v19  ;;  %v7866_v28 = vpack.c.bf16 %v6489_v27, %v6488_v42  ;;  %v6490_v19 = vld [vmem:[%s11036_s17 + $0x70] sm:$0xff] }
 0xfc9   :  { %v7770_v29 = vpack.c.bf16 %v10871_v56, %v10873_v26 }
 0xfcb   :  { %7771 = vmatprep.subr.bf16.mxu1 %v7770_v29  ;;  %7775 = vmatprep.subr.bf16.mxu0 %v7770_v29 }
 0xfcc   :  { %7773 = vmatpush3.bf16.msra.mxu1 %v7770_v29  ;;  %7777 = vmatpush3.bf16.msra.mxu0 %v7770_v29  ;;  %v6491_v29 = vld [vmem:[%s11036_s17 + $0x78] sm:$0xff] }
 0xfcd   :  { %7811 = vmatprep.subr.bf16.mxu0 %v10559_v20  ;;  %7779 = vmatprep.subr.bf16.mxu1 %v10597_v59 }
 0xfcf   :  { %7526 = vmatmul.mubr.msk.f32.vlgmr.msra.gmra.mrb[84].mxu0 %vm3420_vm2, %v10561_v62  ;;  %7519 = vmatmul.mubr.msk.f32.vlgmr.msra.gmra.mrb[78].mxu1 %vm3420_vm2, %v10563_v21 }
 0xfd0   :  { %7813 = vmatpush3.bf16.msra.mxu0 %v10559_v20  ;;  %7544 = vmatprep.mubr.msk.f32.mxu0 %vm1362_vm0, %v10873_v26 }
 0xfd1   :  { %7815 = vmatprep.subr.bf16.mxu0 %v10566_v15  ;;  %7781 = vmatpush1.bf16.msra.mxu1 %v10608_v18 }
 0xfd2   :  { %7783 = vmatprep.subr.bf16.mxu1 %v10610_v9  ;;  %6259 = vmatprep.mubr.f32.mxu1 %v11068_v50 }
 0xfd4   :  { %7817 = vmatpush3.bf16.msra.mxu0 %v10566_v15 }
 0xfd5   :  { %7819 = vmatprep.subr.bf16.mxu0 %v10576_v25  ;;  %7785 = vmatpush1.bf16.msra.mxu1 %v10626_v44 }
 0xfd6   :  { %7787 = vmatprep.subr.bf16.mxu1 %v10629_v51 }
 0xfd8   :  { %7821 = vmatpush3.bf16.msra.mxu0 %v10576_v25 }
 0xfd9   :  { %7823 = vmatprep.subr.bf16.mxu0 %v10581_v40  ;;  %7789 = vmatpush1.bf16.msra.mxu1 %v10644_v35 }
 0xfda   :  { %7791 = vmatprep.subr.bf16.mxu1 %v10647_v45 }
 0xfdc   :  { %7825 = vmatpush3.bf16.msra.mxu0 %v10581_v40 }
 0xfdd   :  { %7793 = vmatpush1.bf16.msra.mxu1 %v10662_v39  ;;  %7827 = vmatprep.subr.bf16.mxu0 %v10743_v12 }
 0xfde   :  { %7795 = vmatprep.subr.bf16.mxu1 %v10665_v4 }
 0xfdf   :  { %7545 = vmatmul.mubr.msk.f32.vlgmr.msra.gmra.mrb[86].mxu0 %vm1362_vm0, %v10871_v56 }
 0xfe0   :  { %7829 = vmatpush3.bf16.msra.mxu0 %v10743_v12 }
 0xfe1   :  { %7797 = vmatpush1.bf16.msra.mxu1 %v10680_v36  ;;  %7831 = vmatprep.subr.bf16.mxu0 %v10745_v5 }
 0xfe2   :  { %7799 = vmatprep.subr.bf16.mxu1 %v10683_v54 }
 0xfe4   :  { %7833 = vmatpush3.bf16.msra.mxu0 %v10745_v5 }
 0xfe5   :  { %7801 = vmatpush1.bf16.msra.mxu1 %v10698_v32  ;;  %7835 = vmatprep.subr.bf16.mxu0 %v10750_v46 }
 0xfe6   :  { %7803 = vmatprep.subr.bf16.mxu1 %v10701_v47 }
 0xfe8   :  { %7837 = vmatpush3.bf16.msra.mxu0 %v10750_v46 }
 0xfe9   :  { %7805 = vmatpush1.bf16.msra.mxu1 %v10716_v24  ;;  %7839 = vmatprep.subr.bf16.mxu0 %v10770_v33 }
 0xfea   :  { %7807 = vmatprep.subr.bf16.mxu1 %v10719_v55 }
 0xfec   :  { %7841 = vmatpush3.bf16.msra.mxu0 %v10770_v33  ;;  %v6476_v33 = vld [vmem:[%s11036_s17] sm:$0xff] }
 0xfed   :  { %7809 = vmatpush1.bf16.msra.mxu1 %v10728_v30 }
0x10a2   :  { %v7527_v20 = vpop.f32.mrb[84].mxu0  ;;  %v7520_v62 = vpop.f32.mrb[78].mxu1 }
0x10a3   :  { %6189 = vrot.lane.b32.xlu1 %v7527_v20, %s8480_s1  ;;  %v6176_v21 = vpop.f32.mrb[85].mxu0  ;;  %v6101_v15 = vpop.f32.mrb[79].mxu1  ;;  %v7870_v20 = vpack.c.bf16 %v6491_v29, %v6490_v19 }
0x10a4   :  { %6187 = vrot.lane.b32.xlu0 %v6176_v21, %s8480_s1 }
0x10a7   :  { %6369 = vrot.lane.b32.xlu1 %v10871_v56, %s8480_s1 }
0x10a8   :  { %6367 = vrot.lane.b32.xlu0 %v10873_v26, %s8480_s1 }
0x10b2   :  { %v7546_v25 = vpop.f32.mrb[86].mxu0 }
0x10b3   :  { %v6344_v40 = vpop.f32.mrb[87].mxu0  ;;  %v6350_v54 = vadd.f32 %v7546_v25, %v10764_v43 }
0x10b4   :  { %v6345_v35 = vadd.f32 %v10764_v43, %v6344_v40  ;;  %v6478_v43 = vld [vmem:[%s11036_s17 + $0x10] sm:$0xff] }
0x10b5   :  { %v7846_v14 = vpack.c.bf16 %v6479_v22, %v6478_v43 }
0x1115   :  { %v6190_v9 = vpop.permute.xlu1 %6189 }
0x1116   :  { %v6188_v59 = vpop.permute.xlu0 %6187  ;;  %v6194_v44 = vsel %vm1362_vm0, %v7520_v62, %v6190_v9 }
0x1117   :  { %v6193_v18 = vsel %vm1362_vm0, %v6101_v15, %v6188_v59 }
0x1118   :  { %6260 = vmatmul.mubr.f32.vlgmr.msra.gmra.mrb[80].mxu1 %v6193_v18 }
0x1119   :  { %6265 = vmatprep.mubr.f32.mxu1 %v11068_v50  ;;  %v6370_v52 = vpop.permute.xlu1 %6369 }
0x111a   :  { %v6368_v48 = vpop.permute.xlu0 %6367 }
0x111c   :  { %6266 = vmatmul.mubr.f32.gmra.mrb[82].mxu1 %v6194_v44 }
0x11eb   :  { %v6261_v51 = vpop.f32.mrb[80].mxu1 }
0x11ec   :  { %v6262_v45 = vadd.f32 %v6261_v51, %v10759_v2  ;;  %v10929_v39 = vpop.f32.mrb[81].mxu1 }
0x11ed   :  { %v6264_v21 = vadd.f32 %v10929_v39, %v10787_v3 }
0x11ee   :  { %v6353_v4 = vadd.f32 %v6345_v35, %v6262_v45 }
0x11ef   :  { %v6267_v36 = vpop.f32.mrb[82].mxu1 }
0x11f0   :  { %v7014_v32 = vmul.f32 -1.442695, %v6353_v4  ;;  %v6268_v47 = vadd.f32 %v6267_v36, %v10759_v2  ;;  %v10933_v24 = vpop.f32.mrb[83].mxu1  ;;  %v6477_v2 = vld [vmem:[%s11036_s17 + $0x8] sm:$0xff] }
0x11f1   :  { %v7842_v8 = vpack.c.bf16 %v6477_v2, %v6476_v33  ;;  %v6270_v62 = vadd.f32 %v10933_v24, %v10787_v3  ;;  %v7018_v24 = vld [vmem:[#allocation15] ss:$0 sm:$0xff]  ;;  %v7019_v2 = vld [vmem:[#allocation17] ss:$0 sm:$0xff] }
0x11f2   :  { %8212 = vpow2.f32 %v7014_v32  ;;  %v6354_v50 = vadd.f32 %v6350_v54, %v6268_v47 }
0x11f3   :  { %7843 = vmatprep.subr.bf16.mxu1 %v7842_v8 }
0x11f4   :  { %v7015_v55 = vmul.f32 -1.442695, %v6354_v50  ;;  %7845 = vmatpush3.bf16.msra.mxu1 %v7842_v8 }
0x11f5   :  { %7847 = vmatprep.subr.bf16.mxu1 %v7846_v14 }
0x11f6   :  { %8214 = vpow2.f32 %v7015_v55 }
0x11f8   :  { %7849 = vmatpush3.bf16.msra.mxu1 %v7846_v14 }
0x11f9   :  { %7851 = vmatprep.subr.bf16.mxu1 %v7850_v13 }
0x11fc   :  { %v8213_v30 = vpop.eup %8212  ;;  %7853 = vmatpush3.bf16.msra.mxu1 %v7850_v13 }
0x11fd   :  { %v6361_v12 = vadd.f32 1.0, %v8213_v30  ;;  %7855 = vmatprep.subr.bf16.mxu1 %v7854_v17 }
0x11ff   :  { %8216 = vrcp.f32 %v6361_v12 }
0x1200   :  { %v8215_v5 = vpop.eup %8214  ;;  %7857 = vmatpush3.bf16.msra.mxu1 %v7854_v17 }
0x1201   :  { %v6362_v46 = vadd.f32 1.0, %v8215_v5  ;;  %7859 = vmatprep.subr.bf16.mxu1 %v7858_v31 }
0x1203   :  { %8218 = vrcp.f32 %v6362_v46 }
0x1204   :  { %7861 = vmatpush3.bf16.msra.mxu1 %v7858_v31 }
0x1205   :  { %7863 = vmatprep.subr.bf16.mxu1 %v7862_v16 }
0x1208   :  { %7865 = vmatpush3.bf16.msra.mxu1 %v7862_v16 }
0x1209   :  { %v8217_v37 = vpop.eup %8216  ;;  %7867 = vmatprep.subr.bf16.mxu1 %v7866_v28 }
0x120a   :  { %v6373_v53 = vmul.f32 %v8217_v37, %v6368_v48  ;;  %v6466_v51 = vsub.f32 1.0, %v8217_v37 }
0x120c   :  { %6377 = vrot.lane.b32.xlu0 %v6373_v53, %s8480_s1  ;;  %7869 = vmatpush3.bf16.msra.mxu1 %v7866_v28  ;;  %v6468_v54 = vmul.f32 %v6466_v51, %v10873_v26 }
0x120d   :  { %v8219_v49 = vpop.eup %8218  ;;  %7871 = vmatprep.subr.bf16.mxu1 %v7870_v20 }
0x120e   :  { %v6374_v58 = vmul.f32 %v8219_v49, %v6370_v52  ;;  %v6467_v44 = vsub.f32 1.0, %v8219_v49 }
0x1210   :  { %6379 = vrot.lane.b32.xlu1 %v6374_v58, %s8480_s1  ;;  %7873 = vmatpush3.bf16.msra.mxu1 %v7870_v20  ;;  %v6469_v4 = vmul.f32 %v6467_v44, %v10871_v56  ;;  %v6576_v56 = vld [vmem:[%s11038_s19] sm:$0xff]  ;;  %s8481_s19 = smov [#allocation18]  }
0x1211   :  { %s6623_s30 = sshll.u32 %s8481_s19, 4  ;;  %s6624_s30 = int_to_ptr.vmem [resolvable:$true] %s6623_s30 }
0x1212   :  { %s8430_s9 = scalar_lea.vmem %s6624_s30, 32  ;;  %p8435_p3 = scmp.lt.s32.totalorder %s6624_s30, %s6624_s30 }
0x1213   :  { %p8431_p2 = scmp.ne.s32.totalorder %s6624_s30, %s8430_s9  ;;  %p8436_p4 = scmp.lt.s32.totalorder %s8430_s9, %s8430_s9 }
0x1215   :  { %p8437_p5 = por %p8436_p4, %p8435_p3 }
0x1217   :  { %p8438_p6 = pnand %p8437_p5, %p8431_p2 }
0x127e   :  { %v6378_v41 = vpop.permute.xlu0 %6377 }
0x127f   :  { %7563 = vmatprep.mubr.msk.f32.mxu0 %vm1362_vm0, %v6378_v41 }
0x1282   :  { %v6380_v10 = vpop.permute.xlu1 %6379 }
0x1283   :  { %7564 = vmatmul.mubr.msk.f32.vlgmr.msra.gmra.mrb[88].mxu0 %vm1362_vm0, %v6380_v10 }
0x1356   :  { %v7565_v15 = vpop.f32.mrb[88].mxu0 }
0x1357   :  { %v6461_v25 = vadd.f32 %v7565_v15, %v6270_v62  ;;  %v6451_v40 = vpop.f32.mrb[89].mxu0 }
0x1358   :  { %v6460_v59 = vadd.f32 %v6451_v40, %v6264_v21 }
0x1359   :  { %v6463_v18 = vadd.f32 %v10791_v0, %v6461_v25 }
0x135a   :  { %v6462_v9 = vadd.f32 %v10791_v0, %v6460_v59 }
0x135b   :  { %8220 = vtanh.f32 %v6463_v18 }
0x135c   :  { %8222 = vtanh.f32 %v6462_v9 }
0x1365   :  { %v8221_v35 = vpop.eup %8220 }
0x1366   :  { %v8223_v45 = vpop.eup %8222  ;;  %v6471_v36 = vmul.f32 %v8221_v35, %v8219_v49 }
0x1367   :  { %v6470_v3 = vmul.f32 %v8223_v45, %v8217_v37 }
0x1368   :  { %v6473_v39 = vadd.f32 %v6471_v36, %v6469_v4 }
0x1369   :  { %v6472_v32 = vadd.f32 %v6470_v3, %v6468_v54 }
0x136a   :  { %v6475_v0 = vsel %vm1362_vm0, %v6473_v39, %v10778_v61 }
0x136b   :  { %v6474_v47 = vsel %vm1362_vm0, %v6472_v32, %v10774_v23 }
0x136c   :  { %7598 = vmatprep.mubr.f32.mxu1 %v6474_v47 }
0x136d   :  { %7599 = vmatmul.mubr.f32.vlgmr.msra.gmra.mrb[84].mxu1 %v6475_v0 }
0x1440   :  { %v7600_v50 = vpop.f32.mrb[84].mxu1 }
0x1441   :  { %v6571_v55 = vadd.f32 %v7600_v50, %v7018_v24  ;;  %v6565_v30 = vpop.f32.mrb[85].mxu1 }
0x1442   :  { %v6566_v12 = vadd.f32 %v7018_v24, %v6565_v30 }
0x1443   :  { %8224 = vtanh.f32 %v6571_v55 }
0x1444   :  { %8226 = vtanh.f32 %v6566_v12 }
0x144d   :  { %v8225_v26 = vpop.eup %8224 }
0x144e   :  { %v8227_v5 = vpop.eup %8226  ;;  %v6578_v46 = vmul.f32 %v8225_v26, %v6576_v56 }
0x144f   :  { %v6577_v23 = vmul.f32 %v8227_v5, %v6576_v56 }
0x1450   :  { %v6582_v33 = vsel %vm1362_vm0, %v6578_v46, 0.0 }
0x1451   :  { %6583 = vadd.xlane.f32.xlu1 %v6582_v33  ;;  %v6579_v61 = vsel %vm1362_vm0, %v6577_v23, 0.0 }
0x1452   :  { %6580 = vadd.xlane.f32.xlu0 %v6579_v61 }
0x1468   :  { %6592 = vbcast.lane.b32.xlu0 %v7019_v2, 256 }
0x14de   :  { %v6584_v8 = vpop.xlane.xlu1 %6583 }
0x14df   :  { %v6581_v43 = vpop.xlane.xlu0 %6580 }
0x14e3   :  { %v6593_v22 = vpop.permute.xlu0 %6592 }
0x14e4   :  { %v6595_v14 = vadd.f32 %v6593_v22, %v6581_v43  ;;  %v6596_v1 = vadd.f32 %v6593_v22, %v6584_v8 }
0x14e6   :  { %6603 = vperm.xlu0 %7892, %v6596_v1   ;;  %6600 = vperm.xlu1 %7893, %v6595_v14  }
0x1565   :  { %v6604_v7 = vpop.permute.xlu0 %6603  ;;  %v6601_v13 = vpop.permute.xlu1 %6600 }
0x1566   :  { %v6612_v37 = vrot.slane %v6604_v7, %v9960_v6  ;;  %v6608_v48 = vrot.slane %v6601_v13, %v9960_v6 }
0x1568   :  { %v6613_v53 = vsel %vm4006_vm5, %v6612_v37, %v6608_v48 }
0x1569   :  { %6616 = vst.msk [vmem:[#allocation18] sm:$0x3] %vm6615_vm12, %v6613_v53 }
0x156a   :  { %8441 = shalt.err (!%p8438_p6)
}
0x156b   :  { %s8442_s7 = scalar_lea.hbm %s11040_s21, 32 }
0x156c   :  { %p8443_p7 = scmp.ne.s32.totalorder %s11040_s21, %s8442_s7  ;;  %p8446_p8 = scmp.lt.u32.totalorder %s8442_s7, %s11040_s21 }
0x156e   :  { %p8448_p9 = pnand %p8446_p8, %p8443_p7 }
0x1570   :  { %8451 = shalt.err (!%p8448_p9)
}
0x1571   :  { %6626 = dma.vmem_to_hbm [thread:$0]  %s6624_s30, 32, %s11040_s21, [#allocation5]  }
0x1572   :  { %8462 = dma.done.wait [#allocation5], 32  }
0x1573   :  { %8463 = vsyncadd [#allocation5], 4294967264 }
0x1574   :  { %6630 = vsyncpa [#allocation4], 1 }
0x1575   :  { %6631 = vsyncpa [#allocation7], 1 }
0x1576   :  { %6632 = vsyncpa [#allocation10], 1 }
0x1577   :  { %6633 = vsyncpa [#allocation13], 1 }
0x1578   :  { %6634 = vsyncpa [#allocation16], 1 }
0x1579   :  { %6635 = vsyncpa [#allocation5], 1 }

</bundles_post_ra>
